<compile_context>
chip_gen: v5e
topology: v5e:2x2
jax: 0.10.0
libtpu: 0.0.40
codegen_flags: <defaults>
</compile_context>

<pallas_src>
import functools

import jax
import jax.numpy as jnp
from jax.experimental import pallas as pl
from jax.experimental.pallas import tpu as pltpu


def _round_up(a, b):
    return (a + b - 1) // b * b


# ---------------------------------------------------------------------------
# Single fused kernel: per-chunk prologue (batched encoder + input->gate
# projection), sequential recurrence, per-chunk epilogue (batched decoder +
# masked RMSE accumulation).  Grid = time chunks, sequential ("arbitrary").
# ---------------------------------------------------------------------------
def lstm_fused_kernel(x_ref, tgt_ref, wmask_ref,
                      w1_ref, b1_ref, w2_ref, b2_ref,
                      wih_ref, bl_ref, whh_ref,
                      w3_ref, b3_ref, w4_ref, b4_ref,
                      traj_ref, loss_ref,
                      xg_scr, hbuf_scr, h_scr, c_scr):
    chunk = pl.program_id(0)
    tc, n_pad, gp4 = xg_scr.shape
    gp = gp4 // 4                       # padded per-gate lane width (== HP)
    hp = h_scr.shape[1]
    out_pad = traj_ref.shape[2]
    rows = tc * n_pad

    @pl.when(chunk == 0)
    def _():
        h_scr[...] = jnp.zeros_like(h_scr)
        c_scr[...] = jnp.zeros_like(c_scr)
        loss_ref[...] = jnp.zeros_like(loss_ref)

    # ---- chunk prologue: everything that does not depend on h, batched over
    #      all tc * n_pad rows (time-parallel MXU work, off the serial chain).
    x2 = x_ref[...].reshape(rows, x_ref.shape[2])
    enc = jnp.dot(x2.astype(w1_ref.dtype), w1_ref[...],
                  preferred_element_type=jnp.float32) + b1_ref[...]
    enc = jnp.maximum(enc, 0.0)
    enc = jnp.dot(enc.astype(w2_ref.dtype), w2_ref[...],
                  preferred_element_type=jnp.float32) + b2_ref[...]
    xg = jnp.dot(enc.astype(wih_ref.dtype), wih_ref[...],
                 preferred_element_type=jnp.float32) + bl_ref[...]
    xg_scr[...] = xg.reshape(tc, n_pad, gp4)

    # ---- sequential recurrence: per step one (N_pad, HP)x(HP, 4*GP) matmul +
    #      VPU/EUP elementwise work on lane-aligned 128-wide gate slabs.
    def step(t, carry):
        h, c = carry
        gates = xg_scr[t] + jnp.dot(h.astype(whh_ref.dtype), whh_ref[...],
                                    preferred_element_type=jnp.float32)
        i_g = jax.nn.sigmoid(gates[:, 0 * gp:1 * gp])
        f_g = jax.nn.sigmoid(gates[:, 1 * gp:2 * gp])
        g_g = jnp.tanh(gates[:, 2 * gp:3 * gp])
        o_g = jax.nn.sigmoid(gates[:, 3 * gp:4 * gp])
        c_new = f_g * c + i_g * g_g
        h_new = o_g * jnp.tanh(c_new)
        hbuf_scr[t] = h_new            # stays in VMEM; consumed by the epilogue
        return (h_new, c_new)

    h, c = jax.lax.fori_loop(0, tc, step, (h_scr[...], c_scr[...]),
                             unroll=min(8, tc))
    h_scr[...] = h
    c_scr[...] = c

    # ---- chunk epilogue: batched decoder (pro3 -> pro4) + masked RMSE loss.
    hc = hbuf_scr[...].reshape(rows, hp)
    out = jnp.dot(hc.astype(w3_ref.dtype), w3_ref[...],
                  preferred_element_type=jnp.float32) + b3_ref[...]
    tra = jnp.dot(out.astype(w4_ref.dtype), w4_ref[...],
                  preferred_element_type=jnp.float32) + b4_ref[...]
    traj_ref[...] = tra.reshape(tc, n_pad, out_pad)   # lane-dense store

    d = tra - tgt_ref[...].reshape(rows, out_pad)     # padded lanes diff == 0
    rmse = jnp.sqrt(jnp.sum(d * d, axis=-1, keepdims=True))      # (rows, 1)
    lw = wmask_ref[...].reshape(rows, 1)               # 1/N on valid rows else 0
    loss_ref[...] += jnp.sum(rmse * lw, keepdims=True)


# ---------------------------------------------------------------------------
# Wrapper
# ---------------------------------------------------------------------------
def lstm_forward(x, params, *, obs_length, feats_in, feats_out,
                 t_chunk=256, matmul_dtype=jnp.float32):
    """x: (T, N, F) with F >= feats_in >= feats_out.  Returns (traj, loss)."""
    T, N, _ = x.shape
    H = params["w2"].shape[1]
    H2 = params["w3"].shape[1]

    GP = _round_up(H, 128)              # per-gate lane slab width
    HP = GP                             # padded hidden width carried in h/c
    OUT_PAD = _round_up(max(feats_out, 128), 128)
    F_PAD = _round_up(feats_in, 8)
    N_PAD = _round_up(max(N, 8), 8)
    tc = max(1, min(t_chunk, T))
    T_PAD = _round_up(T, tc)            # static per-chunk trip count
    n_chunks = T_PAD // tc
    f32 = jnp.float32

    # glue: feature slice, zero post-observation inputs (the torch.cat), padding.
    batch = x[:, :, :feats_in].astype(f32)
    keep = (jnp.arange(T) < obs_length)[:, None, None]
    x_in = jnp.where(keep, batch, 0.0)
    x_p = jnp.zeros((T_PAD, N_PAD, F_PAD), f32).at[:T, :N, :feats_in].set(x_in)

    tgt = x[obs_length:T, :, :feats_out].astype(f32)
    tgt_p = jnp.zeros((T_PAD, N_PAD, OUT_PAD), f32)
    tgt_p = tgt_p.at[obs_length:T, :N, :feats_out].set(tgt)

    # per-row loss weight: 1/N on valid (t, agent) rows, 0 on all padding.
    wmask_p = jnp.zeros((T_PAD, N_PAD, 1), f32).at[obs_length:T, :N, :].set(1.0 / N)

    def pad_gate_cols(w):               # (d, 4H) -> (d, 4*GP), gate slabs lane-aligned
        return jnp.concatenate(
            [jnp.pad(w[:, g * H:(g + 1) * H], ((0, 0), (0, GP - H)))
             for g in range(4)], axis=1)

    mm = matmul_dtype
    w1_p = jnp.pad(params["w1"], ((0, F_PAD - feats_in), (0, 0))).astype(mm)
    w2_c = params["w2"].astype(mm)
    wih_p = pad_gate_cols(params["wih"]).astype(mm)
    bl_p = pad_gate_cols(params["bl"])                              # f32
    whh_p = jnp.pad(pad_gate_cols(params["whh"]), ((0, HP - H), (0, 0))).astype(mm)
    w3_p = jnp.pad(params["w3"], ((0, HP - H), (0, 0))).astype(mm)
    w4_p = jnp.pad(params["w4"], ((0, 0), (0, OUT_PAD - feats_out))).astype(mm)
    b4_p = jnp.pad(params["b4"], ((0, 0), (0, OUT_PAD - feats_out)))  # f32

    traj_p, loss = pl.pallas_call(
        lstm_fused_kernel,
        out_shape=(
            jax.ShapeDtypeStruct((T_PAD, N_PAD, OUT_PAD), f32),
            jax.ShapeDtypeStruct((1, 1), f32),
        ),
        grid_spec=pltpu.PrefetchScalarGridSpec(
            num_scalar_prefetch=0,
            grid=(n_chunks,),
            in_specs=[
                pl.BlockSpec((tc, N_PAD, F_PAD), lambda i: (i, 0, 0)),     # x
                pl.BlockSpec((tc, N_PAD, OUT_PAD), lambda i: (i, 0, 0)),   # target
                pl.BlockSpec((tc, N_PAD, 1), lambda i: (i, 0, 0)),         # loss weight
                pl.BlockSpec((F_PAD, H), lambda i: (0, 0)),                # w1
                pl.BlockSpec((1, H), lambda i: (0, 0)),                    # b1
                pl.BlockSpec((H, H), lambda i: (0, 0)),                    # w2
                pl.BlockSpec((1, H), lambda i: (0, 0)),                    # b2
                pl.BlockSpec((H, 4 * GP), lambda i: (0, 0)),               # wih
                pl.BlockSpec((1, 4 * GP), lambda i: (0, 0)),               # bl
                pl.BlockSpec((HP, 4 * GP), lambda i: (0, 0)),              # whh
                pl.BlockSpec((HP, H2), lambda i: (0, 0)),                  # w3
                pl.BlockSpec((1, H2), lambda i: (0, 0)),                   # b3
                pl.BlockSpec((H2, OUT_PAD), lambda i: (0, 0)),             # w4
                pl.BlockSpec((1, OUT_PAD), lambda i: (0, 0)),              # b4
            ],
            out_specs=[
                pl.BlockSpec((tc, N_PAD, OUT_PAD), lambda i: (i, 0, 0)),   # traj
                pl.BlockSpec((1, 1), lambda i: (0, 0)),                    # loss acc
            ],
            scratch_shapes=[
                pltpu.VMEM((tc, N_PAD, 4 * GP), f32),   # per-chunk gate pre-acts
                pltpu.VMEM((tc, N_PAD, HP), f32),       # per-chunk hidden states
                pltpu.VMEM((N_PAD, HP), f32),           # h carried across chunks
                pltpu.VMEM((N_PAD, HP), f32),           # c carried across chunks
            ],
        ),
        compiler_params=pltpu.CompilerParams(
            dimension_semantics=("arbitrary",),          # recurrence -> sequential
            vmem_limit_bytes=32 * 1024 * 1024),
    )(x_p, tgt_p, wmask_p, w1_p, params["b1"], w2_c, params["b2"],
      wih_p, bl_p, whh_p, w3_p, params["b3"], w4_p, b4_p)

    traj = traj_p[obs_length:T, :N, :feats_out]          # glue slice
    return traj, loss[0, 0]


# ---------------------------------------------------------------------------
# Pure-JAX reference mirroring the PyTorch module (fused-gate parameterization).
# ---------------------------------------------------------------------------
def reference_forward(x, params, *, obs_length, feats_in, feats_out):
    batch = x[:, :, :feats_in]
    tar_y = x[obs_length:, :, :feats_out]
    T, N, _ = batch.shape
    H = params["w2"].shape[1]

    batch_in = jnp.concatenate(
        [batch[:obs_length], jnp.zeros_like(batch[obs_length:])], axis=0)
    enc = jnp.maximum(batch_in @ params["w1"] + params["b1"], 0.0)
    enc = enc @ params["w2"] + params["b2"]

    def step(carry, xt):
        h, c = carry
        gates = xt @ params["wih"] + h @ params["whh"] + params["bl"]
        i = jax.nn.sigmoid(gates[:, 0:H])
        f = jax.nn.sigmoid(gates[:, H:2 * H])
        g = jnp.tanh(gates[:, 2 * H:3 * H])
        o = jax.nn.sigmoid(gates[:, 3 * H:4 * H])
        c = f * c + i * g
        h = o * jnp.tanh(c)
        return (h, c), h

    h0 = jnp.zeros((N, H), jnp.float32)
    c0 = jnp.zeros((N, H), jnp.float32)
    _, outs = jax.lax.scan(step, (h0, c0), enc)
    out = outs @ params["w3"] + params["b3"]
    tra = out @ params["w4"] + params["b4"]
    traj = tra[obs_length:]
    rmse = jnp.sqrt(jnp.sum((traj - tar_y) ** 2, axis=-1)).sum(axis=0)
    return traj, rmse.mean()


if __name__ == "__main__":
    # small, forward-consistent shapes
    T, N = 8, 4                 # total sequence length, num agents (batch)
    obs_length = 5
    feats_in, feats_out = 3, 2
    H = 32                      # feats_hidden -> fused gate width 4H = 128
    H2 = H // 2

    key = jax.random.PRNGKey(0)
    ks = jax.random.split(key, 12)

    def uinit(k, shape, fan_in):
        bound = 1.0 / (fan_in ** 0.5)
        return jax.random.uniform(k, shape, jnp.float32, -bound, bound)

    params = {
        "w1":  uinit(ks[0], (feats_in, H), feats_in),
        "b1":  uinit(ks[1], (1, H), feats_in),
        "w2":  uinit(ks[2], (H, H), H),
        "b2":  uinit(ks[3], (1, H), H),
        # LSTM weights fused across gates (i, f, g, o): (H, 4H); b_ih+b_hh folded.
        "wih": uinit(ks[4], (H, 4 * H), H),
        "whh": uinit(ks[5], (H, 4 * H), H),
        "bl":  uinit(ks[6], (1, 4 * H), H),
        "w3":  uinit(ks[7], (H, H2), H),
        "b3":  uinit(ks[8], (1, H2), H),
        "w4":  uinit(ks[9], (H2, feats_out), H2),
        "b4":  uinit(ks[10], (1, feats_out), H2),
    }

    x = jax.random.normal(ks[11], (T, N, feats_in), jnp.float32)

    traj, loss = lstm_forward(x, params, obs_length=obs_length,
                              feats_in=feats_in, feats_out=feats_out)
    jax.block_until_ready((traj, loss))

    traj_r, loss_r = reference_forward(x, params, obs_length=obs_length,
                                       feats_in=feats_in, feats_out=feats_out)

    assert traj.shape == (T - obs_length, N, feats_out)
    assert jnp.allclose(traj, traj_r, atol=2e-3, rtol=2e-3), "traj mismatch"
    assert jnp.allclose(loss, loss_r, atol=2e-3, rtol=2e-3), "loss mismatch"

    print("KERNEL_OK")
</pallas_src>

<mosaic_0001>
module attributes {stable_mosaic.version = 11 : i64} {
  func.func @lstm_fused_kernel(%arg0: i32, %arg1: memref<8x8x8xf32, #tpu.memory_space<vmem>>, %arg2: memref<8x8x128xf32, #tpu.memory_space<vmem>>, %arg3: memref<8x8x1xf32, #tpu.memory_space<vmem>>, %arg4: memref<8x32xf32, #tpu.memory_space<vmem>>, %arg5: memref<1x32xf32, #tpu.memory_space<vmem>>, %arg6: memref<32x32xf32, #tpu.memory_space<vmem>>, %arg7: memref<1x32xf32, #tpu.memory_space<vmem>>, %arg8: memref<32x512xf32, #tpu.memory_space<vmem>>, %arg9: memref<1x512xf32, #tpu.memory_space<vmem>>, %arg10: memref<128x512xf32, #tpu.memory_space<vmem>>, %arg11: memref<128x16xf32, #tpu.memory_space<vmem>>, %arg12: memref<1x16xf32, #tpu.memory_space<vmem>>, %arg13: memref<16x128xf32, #tpu.memory_space<vmem>>, %arg14: memref<1x128xf32, #tpu.memory_space<vmem>>, %arg15: memref<8x8x128xf32, #tpu.memory_space<vmem>>, %arg16: memref<1x1xf32, #tpu.memory_space<vmem>>, %arg17: memref<8x8x512xf32, #tpu.memory_space<vmem>>, %arg18: memref<8x8x128xf32, #tpu.memory_space<vmem>>, %arg19: memref<8x128xf32, #tpu.memory_space<vmem>>, %arg20: memref<8x128xf32, #tpu.memory_space<vmem>>) attributes {dimension_semantics = [#tpu.dimension_semantics<arbitrary>], iteration_bounds = array<i64: 1>, scalar_prefetch = 0 : i64, scratch_operands = 4 : i64, tpu.core_type = #tpu.core_type<tc>, window_params = [{transform_indices = @transform_0, window_bounds = array<i64: 8, 8, 8>}, {transform_indices = @transform_1, window_bounds = array<i64: 8, 8, 128>}, {transform_indices = @transform_2, window_bounds = array<i64: 8, 8, 1>}, {pipeline_mode = #tpu.pipeline_mode<synchronous>, transform_indices = @transform_3, window_bounds = array<i64: 8, 32>}, {pipeline_mode = #tpu.pipeline_mode<synchronous>, transform_indices = @transform_4, window_bounds = array<i64: 1, 32>}, {pipeline_mode = #tpu.pipeline_mode<synchronous>, transform_indices = @transform_5, window_bounds = array<i64: 32, 32>}, {pipeline_mode = #tpu.pipeline_mode<synchronous>, transform_indices = @transform_6, window_bounds = array<i64: 1, 32>}, {pipeline_mode = #tpu.pipeline_mode<synchronous>, transform_indices = @transform_7, window_bounds = array<i64: 32, 512>}, {pipeline_mode = #tpu.pipeline_mode<synchronous>, transform_indices = @transform_8, window_bounds = array<i64: 1, 512>}, {pipeline_mode = #tpu.pipeline_mode<synchronous>, transform_indices = @transform_9, window_bounds = array<i64: 128, 512>}, {pipeline_mode = #tpu.pipeline_mode<synchronous>, transform_indices = @transform_10, window_bounds = array<i64: 128, 16>}, {pipeline_mode = #tpu.pipeline_mode<synchronous>, transform_indices = @transform_11, window_bounds = array<i64: 1, 16>}, {pipeline_mode = #tpu.pipeline_mode<synchronous>, transform_indices = @transform_12, window_bounds = array<i64: 16, 128>}, {pipeline_mode = #tpu.pipeline_mode<synchronous>, transform_indices = @transform_13, window_bounds = array<i64: 1, 128>}, {transform_indices = @transform_14, window_bounds = array<i64: 8, 8, 128>}, {pipeline_mode = #tpu.pipeline_mode<synchronous>, transform_indices = @transform_15, window_bounds = array<i64: 1, 1>}]} {
    %c0_i32 = arith.constant 0 : i32
    %0 = arith.cmpi eq, %arg0, %c0_i32 : i32
    %1 = arith.extui %0 : i1 to i32
    %c0_i32_0 = arith.constant 0 : i32
    %2 = arith.cmpi ne, %1, %c0_i32_0 : i32
    scf.if %2 {
      %cst_138 = arith.constant 0.000000e+00 : f32
      %340 = vector.broadcast %cst_138 : f32 to vector<8x128xf32>
      %c0_139 = arith.constant 0 : index
      %c0_140 = arith.constant 0 : index
      %341 = vector.load %arg19[%c0_139, %c0_140] : memref<8x128xf32, #tpu.memory_space<vmem>>, vector<8x128xf32>
      tpu.vector_store %arg19[%c0_139, %c0_140], %340 {strides = array<i32>} : memref<8x128xf32, #tpu.memory_space<vmem>>, vector<8x128xf32>,
      %cst_141 = arith.constant 0.000000e+00 : f32
      %342 = vector.broadcast %cst_141 : f32 to vector<8x128xf32>
      %c0_142 = arith.constant 0 : index
      %c0_143 = arith.constant 0 : index
      %343 = vector.load %arg20[%c0_142, %c0_143] : memref<8x128xf32, #tpu.memory_space<vmem>>, vector<8x128xf32>
      tpu.vector_store %arg20[%c0_142, %c0_143], %342 {strides = array<i32>} : memref<8x128xf32, #tpu.memory_space<vmem>>, vector<8x128xf32>,
      %cst_144 = arith.constant 0.000000e+00 : f32
      %344 = vector.broadcast %cst_144 : f32 to vector<1x1xf32>
      %c0_145 = arith.constant 0 : index
      %c0_146 = arith.constant 0 : index
      %345 = vector.load %arg16[%c0_145, %c0_146] : memref<1x1xf32, #tpu.memory_space<vmem>>, vector<1x1xf32>
      tpu.vector_store %arg16[%c0_145, %c0_146], %344 {strides = array<i32>} : memref<1x1xf32, #tpu.memory_space<vmem>>, vector<1x1xf32>,
    } else {
    }
    %c0 = arith.constant 0 : index
    %c0_1 = arith.constant 0 : index
    %c0_2 = arith.constant 0 : index
    %3 = vector.load %arg1[%c0, %c0_1, %c0_2] : memref<8x8x8xf32, #tpu.memory_space<vmem>>, vector<8x8x8xf32>
    %4 = vector.shape_cast %3 : vector<8x8x8xf32> to vector<64x8xf32>
    %c0_3 = arith.constant 0 : index
    %c0_4 = arith.constant 0 : index
    %5 = vector.load %arg4[%c0_3, %c0_4] : memref<8x32xf32, #tpu.memory_space<vmem>>, vector<8x32xf32>
    %cst = arith.constant dense<0.000000e+00> : vector<64x32xf32>
    %6 = tpu.matmul %4, %5, %cst {dimension_numbers = #tpu.dot_dimension_numbers<[1], [0], [0], [1], [0, 0, 1, 1], [], []>} : vector<64x8xf32>, vector<8x32xf32>, vector<64x32xf32> -> vector<64x32xf32>
    %c0_5 = arith.constant 0 : index
    %c0_6 = arith.constant 0 : index
    %7 = vector.load %arg5[%c0_5, %c0_6] : memref<1x32xf32, #tpu.memory_space<vmem>>, vector<1x32xf32>
    %8 = vector.broadcast %7 : vector<1x32xf32> to vector<64x32xf32>
    %9 = arith.addf %6, %8 : vector<64x32xf32>
    %cst_7 = arith.constant 0.000000e+00 : f32
    %10 = vector.broadcast %cst_7 : f32 to vector<64x32xf32>
    %11 = arith.maximumf %9, %10 : vector<64x32xf32>
    %c0_8 = arith.constant 0 : index
    %c0_9 = arith.constant 0 : index
    %12 = vector.load %arg6[%c0_8, %c0_9] : memref<32x32xf32, #tpu.memory_space<vmem>>, vector<32x32xf32>
    %cst_10 = arith.constant dense<0.000000e+00> : vector<64x32xf32>
    %13 = tpu.matmul %11, %12, %cst_10 {dimension_numbers = #tpu.dot_dimension_numbers<[1], [0], [0], [1], [0, 0, 1, 1], [], []>} : vector<64x32xf32>, vector<32x32xf32>, vector<64x32xf32> -> vector<64x32xf32>
    %c0_11 = arith.constant 0 : index
    %c0_12 = arith.constant 0 : index
    %14 = vector.load %arg7[%c0_11, %c0_12] : memref<1x32xf32, #tpu.memory_space<vmem>>, vector<1x32xf32>
    %15 = vector.broadcast %14 : vector<1x32xf32> to vector<64x32xf32>
    %16 = arith.addf %13, %15 : vector<64x32xf32>
    %c0_13 = arith.constant 0 : index
    %c0_14 = arith.constant 0 : index
    %17 = vector.load %arg8[%c0_13, %c0_14] : memref<32x512xf32, #tpu.memory_space<vmem>>, vector<32x512xf32>
    %cst_15 = arith.constant dense<0.000000e+00> : vector<64x512xf32>
    %18 = tpu.matmul %16, %17, %cst_15 {dimension_numbers = #tpu.dot_dimension_numbers<[1], [0], [0], [1], [0, 0, 1, 1], [], []>} : vector<64x32xf32>, vector<32x512xf32>, vector<64x512xf32> -> vector<64x512xf32>
    %c0_16 = arith.constant 0 : index
    %c0_17 = arith.constant 0 : index
    %19 = vector.load %arg9[%c0_16, %c0_17] : memref<1x512xf32, #tpu.memory_space<vmem>>, vector<1x512xf32>
    %20 = vector.broadcast %19 : vector<1x512xf32> to vector<64x512xf32>
    %21 = arith.addf %18, %20 : vector<64x512xf32>
    %22 = vector.shape_cast %21 : vector<64x512xf32> to vector<8x8x512xf32>
    %c0_18 = arith.constant 0 : index
    %c0_19 = arith.constant 0 : index
    %c0_20 = arith.constant 0 : index
    %23 = vector.load %arg17[%c0_18, %c0_19, %c0_20] : memref<8x8x512xf32, #tpu.memory_space<vmem>>, vector<8x8x512xf32>
    tpu.vector_store %arg17[%c0_18, %c0_19, %c0_20], %22 {strides = array<i32>} : memref<8x8x512xf32, #tpu.memory_space<vmem>>, vector<8x8x512xf32>,
    %c0_21 = arith.constant 0 : index
    %c0_22 = arith.constant 0 : index
    %24 = vector.load %arg19[%c0_21, %c0_22] : memref<8x128xf32, #tpu.memory_space<vmem>>, vector<8x128xf32>
    %c0_23 = arith.constant 0 : index
    %c0_24 = arith.constant 0 : index
    %25 = vector.load %arg20[%c0_23, %c0_24] : memref<8x128xf32, #tpu.memory_space<vmem>>, vector<8x128xf32>
    %c0_i32_25 = arith.constant 0 : i32
    %26 = arith.index_cast %c0_i32_25 : i32 to index
    %c0_26 = arith.constant 0 : index
    %c0_27 = arith.constant 0 : index
    %27 = vector.load %arg17[%26, %c0_26, %c0_27] : memref<8x8x512xf32, #tpu.memory_space<vmem>>, vector<1x8x512xf32>
    %28 = vector.shape_cast %27 : vector<1x8x512xf32> to vector<8x512xf32>
    %c0_28 = arith.constant 0 : index
    %c0_29 = arith.constant 0 : index
    %29 = vector.load %arg10[%c0_28, %c0_29] : memref<128x512xf32, #tpu.memory_space<vmem>>, vector<128x512xf32>
    %cst_30 = arith.constant dense<0.000000e+00> : vector<8x512xf32>
    %30 = tpu.matmul %24, %29, %cst_30 {dimension_numbers = #tpu.dot_dimension_numbers<[1], [0], [0], [1], [0, 0, 1, 1], [], []>} : vector<8x128xf32>, vector<128x512xf32>, vector<8x512xf32> -> vector<8x512xf32>
    %31 = arith.addf %28, %30 : vector<8x512xf32>
    %32 = vector.extract_strided_slice %31 {offsets = [0, 0], sizes = [8, 128], strides = [1, 1]} : vector<8x512xf32> to vector<8x128xf32>
    %33 = arith.negf %32 : vector<8x128xf32>
    %34 = math.exp %33 : vector<8x128xf32>
    %cst_31 = arith.constant 1.000000e+00 : f32
    %35 = vector.broadcast %cst_31 : f32 to vector<8x128xf32>
    %36 = arith.addf %35, %34 : vector<8x128xf32>
    %37 = arith.divf %35, %36 : vector<8x128xf32>
    %38 = vector.extract_strided_slice %31 {offsets = [0, 128], sizes = [8, 128], strides = [1, 1]} : vector<8x512xf32> to vector<8x128xf32>
    %39 = arith.negf %38 : vector<8x128xf32>
    %40 = math.exp %39 : vector<8x128xf32>
    %cst_32 = arith.constant 1.000000e+00 : f32
    %41 = vector.broadcast %cst_32 : f32 to vector<8x128xf32>
    %42 = arith.addf %41, %40 : vector<8x128xf32>
    %43 = arith.divf %41, %42 : vector<8x128xf32>
    %44 = vector.extract_strided_slice %31 {offsets = [0, 256], sizes = [8, 128], strides = [1, 1]} : vector<8x512xf32> to vector<8x128xf32>
    %45 = math.tanh %44 : vector<8x128xf32>
    %46 = vector.extract_strided_slice %31 {offsets = [0, 384], sizes = [8, 128], strides = [1, 1]} : vector<8x512xf32> to vector<8x128xf32>
    %47 = arith.negf %46 : vector<8x128xf32>
    %48 = math.exp %47 : vector<8x128xf32>
    %cst_33 = arith.constant 1.000000e+00 : f32
    %49 = vector.broadcast %cst_33 : f32 to vector<8x128xf32>
    %50 = arith.addf %49, %48 : vector<8x128xf32>
    %51 = arith.divf %49, %50 : vector<8x128xf32>
    %52 = arith.mulf %43, %25 : vector<8x128xf32>
    %53 = arith.mulf %37, %45 : vector<8x128xf32>
    %54 = arith.addf %52, %53 : vector<8x128xf32>
    %55 = math.tanh %54 : vector<8x128xf32>
    %56 = arith.mulf %51, %55 : vector<8x128xf32>
    %57 = arith.index_cast %c0_i32_25 : i32 to index
    %c0_34 = arith.constant 0 : index
    %c0_35 = arith.constant 0 : index
    %58 = vector.load %arg18[%57, %c0_34, %c0_35] : memref<8x8x128xf32, #tpu.memory_space<vmem>>, vector<1x8x128xf32>
    %59 = vector.shape_cast %58 : vector<1x8x128xf32> to vector<8x128xf32>
    %60 = vector.shape_cast %56 : vector<8x128xf32> to vector<1x8x128xf32>
    tpu.vector_store %arg18[%57, %c0_34, %c0_35], %60 {strides = array<i32>} : memref<8x8x128xf32, #tpu.memory_space<vmem>>, vector<1x8x128xf32>,
    %c1_i32 = arith.constant 1 : i32
    %61 = arith.index_cast %c1_i32 : i32 to index
    %c0_36 = arith.constant 0 : index
    %c0_37 = arith.constant 0 : index
    %62 = vector.load %arg17[%61, %c0_36, %c0_37] : memref<8x8x512xf32, #tpu.memory_space<vmem>>, vector<1x8x512xf32>
    %63 = vector.shape_cast %62 : vector<1x8x512xf32> to vector<8x512xf32>
    %c0_38 = arith.constant 0 : index
    %c0_39 = arith.constant 0 : index
    %64 = vector.load %arg10[%c0_38, %c0_39] : memref<128x512xf32, #tpu.memory_space<vmem>>, vector<128x512xf32>
    %cst_40 = arith.constant dense<0.000000e+00> : vector<8x512xf32>
    %65 = tpu.matmul %56, %64, %cst_40 {dimension_numbers = #tpu.dot_dimension_numbers<[1], [0], [0], [1], [0, 0, 1, 1], [], []>} : vector<8x128xf32>, vector<128x512xf32>, vector<8x512xf32> -> vector<8x512xf32>
    %66 = arith.addf %63, %65 : vector<8x512xf32>
    %67 = vector.extract_strided_slice %66 {offsets = [0, 0], sizes = [8, 128], strides = [1, 1]} : vector<8x512xf32> to vector<8x128xf32>
    %68 = arith.negf %67 : vector<8x128xf32>
    %69 = math.exp %68 : vector<8x128xf32>
    %cst_41 = arith.constant 1.000000e+00 : f32
    %70 = vector.broadcast %cst_41 : f32 to vector<8x128xf32>
    %71 = arith.addf %70, %69 : vector<8x128xf32>
    %72 = arith.divf %70, %71 : vector<8x128xf32>
    %73 = vector.extract_strided_slice %66 {offsets = [0, 128], sizes = [8, 128], strides = [1, 1]} : vector<8x512xf32> to vector<8x128xf32>
    %74 = arith.negf %73 : vector<8x128xf32>
    %75 = math.exp %74 : vector<8x128xf32>
    %cst_42 = arith.constant 1.000000e+00 : f32
    %76 = vector.broadcast %cst_42 : f32 to vector<8x128xf32>
    %77 = arith.addf %76, %75 : vector<8x128xf32>
    %78 = arith.divf %76, %77 : vector<8x128xf32>
    %79 = vector.extract_strided_slice %66 {offsets = [0, 256], sizes = [8, 128], strides = [1, 1]} : vector<8x512xf32> to vector<8x128xf32>
    %80 = math.tanh %79 : vector<8x128xf32>
    %81 = vector.extract_strided_slice %66 {offsets = [0, 384], sizes = [8, 128], strides = [1, 1]} : vector<8x512xf32> to vector<8x128xf32>
    %82 = arith.negf %81 : vector<8x128xf32>
    %83 = math.exp %82 : vector<8x128xf32>
    %cst_43 = arith.constant 1.000000e+00 : f32
    %84 = vector.broadcast %cst_43 : f32 to vector<8x128xf32>
    %85 = arith.addf %84, %83 : vector<8x128xf32>
    %86 = arith.divf %84, %85 : vector<8x128xf32>
    %87 = arith.mulf %78, %54 : vector<8x128xf32>
    %88 = arith.mulf %72, %80 : vector<8x128xf32>
    %89 = arith.addf %87, %88 : vector<8x128xf32>
    %90 = math.tanh %89 : vector<8x128xf32>
    %91 = arith.mulf %86, %90 : vector<8x128xf32>
    %92 = arith.index_cast %c1_i32 : i32 to index
    %c0_44 = arith.constant 0 : index
    %c0_45 = arith.constant 0 : index
    %93 = vector.load %arg18[%92, %c0_44, %c0_45] : memref<8x8x128xf32, #tpu.memory_space<vmem>>, vector<1x8x128xf32>
    %94 = vector.shape_cast %93 : vector<1x8x128xf32> to vector<8x128xf32>
    %95 = vector.shape_cast %91 : vector<8x128xf32> to vector<1x8x128xf32>
    tpu.vector_store %arg18[%92, %c0_44, %c0_45], %95 {strides = array<i32>} : memref<8x8x128xf32, #tpu.memory_space<vmem>>, vector<1x8x128xf32>,
    %c2_i32 = arith.constant 2 : i32
    %96 = arith.index_cast %c2_i32 : i32 to index
    %c0_46 = arith.constant 0 : index
    %c0_47 = arith.constant 0 : index
    %97 = vector.load %arg17[%96, %c0_46, %c0_47] : memref<8x8x512xf32, #tpu.memory_space<vmem>>, vector<1x8x512xf32>
    %98 = vector.shape_cast %97 : vector<1x8x512xf32> to vector<8x512xf32>
    %c0_48 = arith.constant 0 : index
    %c0_49 = arith.constant 0 : index
    %99 = vector.load %arg10[%c0_48, %c0_49] : memref<128x512xf32, #tpu.memory_space<vmem>>, vector<128x512xf32>
    %cst_50 = arith.constant dense<0.000000e+00> : vector<8x512xf32>
    %100 = tpu.matmul %91, %99, %cst_50 {dimension_numbers = #tpu.dot_dimension_numbers<[1], [0], [0], [1], [0, 0, 1, 1], [], []>} : vector<8x128xf32>, vector<128x512xf32>, vector<8x512xf32> -> vector<8x512xf32>
    %101 = arith.addf %98, %100 : vector<8x512xf32>
    %102 = vector.extract_strided_slice %101 {offsets = [0, 0], sizes = [8, 128], strides = [1, 1]} : vector<8x512xf32> to vector<8x128xf32>
    %103 = arith.negf %102 : vector<8x128xf32>
    %104 = math.exp %103 : vector<8x128xf32>
    %cst_51 = arith.constant 1.000000e+00 : f32
    %105 = vector.broadcast %cst_51 : f32 to vector<8x128xf32>
    %106 = arith.addf %105, %104 : vector<8x128xf32>
    %107 = arith.divf %105, %106 : vector<8x128xf32>
    %108 = vector.extract_strided_slice %101 {offsets = [0, 128], sizes = [8, 128], strides = [1, 1]} : vector<8x512xf32> to vector<8x128xf32>
    %109 = arith.negf %108 : vector<8x128xf32>
    %110 = math.exp %109 : vector<8x128xf32>
    %cst_52 = arith.constant 1.000000e+00 : f32
    %111 = vector.broadcast %cst_52 : f32 to vector<8x128xf32>
    %112 = arith.addf %111, %110 : vector<8x128xf32>
    %113 = arith.divf %111, %112 : vector<8x128xf32>
    %114 = vector.extract_strided_slice %101 {offsets = [0, 256], sizes = [8, 128], strides = [1, 1]} : vector<8x512xf32> to vector<8x128xf32>
    %115 = math.tanh %114 : vector<8x128xf32>
    %116 = vector.extract_strided_slice %101 {offsets = [0, 384], sizes = [8, 128], strides = [1, 1]} : vector<8x512xf32> to vector<8x128xf32>
    %117 = arith.negf %116 : vector<8x128xf32>
    %118 = math.exp %117 : vector<8x128xf32>
    %cst_53 = arith.constant 1.000000e+00 : f32
    %119 = vector.broadcast %cst_53 : f32 to vector<8x128xf32>
    %120 = arith.addf %119, %118 : vector<8x128xf32>
    %121 = arith.divf %119, %120 : vector<8x128xf32>
    %122 = arith.mulf %113, %89 : vector<8x128xf32>
    %123 = arith.mulf %107, %115 : vector<8x128xf32>
    %124 = arith.addf %122, %123 : vector<8x128xf32>
    %125 = math.tanh %124 : vector<8x128xf32>
    %126 = arith.mulf %121, %125 : vector<8x128xf32>
    %127 = arith.index_cast %c2_i32 : i32 to index
    %c0_54 = arith.constant 0 : index
    %c0_55 = arith.constant 0 : index
    %128 = vector.load %arg18[%127, %c0_54, %c0_55] : memref<8x8x128xf32, #tpu.memory_space<vmem>>, vector<1x8x128xf32>
    %129 = vector.shape_cast %128 : vector<1x8x128xf32> to vector<8x128xf32>
    %130 = vector.shape_cast %126 : vector<8x128xf32> to vector<1x8x128xf32>
    tpu.vector_store %arg18[%127, %c0_54, %c0_55], %130 {strides = array<i32>} : memref<8x8x128xf32, #tpu.memory_space<vmem>>, vector<1x8x128xf32>,
    %c3_i32 = arith.constant 3 : i32
    %131 = arith.index_cast %c3_i32 : i32 to index
    %c0_56 = arith.constant 0 : index
    %c0_57 = arith.constant 0 : index
    %132 = vector.load %arg17[%131, %c0_56, %c0_57] : memref<8x8x512xf32, #tpu.memory_space<vmem>>, vector<1x8x512xf32>
    %133 = vector.shape_cast %132 : vector<1x8x512xf32> to vector<8x512xf32>
    %c0_58 = arith.constant 0 : index
    %c0_59 = arith.constant 0 : index
    %134 = vector.load %arg10[%c0_58, %c0_59] : memref<128x512xf32, #tpu.memory_space<vmem>>, vector<128x512xf32>
    %cst_60 = arith.constant dense<0.000000e+00> : vector<8x512xf32>
    %135 = tpu.matmul %126, %134, %cst_60 {dimension_numbers = #tpu.dot_dimension_numbers<[1], [0], [0], [1], [0, 0, 1, 1], [], []>} : vector<8x128xf32>, vector<128x512xf32>, vector<8x512xf32> -> vector<8x512xf32>
    %136 = arith.addf %133, %135 : vector<8x512xf32>
    %137 = vector.extract_strided_slice %136 {offsets = [0, 0], sizes = [8, 128], strides = [1, 1]} : vector<8x512xf32> to vector<8x128xf32>
    %138 = arith.negf %137 : vector<8x128xf32>
    %139 = math.exp %138 : vector<8x128xf32>
    %cst_61 = arith.constant 1.000000e+00 : f32
    %140 = vector.broadcast %cst_61 : f32 to vector<8x128xf32>
    %141 = arith.addf %140, %139 : vector<8x128xf32>
    %142 = arith.divf %140, %141 : vector<8x128xf32>
    %143 = vector.extract_strided_slice %136 {offsets = [0, 128], sizes = [8, 128], strides = [1, 1]} : vector<8x512xf32> to vector<8x128xf32>
    %144 = arith.negf %143 : vector<8x128xf32>
    %145 = math.exp %144 : vector<8x128xf32>
    %cst_62 = arith.constant 1.000000e+00 : f32
    %146 = vector.broadcast %cst_62 : f32 to vector<8x128xf32>
    %147 = arith.addf %146, %145 : vector<8x128xf32>
    %148 = arith.divf %146, %147 : vector<8x128xf32>
    %149 = vector.extract_strided_slice %136 {offsets = [0, 256], sizes = [8, 128], strides = [1, 1]} : vector<8x512xf32> to vector<8x128xf32>
    %150 = math.tanh %149 : vector<8x128xf32>
    %151 = vector.extract_strided_slice %136 {offsets = [0, 384], sizes = [8, 128], strides = [1, 1]} : vector<8x512xf32> to vector<8x128xf32>
    %152 = arith.negf %151 : vector<8x128xf32>
    %153 = math.exp %152 : vector<8x128xf32>
    %cst_63 = arith.constant 1.000000e+00 : f32
    %154 = vector.broadcast %cst_63 : f32 to vector<8x128xf32>
    %155 = arith.addf %154, %153 : vector<8x128xf32>
    %156 = arith.divf %154, %155 : vector<8x128xf32>
    %157 = arith.mulf %148, %124 : vector<8x128xf32>
    %158 = arith.mulf %142, %150 : vector<8x128xf32>
    %159 = arith.addf %157, %158 : vector<8x128xf32>
    %160 = math.tanh %159 : vector<8x128xf32>
    %161 = arith.mulf %156, %160 : vector<8x128xf32>
    %162 = arith.index_cast %c3_i32 : i32 to index
    %c0_64 = arith.constant 0 : index
    %c0_65 = arith.constant 0 : index
    %163 = vector.load %arg18[%162, %c0_64, %c0_65] : memref<8x8x128xf32, #tpu.memory_space<vmem>>, vector<1x8x128xf32>
    %164 = vector.shape_cast %163 : vector<1x8x128xf32> to vector<8x128xf32>
    %165 = vector.shape_cast %161 : vector<8x128xf32> to vector<1x8x128xf32>
    tpu.vector_store %arg18[%162, %c0_64, %c0_65], %165 {strides = array<i32>} : memref<8x8x128xf32, #tpu.memory_space<vmem>>, vector<1x8x128xf32>,
    %c4_i32 = arith.constant 4 : i32
    %166 = arith.index_cast %c4_i32 : i32 to index
    %c0_66 = arith.constant 0 : index
    %c0_67 = arith.constant 0 : index
    %167 = vector.load %arg17[%166, %c0_66, %c0_67] : memref<8x8x512xf32, #tpu.memory_space<vmem>>, vector<1x8x512xf32>
    %168 = vector.shape_cast %167 : vector<1x8x512xf32> to vector<8x512xf32>
    %c0_68 = arith.constant 0 : index
    %c0_69 = arith.constant 0 : index
    %169 = vector.load %arg10[%c0_68, %c0_69] : memref<128x512xf32, #tpu.memory_space<vmem>>, vector<128x512xf32>
    %cst_70 = arith.constant dense<0.000000e+00> : vector<8x512xf32>
    %170 = tpu.matmul %161, %169, %cst_70 {dimension_numbers = #tpu.dot_dimension_numbers<[1], [0], [0], [1], [0, 0, 1, 1], [], []>} : vector<8x128xf32>, vector<128x512xf32>, vector<8x512xf32> -> vector<8x512xf32>
    %171 = arith.addf %168, %170 : vector<8x512xf32>
    %172 = vector.extract_strided_slice %171 {offsets = [0, 0], sizes = [8, 128], strides = [1, 1]} : vector<8x512xf32> to vector<8x128xf32>
    %173 = arith.negf %172 : vector<8x128xf32>
    %174 = math.exp %173 : vector<8x128xf32>
    %cst_71 = arith.constant 1.000000e+00 : f32
    %175 = vector.broadcast %cst_71 : f32 to vector<8x128xf32>
    %176 = arith.addf %175, %174 : vector<8x128xf32>
    %177 = arith.divf %175, %176 : vector<8x128xf32>
    %178 = vector.extract_strided_slice %171 {offsets = [0, 128], sizes = [8, 128], strides = [1, 1]} : vector<8x512xf32> to vector<8x128xf32>
    %179 = arith.negf %178 : vector<8x128xf32>
    %180 = math.exp %179 : vector<8x128xf32>
    %cst_72 = arith.constant 1.000000e+00 : f32
    %181 = vector.broadcast %cst_72 : f32 to vector<8x128xf32>
    %182 = arith.addf %181, %180 : vector<8x128xf32>
    %183 = arith.divf %181, %182 : vector<8x128xf32>
    %184 = vector.extract_strided_slice %171 {offsets = [0, 256], sizes = [8, 128], strides = [1, 1]} : vector<8x512xf32> to vector<8x128xf32>
    %185 = math.tanh %184 : vector<8x128xf32>
    %186 = vector.extract_strided_slice %171 {offsets = [0, 384], sizes = [8, 128], strides = [1, 1]} : vector<8x512xf32> to vector<8x128xf32>
    %187 = arith.negf %186 : vector<8x128xf32>
    %188 = math.exp %187 : vector<8x128xf32>
    %cst_73 = arith.constant 1.000000e+00 : f32
    %189 = vector.broadcast %cst_73 : f32 to vector<8x128xf32>
    %190 = arith.addf %189, %188 : vector<8x128xf32>
    %191 = arith.divf %189, %190 : vector<8x128xf32>
    %192 = arith.mulf %183, %159 : vector<8x128xf32>
    %193 = arith.mulf %177, %185 : vector<8x128xf32>
    %194 = arith.addf %192, %193 : vector<8x128xf32>
    %195 = math.tanh %194 : vector<8x128xf32>
    %196 = arith.mulf %191, %195 : vector<8x128xf32>
    %197 = arith.index_cast %c4_i32 : i32 to index
    %c0_74 = arith.constant 0 : index
    %c0_75 = arith.constant 0 : index
    %198 = vector.load %arg18[%197, %c0_74, %c0_75] : memref<8x8x128xf32, #tpu.memory_space<vmem>>, vector<1x8x128xf32>
    %199 = vector.shape_cast %198 : vector<1x8x128xf32> to vector<8x128xf32>
    %200 = vector.shape_cast %196 : vector<8x128xf32> to vector<1x8x128xf32>
    tpu.vector_store %arg18[%197, %c0_74, %c0_75], %200 {strides = array<i32>} : memref<8x8x128xf32, #tpu.memory_space<vmem>>, vector<1x8x128xf32>,
    %c5_i32 = arith.constant 5 : i32
    %201 = arith.index_cast %c5_i32 : i32 to index
    %c0_76 = arith.constant 0 : index
    %c0_77 = arith.constant 0 : index
    %202 = vector.load %arg17[%201, %c0_76, %c0_77] : memref<8x8x512xf32, #tpu.memory_space<vmem>>, vector<1x8x512xf32>
    %203 = vector.shape_cast %202 : vector<1x8x512xf32> to vector<8x512xf32>
    %c0_78 = arith.constant 0 : index
    %c0_79 = arith.constant 0 : index
    %204 = vector.load %arg10[%c0_78, %c0_79] : memref<128x512xf32, #tpu.memory_space<vmem>>, vector<128x512xf32>
    %cst_80 = arith.constant dense<0.000000e+00> : vector<8x512xf32>
    %205 = tpu.matmul %196, %204, %cst_80 {dimension_numbers = #tpu.dot_dimension_numbers<[1], [0], [0], [1], [0, 0, 1, 1], [], []>} : vector<8x128xf32>, vector<128x512xf32>, vector<8x512xf32> -> vector<8x512xf32>
    %206 = arith.addf %203, %205 : vector<8x512xf32>
    %207 = vector.extract_strided_slice %206 {offsets = [0, 0], sizes = [8, 128], strides = [1, 1]} : vector<8x512xf32> to vector<8x128xf32>
    %208 = arith.negf %207 : vector<8x128xf32>
    %209 = math.exp %208 : vector<8x128xf32>
    %cst_81 = arith.constant 1.000000e+00 : f32
    %210 = vector.broadcast %cst_81 : f32 to vector<8x128xf32>
    %211 = arith.addf %210, %209 : vector<8x128xf32>
    %212 = arith.divf %210, %211 : vector<8x128xf32>
    %213 = vector.extract_strided_slice %206 {offsets = [0, 128], sizes = [8, 128], strides = [1, 1]} : vector<8x512xf32> to vector<8x128xf32>
    %214 = arith.negf %213 : vector<8x128xf32>
    %215 = math.exp %214 : vector<8x128xf32>
    %cst_82 = arith.constant 1.000000e+00 : f32
    %216 = vector.broadcast %cst_82 : f32 to vector<8x128xf32>
    %217 = arith.addf %216, %215 : vector<8x128xf32>
    %218 = arith.divf %216, %217 : vector<8x128xf32>
    %219 = vector.extract_strided_slice %206 {offsets = [0, 256], sizes = [8, 128], strides = [1, 1]} : vector<8x512xf32> to vector<8x128xf32>
    %220 = math.tanh %219 : vector<8x128xf32>
    %221 = vector.extract_strided_slice %206 {offsets = [0, 384], sizes = [8, 128], strides = [1, 1]} : vector<8x512xf32> to vector<8x128xf32>
    %222 = arith.negf %221 : vector<8x128xf32>
    %223 = math.exp %222 : vector<8x128xf32>
    %cst_83 = arith.constant 1.000000e+00 : f32
    %224 = vector.broadcast %cst_83 : f32 to vector<8x128xf32>
    %225 = arith.addf %224, %223 : vector<8x128xf32>
    %226 = arith.divf %224, %225 : vector<8x128xf32>
    %227 = arith.mulf %218, %194 : vector<8x128xf32>
    %228 = arith.mulf %212, %220 : vector<8x128xf32>
    %229 = arith.addf %227, %228 : vector<8x128xf32>
    %230 = math.tanh %229 : vector<8x128xf32>
    %231 = arith.mulf %226, %230 : vector<8x128xf32>
    %232 = arith.index_cast %c5_i32 : i32 to index
    %c0_84 = arith.constant 0 : index
    %c0_85 = arith.constant 0 : index
    %233 = vector.load %arg18[%232, %c0_84, %c0_85] : memref<8x8x128xf32, #tpu.memory_space<vmem>>, vector<1x8x128xf32>
    %234 = vector.shape_cast %233 : vector<1x8x128xf32> to vector<8x128xf32>
    %235 = vector.shape_cast %231 : vector<8x128xf32> to vector<1x8x128xf32>
    tpu.vector_store %arg18[%232, %c0_84, %c0_85], %235 {strides = array<i32>} : memref<8x8x128xf32, #tpu.memory_space<vmem>>, vector<1x8x128xf32>,
    %c6_i32 = arith.constant 6 : i32
    %236 = arith.index_cast %c6_i32 : i32 to index
    %c0_86 = arith.constant 0 : index
    %c0_87 = arith.constant 0 : index
    %237 = vector.load %arg17[%236, %c0_86, %c0_87] : memref<8x8x512xf32, #tpu.memory_space<vmem>>, vector<1x8x512xf32>
    %238 = vector.shape_cast %237 : vector<1x8x512xf32> to vector<8x512xf32>
    %c0_88 = arith.constant 0 : index
    %c0_89 = arith.constant 0 : index
    %239 = vector.load %arg10[%c0_88, %c0_89] : memref<128x512xf32, #tpu.memory_space<vmem>>, vector<128x512xf32>
    %cst_90 = arith.constant dense<0.000000e+00> : vector<8x512xf32>
    %240 = tpu.matmul %231, %239, %cst_90 {dimension_numbers = #tpu.dot_dimension_numbers<[1], [0], [0], [1], [0, 0, 1, 1], [], []>} : vector<8x128xf32>, vector<128x512xf32>, vector<8x512xf32> -> vector<8x512xf32>
    %241 = arith.addf %238, %240 : vector<8x512xf32>
    %242 = vector.extract_strided_slice %241 {offsets = [0, 0], sizes = [8, 128], strides = [1, 1]} : vector<8x512xf32> to vector<8x128xf32>
    %243 = arith.negf %242 : vector<8x128xf32>
    %244 = math.exp %243 : vector<8x128xf32>
    %cst_91 = arith.constant 1.000000e+00 : f32
    %245 = vector.broadcast %cst_91 : f32 to vector<8x128xf32>
    %246 = arith.addf %245, %244 : vector<8x128xf32>
    %247 = arith.divf %245, %246 : vector<8x128xf32>
    %248 = vector.extract_strided_slice %241 {offsets = [0, 128], sizes = [8, 128], strides = [1, 1]} : vector<8x512xf32> to vector<8x128xf32>
    %249 = arith.negf %248 : vector<8x128xf32>
    %250 = math.exp %249 : vector<8x128xf32>
    %cst_92 = arith.constant 1.000000e+00 : f32
    %251 = vector.broadcast %cst_92 : f32 to vector<8x128xf32>
    %252 = arith.addf %251, %250 : vector<8x128xf32>
    %253 = arith.divf %251, %252 : vector<8x128xf32>
    %254 = vector.extract_strided_slice %241 {offsets = [0, 256], sizes = [8, 128], strides = [1, 1]} : vector<8x512xf32> to vector<8x128xf32>
    %255 = math.tanh %254 : vector<8x128xf32>
    %256 = vector.extract_strided_slice %241 {offsets = [0, 384], sizes = [8, 128], strides = [1, 1]} : vector<8x512xf32> to vector<8x128xf32>
    %257 = arith.negf %256 : vector<8x128xf32>
    %258 = math.exp %257 : vector<8x128xf32>
    %cst_93 = arith.constant 1.000000e+00 : f32
    %259 = vector.broadcast %cst_93 : f32 to vector<8x128xf32>
    %260 = arith.addf %259, %258 : vector<8x128xf32>
    %261 = arith.divf %259, %260 : vector<8x128xf32>
    %262 = arith.mulf %253, %229 : vector<8x128xf32>
    %263 = arith.mulf %247, %255 : vector<8x128xf32>
    %264 = arith.addf %262, %263 : vector<8x128xf32>
    %265 = math.tanh %264 : vector<8x128xf32>
    %266 = arith.mulf %261, %265 : vector<8x128xf32>
    %267 = arith.index_cast %c6_i32 : i32 to index
    %c0_94 = arith.constant 0 : index
    %c0_95 = arith.constant 0 : index
    %268 = vector.load %arg18[%267, %c0_94, %c0_95] : memref<8x8x128xf32, #tpu.memory_space<vmem>>, vector<1x8x128xf32>
    %269 = vector.shape_cast %268 : vector<1x8x128xf32> to vector<8x128xf32>
    %270 = vector.shape_cast %266 : vector<8x128xf32> to vector<1x8x128xf32>
    tpu.vector_store %arg18[%267, %c0_94, %c0_95], %270 {strides = array<i32>} : memref<8x8x128xf32, #tpu.memory_space<vmem>>, vector<1x8x128xf32>,
    %c7_i32 = arith.constant 7 : i32
    %271 = arith.index_cast %c7_i32 : i32 to index
    %c0_96 = arith.constant 0 : index
    %c0_97 = arith.constant 0 : index
    %272 = vector.load %arg17[%271, %c0_96, %c0_97] : memref<8x8x512xf32, #tpu.memory_space<vmem>>, vector<1x8x512xf32>
    %273 = vector.shape_cast %272 : vector<1x8x512xf32> to vector<8x512xf32>
    %c0_98 = arith.constant 0 : index
    %c0_99 = arith.constant 0 : index
    %274 = vector.load %arg10[%c0_98, %c0_99] : memref<128x512xf32, #tpu.memory_space<vmem>>, vector<128x512xf32>
    %cst_100 = arith.constant dense<0.000000e+00> : vector<8x512xf32>
    %275 = tpu.matmul %266, %274, %cst_100 {dimension_numbers = #tpu.dot_dimension_numbers<[1], [0], [0], [1], [0, 0, 1, 1], [], []>} : vector<8x128xf32>, vector<128x512xf32>, vector<8x512xf32> -> vector<8x512xf32>
    %276 = arith.addf %273, %275 : vector<8x512xf32>
    %277 = vector.extract_strided_slice %276 {offsets = [0, 0], sizes = [8, 128], strides = [1, 1]} : vector<8x512xf32> to vector<8x128xf32>
    %278 = arith.negf %277 : vector<8x128xf32>
    %279 = math.exp %278 : vector<8x128xf32>
    %cst_101 = arith.constant 1.000000e+00 : f32
    %280 = vector.broadcast %cst_101 : f32 to vector<8x128xf32>
    %281 = arith.addf %280, %279 : vector<8x128xf32>
    %282 = arith.divf %280, %281 : vector<8x128xf32>
    %283 = vector.extract_strided_slice %276 {offsets = [0, 128], sizes = [8, 128], strides = [1, 1]} : vector<8x512xf32> to vector<8x128xf32>
    %284 = arith.negf %283 : vector<8x128xf32>
    %285 = math.exp %284 : vector<8x128xf32>
    %cst_102 = arith.constant 1.000000e+00 : f32
    %286 = vector.broadcast %cst_102 : f32 to vector<8x128xf32>
    %287 = arith.addf %286, %285 : vector<8x128xf32>
    %288 = arith.divf %286, %287 : vector<8x128xf32>
    %289 = vector.extract_strided_slice %276 {offsets = [0, 256], sizes = [8, 128], strides = [1, 1]} : vector<8x512xf32> to vector<8x128xf32>
    %290 = math.tanh %289 : vector<8x128xf32>
    %291 = vector.extract_strided_slice %276 {offsets = [0, 384], sizes = [8, 128], strides = [1, 1]} : vector<8x512xf32> to vector<8x128xf32>
    %292 = arith.negf %291 : vector<8x128xf32>
    %293 = math.exp %292 : vector<8x128xf32>
    %cst_103 = arith.constant 1.000000e+00 : f32
    %294 = vector.broadcast %cst_103 : f32 to vector<8x128xf32>
    %295 = arith.addf %294, %293 : vector<8x128xf32>
    %296 = arith.divf %294, %295 : vector<8x128xf32>
    %297 = arith.mulf %288, %264 : vector<8x128xf32>
    %298 = arith.mulf %282, %290 : vector<8x128xf32>
    %299 = arith.addf %297, %298 : vector<8x128xf32>
    %300 = math.tanh %299 : vector<8x128xf32>
    %301 = arith.mulf %296, %300 : vector<8x128xf32>
    %302 = arith.index_cast %c7_i32 : i32 to index
    %c0_104 = arith.constant 0 : index
    %c0_105 = arith.constant 0 : index
    %303 = vector.load %arg18[%302, %c0_104, %c0_105] : memref<8x8x128xf32, #tpu.memory_space<vmem>>, vector<1x8x128xf32>
    %304 = vector.shape_cast %303 : vector<1x8x128xf32> to vector<8x128xf32>
    %305 = vector.shape_cast %301 : vector<8x128xf32> to vector<1x8x128xf32>
    tpu.vector_store %arg18[%302, %c0_104, %c0_105], %305 {strides = array<i32>} : memref<8x8x128xf32, #tpu.memory_space<vmem>>, vector<1x8x128xf32>,
    %c8_i32 = arith.constant 8 : i32
    %c0_106 = arith.constant 0 : index
    %c0_107 = arith.constant 0 : index
    %306 = vector.load %arg19[%c0_106, %c0_107] : memref<8x128xf32, #tpu.memory_space<vmem>>, vector<8x128xf32>
    tpu.vector_store %arg19[%c0_106, %c0_107], %301 {strides = array<i32>} : memref<8x128xf32, #tpu.memory_space<vmem>>, vector<8x128xf32>,
    %c0_108 = arith.constant 0 : index
    %c0_109 = arith.constant 0 : index
    %307 = vector.load %arg20[%c0_108, %c0_109] : memref<8x128xf32, #tpu.memory_space<vmem>>, vector<8x128xf32>
    tpu.vector_store %arg20[%c0_108, %c0_109], %299 {strides = array<i32>} : memref<8x128xf32, #tpu.memory_space<vmem>>, vector<8x128xf32>,
    %c0_110 = arith.constant 0 : index
    %c0_111 = arith.constant 0 : index
    %c0_112 = arith.constant 0 : index
    %308 = vector.load %arg18[%c0_110, %c0_111, %c0_112] : memref<8x8x128xf32, #tpu.memory_space<vmem>>, vector<8x8x128xf32>
    %309 = vector.shape_cast %308 : vector<8x8x128xf32> to vector<64x128xf32>
    %c0_113 = arith.constant 0 : index
    %c0_114 = arith.constant 0 : index
    %310 = vector.load %arg11[%c0_113, %c0_114] : memref<128x16xf32, #tpu.memory_space<vmem>>, vector<128x16xf32>
    %cst_115 = arith.constant dense<0.000000e+00> : vector<64x16xf32>
    %311 = tpu.matmul %309, %310, %cst_115 {dimension_numbers = #tpu.dot_dimension_numbers<[1], [0], [0], [1], [0, 0, 1, 1], [], []>} : vector<64x128xf32>, vector<128x16xf32>, vector<64x16xf32> -> vector<64x16xf32>
    %c0_116 = arith.constant 0 : index
    %c0_117 = arith.constant 0 : index
    %312 = vector.load %arg12[%c0_116, %c0_117] : memref<1x16xf32, #tpu.memory_space<vmem>>, vector<1x16xf32>
    %313 = vector.broadcast %312 : vector<1x16xf32> to vector<64x16xf32>
    %314 = arith.addf %311, %313 : vector<64x16xf32>
    %c0_118 = arith.constant 0 : index
    %c0_119 = arith.constant 0 : index
    %315 = vector.load %arg13[%c0_118, %c0_119] : memref<16x128xf32, #tpu.memory_space<vmem>>, vector<16x128xf32>
    %cst_120 = arith.constant dense<0.000000e+00> : vector<64x128xf32>
    %316 = tpu.matmul %314, %315, %cst_120 {dimension_numbers = #tpu.dot_dimension_numbers<[1], [0], [0], [1], [0, 0, 1, 1], [], []>} : vector<64x16xf32>, vector<16x128xf32>, vector<64x128xf32> -> vector<64x128xf32>
    %c0_121 = arith.constant 0 : index
    %c0_122 = arith.constant 0 : index
    %317 = vector.load %arg14[%c0_121, %c0_122] : memref<1x128xf32, #tpu.memory_space<vmem>>, vector<1x128xf32>
    %318 = vector.broadcast %317 : vector<1x128xf32> to vector<64x128xf32>
    %319 = arith.addf %316, %318 : vector<64x128xf32>
    %320 = vector.shape_cast %319 : vector<64x128xf32> to vector<8x8x128xf32>
    %c0_123 = arith.constant 0 : index
    %c0_124 = arith.constant 0 : index
    %c0_125 = arith.constant 0 : index
    %321 = vector.load %arg15[%c0_123, %c0_124, %c0_125] : memref<8x8x128xf32, #tpu.memory_space<vmem>>, vector<8x8x128xf32>
    tpu.vector_store %arg15[%c0_123, %c0_124, %c0_125], %320 {strides = array<i32>} : memref<8x8x128xf32, #tpu.memory_space<vmem>>, vector<8x8x128xf32>,
    %c0_126 = arith.constant 0 : index
    %c0_127 = arith.constant 0 : index
    %c0_128 = arith.constant 0 : index
    %322 = vector.load %arg2[%c0_126, %c0_127, %c0_128] : memref<8x8x128xf32, #tpu.memory_space<vmem>>, vector<8x8x128xf32>
    %323 = vector.shape_cast %322 : vector<8x8x128xf32> to vector<64x128xf32>
    %324 = arith.subf %319, %323 : vector<64x128xf32>
    %325 = arith.mulf %324, %324 : vector<64x128xf32>
    %cst_129 = arith.constant dense<0.000000e+00> : vector<64xf32>
    %326 = vector.multi_reduction <add>, %325, %cst_129 [1] : vector<64x128xf32> to vector<64xf32>
    %327 = vector.shape_cast %326 : vector<64xf32> to vector<64x1xf32>
    %328 = math.sqrt %327 : vector<64x1xf32>
    %c0_130 = arith.constant 0 : index
    %c0_131 = arith.constant 0 : index
    %c0_132 = arith.constant 0 : index
    %329 = vector.load %arg3[%c0_130, %c0_131, %c0_132] : memref<8x8x1xf32, #tpu.memory_space<vmem>>, vector<8x8x1xf32>
    %330 = vector.shape_cast %329 : vector<8x8x1xf32> to vector<64x1xf32>
    %c0_133 = arith.constant 0 : index
    %c0_134 = arith.constant 0 : index
    %331 = vector.load %arg16[%c0_133, %c0_134] : memref<1x1xf32, #tpu.memory_space<vmem>>, vector<1x1xf32>
    %332 = arith.mulf %328, %330 : vector<64x1xf32>
    %333 = vector.shape_cast %332 : vector<64x1xf32> to vector<1x64x1xf32>
    %cst_135 = arith.constant dense<0.000000e+00> : vector<1xf32>
    %334 = vector.multi_reduction <add>, %333, %cst_135 [1, 2] : vector<1x64x1xf32> to vector<1xf32>
    %335 = vector.shape_cast %334 : vector<1xf32> to vector<1x1x1xf32>
    %336 = vector.extract %335[0, 0, 0] : f32 from vector<1x1x1xf32>
    %337 = vector.broadcast %336 : f32 to vector<1x1xf32>
    %338 = arith.addf %331, %337 : vector<1x1xf32>
    %c0_136 = arith.constant 0 : index
    %c0_137 = arith.constant 0 : index
    %339 = vector.load %arg16[%c0_136, %c0_137] : memref<1x1xf32, #tpu.memory_space<vmem>>, vector<1x1xf32>
    tpu.vector_store %arg16[%c0_136, %c0_137], %338 {strides = array<i32>} : memref<1x1xf32, #tpu.memory_space<vmem>>, vector<1x1xf32>,
    return
  }
  func.func @transform_0(%arg0: i32) -> (i32, i32, i32) {
    %c0_i32 = arith.constant 0 : i32
    %c0_i32_0 = arith.constant 0 : i32
    %c0_i32_1 = arith.constant 0 : i32
    return %arg0, %c0_i32, %c0_i32_0 : i32, i32, i32
  }
  func.func @transform_1(%arg0: i32) -> (i32, i32, i32) {
    %c0_i32 = arith.constant 0 : i32
    %c0_i32_0 = arith.constant 0 : i32
    %c0_i32_1 = arith.constant 0 : i32
    return %arg0, %c0_i32, %c0_i32_0 : i32, i32, i32
  }
  func.func @transform_2(%arg0: i32) -> (i32, i32, i32) {
    %c0_i32 = arith.constant 0 : i32
    %c0_i32_0 = arith.constant 0 : i32
    %c0_i32_1 = arith.constant 0 : i32
    return %arg0, %c0_i32, %c0_i32_0 : i32, i32, i32
  }
  func.func @transform_3(%arg0: i32) -> (i32, i32) {
    %c0_i32 = arith.constant 0 : i32
    %c0_i32_0 = arith.constant 0 : i32
    %c0_i32_1 = arith.constant 0 : i32
    return %c0_i32, %c0_i32_0 : i32, i32
  }
  func.func @transform_4(%arg0: i32) -> (i32, i32) {
    %c0_i32 = arith.constant 0 : i32
    %c0_i32_0 = arith.constant 0 : i32
    %c0_i32_1 = arith.constant 0 : i32
    return %c0_i32, %c0_i32_0 : i32, i32
  }
  func.func @transform_5(%arg0: i32) -> (i32, i32) {
    %c0_i32 = arith.constant 0 : i32
    %c0_i32_0 = arith.constant 0 : i32
    %c0_i32_1 = arith.constant 0 : i32
    return %c0_i32, %c0_i32_0 : i32, i32
  }
  func.func @transform_6(%arg0: i32) -> (i32, i32) {
    %c0_i32 = arith.constant 0 : i32
    %c0_i32_0 = arith.constant 0 : i32
    %c0_i32_1 = arith.constant 0 : i32
    return %c0_i32, %c0_i32_0 : i32, i32
  }
  func.func @transform_7(%arg0: i32) -> (i32, i32) {
    %c0_i32 = arith.constant 0 : i32
    %c0_i32_0 = arith.constant 0 : i32
    %c0_i32_1 = arith.constant 0 : i32
    return %c0_i32, %c0_i32_0 : i32, i32
  }
  func.func @transform_8(%arg0: i32) -> (i32, i32) {
    %c0_i32 = arith.constant 0 : i32
    %c0_i32_0 = arith.constant 0 : i32
    %c0_i32_1 = arith.constant 0 : i32
    return %c0_i32, %c0_i32_0 : i32, i32
  }
  func.func @transform_9(%arg0: i32) -> (i32, i32) {
    %c0_i32 = arith.constant 0 : i32
    %c0_i32_0 = arith.constant 0 : i32
    %c0_i32_1 = arith.constant 0 : i32
    return %c0_i32, %c0_i32_0 : i32, i32
  }
  func.func @transform_10(%arg0: i32) -> (i32, i32) {
    %c0_i32 = arith.constant 0 : i32
    %c0_i32_0 = arith.constant 0 : i32
    %c0_i32_1 = arith.constant 0 : i32
    return %c0_i32, %c0_i32_0 : i32, i32
  }
  func.func @transform_11(%arg0: i32) -> (i32, i32) {
    %c0_i32 = arith.constant 0 : i32
    %c0_i32_0 = arith.constant 0 : i32
    %c0_i32_1 = arith.constant 0 : i32
    return %c0_i32, %c0_i32_0 : i32, i32
  }
  func.func @transform_12(%arg0: i32) -> (i32, i32) {
    %c0_i32 = arith.constant 0 : i32
    %c0_i32_0 = arith.constant 0 : i32
    %c0_i32_1 = arith.constant 0 : i32
    return %c0_i32, %c0_i32_0 : i32, i32
  }
  func.func @transform_13(%arg0: i32) -> (i32, i32) {
    %c0_i32 = arith.constant 0 : i32
    %c0_i32_0 = arith.constant 0 : i32
    %c0_i32_1 = arith.constant 0 : i32
    return %c0_i32, %c0_i32_0 : i32, i32
  }
  func.func @transform_14(%arg0: i32) -> (i32, i32, i32) {
    %c0_i32 = arith.constant 0 : i32
    %c0_i32_0 = arith.constant 0 : i32
    %c0_i32_1 = arith.constant 0 : i32
    return %arg0, %c0_i32, %c0_i32_0 : i32, i32, i32
  }
  func.func @transform_15(%arg0: i32) -> (i32, i32) {
    %c0_i32 = arith.constant 0 : i32
    %c0_i32_0 = arith.constant 0 : i32
    %c0_i32_1 = arith.constant 0 : i32
    return %c0_i32, %c0_i32_0 : i32, i32
  }
}

</mosaic_0001>

<bundles_post_ra>
// kernel: tpu_custom_call.1
= control target key start
LH: loop header
LB: loop body
LE: loop exit
PB: predicated region body
PF: predicated region fallthrough
CT: control target
= control target key end

     0   :  { %21 = vsyncpa [#allocation7], 0  ;;  %s4749_s0 = inlined_call_operand.vmem [shape: f32[8,8,8], index: 0, kind: input, shape index: {}]   ;;  %s4750_s1 = inlined_call_operand.hbm [shape: f32[8,8,128], index: 1, kind: input, shape index: {}]   ;;  %s4751_s2 = inlined_call_operand.vmem [shape: f32[8,8,1], index: 2, kind: input, shape index: {}]   ;;  %s4752_s3 = inlined_call_operand.hbm [shape: f32[8,32], index: 3, kind: input, shape index: {}]   ;;  %s4753_s4 = inlined_call_operand.hbm [shape: f32[1,32], index: 4, kind: input, shape index: {}]   ;;  %s4754_s5 = inlined_call_operand.hbm [shape: f32[32,32], index: 5, kind: input, shape index: {}]   ;;  %s4755_s6 = inlined_call_operand.hbm [shape: f32[1,32], index: 6, kind: input, shape index: {}]   ;;  %s4756_s7 = inlined_call_operand.vmem [shape: f32[32,512], index: 7, kind: input, shape index: {}]   ;;  %s4757_s8 = inlined_call_operand.hbm [shape: f32[1,512], index: 8, kind: input, shape index: {}]   ;;  %s4758_s9 = inlined_call_operand.hbm [shape: f32[128,512], index: 9, kind: input, shape index: {}]   ;;  %s4759_s10 = inlined_call_operand.vmem [shape: f32[128,16], index: 10, kind: input, shape index: {}]   ;;  %s4760_s11 = inlined_call_operand.hbm [shape: f32[1,16], index: 11, kind: input, shape index: {}]   ;;  %s4761_s12 = inlined_call_operand.vmem [shape: f32[16,128], index: 12, kind: input, shape index: {}]   ;;  %s4762_s13 = inlined_call_operand.vmem [shape: f32[1,128], index: 13, kind: input, shape index: {}]   ;;  %s4763_s14 = inlined_call_operand.hbm [shape: f32[8,8,128], index: 14, kind: output, shape index: {0}]   ;;  %s4764_s15 = inlined_call_operand.hbm [shape: f32[1,1], index: 15, kind: output, shape index: {1}]  }
   0x1   :  { %22 = vsyncpa [#allocation10], 0 }
   0x2   :  { %23 = vsyncpa [#allocation13], 0 }
   0x3   :  { %24 = vsyncpa [#allocation16], 0 }
   0x4   :  { %25 = vsyncpa [#allocation19], 0 }
   0x5   :  { %26 = vsyncpa [#allocation8], 0  ;;  %s50_s20 = sshll.u32 %s4752_s3, 4  ;;  %s51_s20 = int_to_ptr.hbm [resolvable:$true] %s50_s20 }
   0x6   :  { %27 = vsyncpa [#allocation22], 0  ;;  %s3202_s21 = smov [#allocation9]   ;;  %s71_s25 = sshll.u32 %s4754_s5, 4  ;;  %s72_s25 = int_to_ptr.hbm [resolvable:$true] %s71_s25 }
   0x7   :  { %s52_s22 = sshll.u32 %s3202_s21, 4  ;;  %s3203_s26 = smov [#allocation12]   ;;  %s53_s22 = int_to_ptr.vmem [resolvable:$true] %s52_s22 }
   0x8   :  { %55 = dma.hbm_to_vmem [thread:$0]  %s51_s20, 128, %s53_s22, [#allocation10]  }
   0x9   :  { %s73_s27 = sshll.u32 %s3203_s26, 4  ;;  %s98_s30 = sshll.u32 %s4757_s8, 4  ;;  %s74_s27 = int_to_ptr.vmem [resolvable:$true] %s73_s27  ;;  %s99_s30 = int_to_ptr.hbm [resolvable:$true] %s98_s30 }
   0xa   :  { %s3204_s3 = smov 128   ;;  %s3205_s16 = smov 8  }
   0xb   :  { %79 = dma.hbm_to_vmem [thread:$0]  %s72_s25, 512, %s74_s27, [#allocation13], %s3204_s3, %s3204_s3, %s3205_s16  }
   0xc   :  { %s34_s19 = sshll.u32 %s4750_s1, 4  ;;  %s3206_s5 = smov [#allocation15]   ;;  %s35_s19 = int_to_ptr.hbm [resolvable:$true] %s34_s19 }
   0xd   :  { %s100_s20 = sshll.u32 %s3206_s5, 4  ;;  %s3207_s21 = smov [#allocation6]   ;;  %s101_s20 = int_to_ptr.vmem [resolvable:$true] %s100_s20 }
   0xe   :  { %103 = dma.hbm_to_vmem [thread:$0]  %s99_s30, 64, %s101_s20, [#allocation16]  }
   0xf   :  { %s36_s22 = sshll.u32 %s3207_s21, 4  ;;  %s61_s24 = sshll.u32 %s4753_s4, 4  ;;  %s37_s22 = int_to_ptr.vmem [resolvable:$true] %s36_s22  ;;  %s62_s24 = int_to_ptr.hbm [resolvable:$true] %s61_s24 }
  0x10   :  { %42 = dma.hbm_to_vmem [thread:$0]  %s35_s19, 1024, %s37_s22, [#allocation7], %s3204_s3, %s3204_s3, %s3205_s16  }
  0x11   :  { %s85_s1 = sshll.u32 %s4755_s6, 4  ;;  %s3208_s27 = smov [#allocation11]   ;;  %s86_s1 = int_to_ptr.hbm [resolvable:$true] %s85_s1 }
  0x12   :  { %s63_s28 = sshll.u32 %s3208_s27, 4  ;;  %s3209_s29 = smov [#allocation14]   ;;  %s64_s28 = int_to_ptr.vmem [resolvable:$true] %s63_s28 }
  0x13   :  { %66 = dma.hbm_to_vmem [thread:$0]  %s62_s24, 16, %s64_s28, [#allocation10]  }
  0x14   :  { %s87_s30 = sshll.u32 %s3209_s29, 4  ;;  %s108_s4 = sshll.u32 %s4758_s9, 4  ;;  %s88_s30 = int_to_ptr.vmem [resolvable:$true] %s87_s30  ;;  %s109_s4 = int_to_ptr.hbm [resolvable:$true] %s108_s4 }
  0x15   :  { %90 = dma.hbm_to_vmem [thread:$0]  %s86_s1, 16, %s88_s30, [#allocation13]  }
  0x16   :  { %s3210_s5 = smov [#allocation17]   ;;  %s124_s6 = sshll.u32 %s4760_s11, 4  ;;  %s125_s6 = int_to_ptr.hbm [resolvable:$true] %s124_s6 }
  0x17   :  { %s110_s19 = sshll.u32 %s3210_s5, 4  ;;  %s3211_s22 = smov 512   ;;  %s111_s19 = int_to_ptr.vmem [resolvable:$true] %s110_s19 }
  0x18   :  { %s3212_s8 = smov 32   ;;  %s3213_s23 = smov [#allocation18]  }
  0x19   :  { %116 = dma.hbm_to_vmem [thread:$0]  %s109_s4, 8192, %s111_s19, [#allocation16], %s3211_s22, %s3211_s22, %s3212_s8  }
  0x1a   :  { %s126_s24 = sshll.u32 %s3213_s23, 4  ;;  %s127_s24 = int_to_ptr.vmem [resolvable:$true] %s126_s24 }
  0x1b   :  { %129 = dma.hbm_to_vmem [thread:$0]  %s125_s6, 16, %s127_s24, [#allocation19]  }
  0x1c   :  { %3188 = dma.done.wait [#allocation7], 1024  }
  0x1d   :  { %3189 = vsyncadd [#allocation7], 4294966272 }
  0x1e   :  { %3190 = dma.done.wait [#allocation10], 144  }
  0x1f   :  { %3191 = vsyncadd [#allocation10], 4294967152 }
  0x20   :  { %3192 = dma.done.wait [#allocation13], 528  }
  0x21   :  { %3193 = vsyncadd [#allocation13], 4294966768 }
  0x22   :  { %3194 = dma.done.wait [#allocation16], 8256  }
  0x23   :  { %3195 = vsyncadd [#allocation16], 4294959040 }
  0x24   :  { %3196 = dma.done.wait [#allocation19], 16  }
  0x25   :  { %3197 = vsyncadd [#allocation19], 4294967280  ;;  %vm187_vm0 = vcmask 64512   ;;  %v182_v0 = vld [vmem:[#allocation9] sm:$0xff]  ;;  %v176_v2 = vld [vmem:[%s4749_s0 + $0x10] sm:$0xff]  ;;  %vm269_vm1 = vcmask 261120  }
  0x26   :  { %v174_v1 = vld [vmem:[%s4749_s0] sm:$0xff]  ;;  %227 = vmatpush.msra.mxu0 %v182_v0  ;;  %2777 = vmatpush.msra.mxu1 %v182_v0  ;;  %v177_v3 = vld [vmem:[%s4749_s0 + $0x18] sm:$0xff]  ;;  %v175_v6 = vld [vmem:[%s4749_s0 + $0x8] sm:$0xff]  ;;  %vm172_vm2 = vcmask 0   ;;  %s3215_s30 = smov [#allocation20]  }
  0x27   :  { %2697 = vmatmul.msk.f32.vlgmr.msra.gmra.mxu0 %vm187_vm0, %v174_v1  ;;  %2699 = vmatmul.msk.f32.vlgmr.msra.gmra.mxu1 %vm187_vm0, %v176_v2  ;;  %v264_v4 = vld [vmem:[#allocation12 + $0x18] sm:$0xff]  ;;  %v263_v5 = vld [vmem:[#allocation12 + $0x10] sm:$0xff]  ;;  %v180_v9 = vld [vmem:[%s4749_s0 + $0x30] sm:$0xff]  ;;  %s2662_s17 = sshll.u32 %s3215_s30, 4  ;;  %s2663_s17 = int_to_ptr.vmem [resolvable:$true] %s2662_s17 }
  0x28   :  { %2778 = vmatpush.msra.mxu2 %v182_v0  ;;  %306 = vmatpush.msrb.mxu1 %v264_v4  ;;  %v178_v7 = vld [vmem:[%s4749_s0 + $0x20] sm:$0xff]  ;;  %v179_v8 = vld [vmem:[%s4749_s0 + $0x28] sm:$0xff]  ;;  %v181_v10 = vld [vmem:[%s4749_s0 + $0x38] sm:$0xff] }
  0x29   :  { %2700 = vmatmul.msk.f32.vlgmr.msra.gmra.mxu2 %vm187_vm0, %v177_v3  ;;  %v262_v11 = vld [vmem:[#allocation12 + $0x8] sm:$0xff]  ;;  %v261_v12 = vld [vmem:[#allocation12] sm:$0xff]  ;;  %v2800_v13 = vld [vmem:[#allocation11] ss:$0 sm:$0xff] }
  0x2a   :  { %307 = vmatpush.msrb.mxu1 %v263_v5  ;;  %v347_v28 = vld [vmem:[%s4756_s7 + $0x60] sm:$0xff]  ;;  %v348_v29 = vld [vmem:[%s4756_s7 + $0x68] sm:$0xff]  ;;  %v349_v30 = vld [vmem:[%s4756_s7 + $0x70] sm:$0xff] }
  0x2b   :  { %397 = vmatpush.msrb.mxu2 %v347_v28  ;;  %438 = vmatpush.msra.mxu3 %v348_v29  ;;  %v350_v32 = vld [vmem:[%s4756_s7 + $0x78] sm:$0xff]  ;;  %v343_v33 = vld [vmem:[%s4756_s7 + $0x40] sm:$0xff]  ;;  %v344_v34 = vld [vmem:[%s4756_s7 + $0x48] sm:$0xff] }
  0x2c   :  { %308 = vmatpush.msrb.mxu1 %v262_v11  ;;  %479 = vmatpush.msrb.mxu0 %v349_v30  ;;  %v345_v35 = vld [vmem:[%s4756_s7 + $0x50] sm:$0xff]  ;;  %v346_v36 = vld [vmem:[%s4756_s7 + $0x58] sm:$0xff]  ;;  %v339_v46 = vld [vmem:[%s4756_s7 + $0x20] sm:$0xff] }
  0x2d   :  { %398 = vmatpush.msrb.mxu2 %v343_v33  ;;  %439 = vmatpush.msra.mxu3 %v344_v34  ;;  %v340_v47 = vld [vmem:[%s4756_s7 + $0x28] sm:$0xff]  ;;  %v341_v48 = vld [vmem:[%s4756_s7 + $0x30] sm:$0xff]  ;;  %v342_v49 = vld [vmem:[%s4756_s7 + $0x38] sm:$0xff] }
  0x2e   :  { %309 = vmatpush.msrb.mxu1 %v261_v12  ;;  %480 = vmatpush.msrb.mxu0 %v345_v35  ;;  %v335_v50 = vld [vmem:[%s4756_s7] sm:$0xff]  ;;  %v336_v51 = vld [vmem:[%s4756_s7 + $0x8] sm:$0xff]  ;;  %v337_v52 = vld [vmem:[%s4756_s7 + $0x10] sm:$0xff] }
  0x2f   :  { %2698 = vmatmul.msk.f32.gmra.mxu0 %vm187_vm0, %v175_v6  ;;  %399 = vmatpush.msrb.mxu2 %v339_v46  ;;  %v338_v53 = vld [vmem:[%s4756_s7 + $0x18] sm:$0xff]  ;;  %v3415_v54 = vld [vmem:[#allocation17 + $0x1e0] sm:$0xff]  ;;  %v3431_v63 = vld [vmem:[#allocation14] ss:$0 sm:$0xff] }
  0x30   :  { %520 = vmatpush.msra.mxu1 %v350_v32  ;;  %440 = vmatpush.msra.mxu3 %v340_v47  ;;  %v3417_v55 = vld [vmem:[#allocation17 + $0x1c0] sm:$0xff]  ;;  %v3443_v11 = vld [vmem:[#allocation17 + $0x1e8] sm:$0xff]  ;;  %v3445_v12 = vld [vmem:[#allocation17 + $0x1f0] sm:$0xff] }
  0x31   :  { %2701 = vmatmul.msk.f32.gmra.mxu2 %vm187_vm0, %v178_v7  ;;  %481 = vmatpush.msrb.mxu0 %v341_v48  ;;  %v3423_v56 = vld [vmem:[#allocation17 + $0x1a0] sm:$0xff]  ;;  %v3498_v28 = vld [vmem:[#allocation17 + $0x130] sm:$0xff]  ;;  %v3500_v29 = vld [vmem:[#allocation17 + $0x108] sm:$0xff] }
  0x32   :  { %521 = vmatpush.msra.mxu1 %v346_v36  ;;  %400 = vmatpush.msrb.mxu2 %v335_v50  ;;  %v3427_v57 = vld [vmem:[#allocation17 + $0x180] sm:$0xff]  ;;  %v3504_v30 = vld [vmem:[#allocation17 + $0x110] sm:$0xff]  ;;  %v3520_v35 = vld [vmem:[#allocation17 + $0xc8] sm:$0xff] }
  0x33   :  { %441 = vmatpush.msra.mxu3 %v336_v51  ;;  %482 = vmatpush.msrb.mxu0 %v337_v52  ;;  %v631_v58 = vld [vmem:[#allocation17 + $0x160] sm:$0xff]  ;;  %v3517_v34 = vld [vmem:[#allocation17 + $0xf0] sm:$0xff]  ;;  %v3562_v47 = vld [vmem:[#allocation17 + $0x48] sm:$0xff] }
  0x34   :  { %522 = vmatpush.msra.mxu1 %v342_v49  ;;  %651 = vmatpush.msra.mxu2 %v3415_v54  ;;  %v627_v59 = vld [vmem:[#allocation17 + $0x140] sm:$0xff]  ;;  %v3558_v46 = vld [vmem:[#allocation17 + $0x50] sm:$0xff] }
  0x35   :  { %2779 = vmatpush.msrb.mxu3 %v350_v32  ;;  %868 = vmatpush.msra.mxu0 %v3415_v54  ;;  %v623_v60 = vld [vmem:[#allocation17 + $0x120] sm:$0xff]  ;;  %v3565_v48 = vld [vmem:[#allocation17 + $0x30] sm:$0xff] }
  0x36   :  { %523 = vmatpush.msra.mxu1 %v338_v53  ;;  %652 = vmatpush.msra.mxu2 %v3417_v55  ;;  %v619_v61 = vld [vmem:[#allocation17 + $0x100] sm:$0xff]  ;;  %v3572_v50 = vld [vmem:[#allocation17 + $0x10] sm:$0xff] }
  0x37   :  { %2780 = vmatpush.msrb.mxu3 %v346_v36  ;;  %869 = vmatpush.msra.mxu0 %v3417_v55  ;;  %v615_v62 = vld [vmem:[#allocation17 + $0xe0] sm:$0xff]  ;;  %v3527_v36 = vld [vmem:[#allocation17 + $0xd0] sm:$0xff] }
  0x38   :  { %653 = vmatpush.msra.mxu2 %v3423_v56  ;;  %v611_v0 = vld [vmem:[#allocation17 + $0xc0] sm:$0xff] }
  0x39   :  { %2702 = vmatmul.msk.f32.gmra.mxu2 %vm187_vm0, %v179_v8  ;;  %2781 = vmatpush.msrb.mxu3 %v342_v49  ;;  %v607_v3 = vld [vmem:[#allocation17 + $0xa0] sm:$0xff]  ;;  %v3569_v49 = vld [vmem:[#allocation17 + $0x28] sm:$0xff] }
  0x3a   :  { %870 = vmatpush.msra.mxu0 %v3423_v56  ;;  %654 = vmatpush.msra.mxu2 %v3427_v57  ;;  %v603_v4 = vld [vmem:[#allocation17 + $0x80] sm:$0xff] }
  0x3b   :  { %2782 = vmatpush.msrb.mxu3 %v338_v53  ;;  %v599_v5 = vld [vmem:[#allocation17 + $0x60] sm:$0xff]  ;;  %v3578_v53 = vld [vmem:[#allocation17 + $0x8] sm:$0xff] }
  0x3c   :  { %871 = vmatpush.msra.mxu0 %v3427_v57  ;;  %655 = vmatpush.msra.mxu2 %v631_v58  ;;  %v595_v6 = vld [vmem:[#allocation17 + $0x40] sm:$0xff] }
  0x3e   :  { %872 = vmatpush.msra.mxu0 %v631_v58  ;;  %656 = vmatpush.msra.mxu2 %v627_v59  ;;  %v3607_v58 = vld [vmem:[#allocation17 + $0x1b8] sm:$0xff] }
  0x40   :  { %873 = vmatpush.msra.mxu0 %v627_v59  ;;  %657 = vmatpush.msra.mxu2 %v623_v60  ;;  %v3612_v59 = vld [vmem:[#allocation17 + $0x198] sm:$0xff] }
  0x41   :  { %2703 = vmatmul.msk.f32.gmra.mxu2 %vm187_vm0, %v180_v9  ;;  %v591_v9 = vld [vmem:[#allocation17 + $0x20] sm:$0xff] }
  0x42   :  { %874 = vmatpush.msra.mxu0 %v623_v60  ;;  %658 = vmatpush.msra.mxu2 %v619_v61  ;;  %v3617_v60 = vld [vmem:[#allocation17 + $0x178] sm:$0xff] }
  0x44   :  { %875 = vmatpush.msra.mxu0 %v619_v61  ;;  %659 = vmatpush.msra.mxu2 %v615_v62  ;;  %v3624_v61 = vld [vmem:[#allocation17 + $0x158] sm:$0xff] }
  0x46   :  { %876 = vmatpush.msra.mxu0 %v615_v62  ;;  %660 = vmatpush.msra.mxu2 %v611_v0  ;;  %v3628_v62 = vld [vmem:[#allocation17 + $0x138] sm:$0xff] }
  0x48   :  { %877 = vmatpush.msra.mxu0 %v611_v0  ;;  %661 = vmatpush.msra.mxu2 %v607_v3  ;;  %v3638_v0 = vld [vmem:[#allocation17 + $0xf8] sm:$0xff] }
  0x49   :  { %2704 = vmatmul.msk.f32.gmra.mxu2 %vm187_vm0, %v181_v10  ;;  %v587_v10 = vld [vmem:[#allocation17] sm:$0xff] }
  0x4a   :  { %878 = vmatpush.msra.mxu0 %v607_v3  ;;  %662 = vmatpush.msra.mxu2 %v603_v4  ;;  %v3654_v3 = vld [vmem:[#allocation17 + $0x98] sm:$0xff] }
  0x4c   :  { %879 = vmatpush.msra.mxu0 %v603_v4  ;;  %663 = vmatpush.msra.mxu2 %v599_v5  ;;  %v3659_v4 = vld [vmem:[#allocation17 + $0x78] sm:$0xff] }
  0x4e   :  { %880 = vmatpush.msra.mxu0 %v599_v5  ;;  %664 = vmatpush.msra.mxu2 %v595_v6  ;;  %v3665_v5 = vld [vmem:[#allocation17 + $0x58] sm:$0xff] }
  0x50   :  { %881 = vmatpush.msra.mxu0 %v595_v6  ;;  %665 = vmatpush.msra.mxu2 %v591_v9  ;;  %v3669_v6 = vld [vmem:[#allocation17 + $0x38] sm:$0xff] }
  0x52   :  { %882 = vmatpush.msra.mxu0 %v591_v9  ;;  %666 = vmatpush.msra.mxu2 %v587_v10  ;;  %v3716_v9 = vld [vmem:[#allocation15] sm:$0xf] }
  0x54   :  { %883 = vmatpush.msra.mxu0 %v587_v10 }
  0xa4   :  { %v229_v14 = vpop.f32.mrf.mxu0  ;;  %v235_v19 = vpop.f32.mrf.mxu1 }
  0xa5   :  { %v230_v15 = vadd.f32 %v2800_v13, %v229_v14  ;;  %v236_v22 = vadd.f32 %v2800_v13, %v235_v19  ;;  %v3451_v14 = vld [vmem:[#allocation17 + $0x1d0] sm:$0xff]  ;;  %v3465_v19 = vld [vmem:[#allocation17 + $0x188] sm:$0xff] }
  0xa7   :  { %v253_v16 = vmax.f32 %v230_v15, 0.0  ;;  %v255_v23 = vmax.f32 %v236_v22, 0.0  ;;  %v3475_v22 = vld [vmem:[#allocation17 + $0x170] sm:$0xff] }
  0xa9   :  { %2705 = vmatmul.msk.f32.vlgmr.msrb.gmra.mxu1 %vm269_vm1, %v253_v16 }
  0xaa   :  { %888 = vmatpush.msrb.mxu1 %v3443_v11 }
  0xac   :  { %v232_v17 = vpop.f32.mrf.mxu0  ;;  %v238_v20 = vpop.f32.mrf.mxu2 }
  0xad   :  { %v233_v18 = vadd.f32 %v2800_v13, %v232_v17  ;;  %v239_v25 = vadd.f32 %v2800_v13, %v238_v20  ;;  %v3457_v17 = vld [vmem:[#allocation17 + $0x1a8] sm:$0xff]  ;;  %v3469_v20 = vld [vmem:[#allocation17 + $0x190] sm:$0xff] }
  0xaf   :  { %v254_v21 = vmax.f32 %v233_v18, 0.0  ;;  %v256_v26 = vmax.f32 %v239_v25, 0.0  ;;  %v3460_v18 = vld [vmem:[#allocation17 + $0x1b0] sm:$0xff] }
  0xb1   :  { %2706 = vmatmul.msk.f32.gmra.mxu1 %vm269_vm1, %v254_v21  ;;  %v3471_v21 = vld [vmem:[#allocation17 + $0x168] sm:$0xff] }
  0xb4   :  { %v241_v24 = vpop.f32.mrf.mxu2 }
  0xb5   :  { %v242_v27 = vadd.f32 %v2800_v13, %v241_v24 }
  0xb7   :  { %v257_v37 = vmax.f32 %v242_v27, 0.0  ;;  %v3490_v27 = vld [vmem:[#allocation17 + $0x128] sm:$0xff] }
  0xb9   :  { %2707 = vmatmul.msk.f32.gmra.mxu1 %vm269_vm1, %v255_v23  ;;  %v3477_v23 = vld [vmem:[#allocation17 + $0x148] sm:$0xff] }
  0xbc   :  { %v244_v31 = vpop.f32.mrf.mxu2 }
  0xbd   :  { %v245_v38 = vadd.f32 %v2800_v13, %v244_v31  ;;  %v3506_v31 = vld [vmem:[#allocation17 + $0xe8] sm:$0xff] }
  0xbf   :  { %v258_v40 = vmax.f32 %v245_v38, 0.0  ;;  %v3214_v38 = vmov 0.0  }
  0xc0   :  { %173 = vst.msk [vmem:[#allocation21] sm:$0x1] %vm172_vm2, %v3214_v38 }
  0xc1   :  { %2708 = vmatmul.msk.f32.gmra.mxu1 %vm269_vm1, %v256_v26  ;;  %v3488_v26 = vld [vmem:[#allocation17 + $0x150] sm:$0xff] }
  0xc4   :  { %v247_v39 = vpop.f32.mrf.mxu2 }
  0xc5   :  { %v248_v41 = vadd.f32 %v2800_v13, %v247_v39  ;;  %v3537_v39 = vld [vmem:[#allocation17 + $0xb0] sm:$0xff] }
  0xc7   :  { %v259_v42 = vmax.f32 %v248_v41, 0.0  ;;  %v3544_v41 = vld [vmem:[#allocation17 + $0x90] sm:$0xff] }
  0xc9   :  { %2709 = vmatmul.msk.f32.gmra.mxu1 %vm269_vm1, %v257_v37  ;;  %v3532_v37 = vld [vmem:[#allocation17 + $0xa8] sm:$0xff] }
  0xcc   :  { %v250_v43 = vpop.f32.mrf.mxu2 }
  0xcd   :  { %v251_v44 = vadd.f32 %v2800_v13, %v250_v43  ;;  %v3448_v13 = vld [vmem:[#allocation17 + $0x1c8] sm:$0xff] }
  0xce   :  { %889 = vmatpush.msrb.mxu1 %v3448_v13 }
  0xcf   :  { %v260_v45 = vmax.f32 %v251_v44, 0.0  ;;  %v3550_v44 = vld [vmem:[#allocation17 + $0x70] sm:$0xff] }
  0xd0   :  { %890 = vmatpush.msrb.mxu1 %v3457_v17 }
  0xd1   :  { %2710 = vmatmul.msk.f32.gmra.mxu1 %vm269_vm1, %v258_v40  ;;  %v3541_v40 = vld [vmem:[#allocation17 + $0x88] sm:$0xff] }
  0xd2   :  { %891 = vmatpush.msrb.mxu1 %v3465_v19 }
  0xd4   :  { %892 = vmatpush.msrb.mxu1 %v3471_v21 }
  0xd6   :  { %893 = vmatpush.msrb.mxu1 %v3477_v23 }
  0xd8   :  { %894 = vmatpush.msrb.mxu1 %v3490_v27 }
  0xd9   :  { %2711 = vmatmul.msk.f32.gmra.mxu1 %vm269_vm1, %v259_v42 }
  0xda   :  { %895 = vmatpush.msrb.mxu1 %v3500_v29 }
  0xdc   :  { %896 = vmatpush.msrb.mxu1 %v3506_v31 }
  0xde   :  { %897 = vmatpush.msrb.mxu1 %v3520_v35 }
  0xe0   :  { %898 = vmatpush.msrb.mxu1 %v3532_v37 }
  0xe1   :  { %2712 = vmatmul.msk.f32.gmra.mxu1 %vm269_vm1, %v260_v45  ;;  %v3554_v45 = vld [vmem:[#allocation17 + $0x68] sm:$0xff] }
  0xe2   :  { %899 = vmatpush.msrb.mxu1 %v3541_v40 }
  0xe4   :  { %900 = vmatpush.msrb.mxu1 %v3554_v45 }
  0xe6   :  { %901 = vmatpush.msrb.mxu1 %v3562_v47 }
  0xe8   :  { %902 = vmatpush.msrb.mxu1 %v3569_v49 }
  0xea   :  { %903 = vmatpush.msrb.mxu1 %v3578_v53 }
 0x126   :  { %v311_v1 = vpop.f32.mrf.mxu1 }
 0x127   :  { %v312_v2 = vadd.f32 %v3431_v63, %v311_v1  ;;  %v3644_v1 = vld [vmem:[#allocation17 + $0xd8] sm:$0xff] }
 0x129   :  { %2713 = vmatmul.msk.f32.vlgmr.msrb.gmra.mxu2 %vm269_vm1, %v312_v2  ;;  %2721 = vmatmul.msk.f32.vlgmr.msra.gmra.mxu3 %vm269_vm1, %v312_v2 }
 0x12a   :  { %2729 = vmatmul.msk.f32.vlgmr.msrb.gmra.mxu0 %vm269_vm1, %v312_v2  ;;  %2737 = vmatmul.msk.f32.vlgmr.msra.gmra.mxu1 %vm269_vm1, %v312_v2  ;;  %v3649_v2 = vld [vmem:[#allocation17 + $0xb8] sm:$0xff] }
 0x12b   :  { %671 = vmatpush.msra.mxu3 %v3443_v11  ;;  %691 = vmatpush.msrb.mxu2 %v3445_v12 }
 0x12c   :  { %1086 = vmatpush.msrb.mxu0 %v3415_v54  ;;  %1106 = vmatpush.msra.mxu1 %v3443_v11 }
 0x12d   :  { %672 = vmatpush.msra.mxu3 %v3448_v13  ;;  %692 = vmatpush.msrb.mxu2 %v3451_v14 }
 0x12e   :  { %v314_v7 = vpop.f32.mrf.mxu1  ;;  %1087 = vmatpush.msrb.mxu0 %v3417_v55  ;;  %1107 = vmatpush.msra.mxu1 %v3448_v13 }
 0x12f   :  { %v315_v8 = vadd.f32 %v3431_v63, %v314_v7  ;;  %673 = vmatpush.msra.mxu3 %v3457_v17  ;;  %693 = vmatpush.msrb.mxu2 %v3460_v18  ;;  %v3673_v7 = vld [vmem:[#allocation17 + $0x18] sm:$0xff] }
 0x130   :  { %1088 = vmatpush.msrb.mxu0 %v3423_v56  ;;  %1108 = vmatpush.msra.mxu1 %v3457_v17  ;;  %v3597_v56 = vld [vmem:[#allocation17 + $0x1f8] sm:$0xff] }
 0x131   :  { %2714 = vmatmul.msk.f32.gmra.mxu2 %vm269_vm1, %v315_v8  ;;  %2722 = vmatmul.msk.f32.gmra.mxu3 %vm269_vm1, %v315_v8 }
 0x132   :  { %2730 = vmatmul.msk.f32.gmra.mxu0 %vm269_vm1, %v315_v8  ;;  %2738 = vmatmul.msk.f32.gmra.mxu1 %vm269_vm1, %v315_v8 }
 0x133   :  { %674 = vmatpush.msra.mxu3 %v3465_v19  ;;  %694 = vmatpush.msrb.mxu2 %v3469_v20 }
 0x134   :  { %1089 = vmatpush.msrb.mxu0 %v3427_v57  ;;  %1109 = vmatpush.msra.mxu1 %v3465_v19  ;;  %v3603_v57 = vld [vmem:[#allocation17 + $0x1d8] sm:$0xff] }
 0x135   :  { %675 = vmatpush.msra.mxu3 %v3471_v21  ;;  %695 = vmatpush.msrb.mxu2 %v3475_v22 }
 0x136   :  { %v317_v15 = vpop.f32.mrf.mxu1  ;;  %1110 = vmatpush.msra.mxu1 %v3471_v21 }
 0x137   :  { %v318_v16 = vadd.f32 %v3431_v63, %v317_v15  ;;  %676 = vmatpush.msra.mxu3 %v3477_v23  ;;  %696 = vmatpush.msrb.mxu2 %v3488_v26  ;;  %v353_v15 = vperm.slane %v3716_v9, 0 }
 0x138   :  { %1111 = vmatpush.msra.mxu1 %v3477_v23 }
 0x139   :  { %2715 = vmatmul.msk.f32.gmra.mxu2 %vm269_vm1, %v318_v16  ;;  %2723 = vmatmul.msk.f32.gmra.mxu3 %vm269_vm1, %v318_v16 }
 0x13a   :  { %2731 = vmatmul.msk.f32.gmra.mxu0 %vm269_vm1, %v318_v16  ;;  %2739 = vmatmul.msk.f32.gmra.mxu1 %vm269_vm1, %v318_v16  ;;  %v354_v16 = vperm.slane %v3716_v9, 1 }
 0x13b   :  { %677 = vmatpush.msra.mxu3 %v3490_v27  ;;  %697 = vmatpush.msrb.mxu2 %v3498_v28 }
 0x13c   :  { %1112 = vmatpush.msra.mxu1 %v3490_v27 }
 0x13d   :  { %678 = vmatpush.msra.mxu3 %v3500_v29  ;;  %698 = vmatpush.msrb.mxu2 %v3504_v30 }
 0x13e   :  { %v320_v24 = vpop.f32.mrf.mxu1  ;;  %1113 = vmatpush.msra.mxu1 %v3500_v29 }
 0x13f   :  { %v321_v25 = vadd.f32 %v3431_v63, %v320_v24  ;;  %679 = vmatpush.msra.mxu3 %v3506_v31  ;;  %699 = vmatpush.msrb.mxu2 %v3517_v34 }
 0x140   :  { %1114 = vmatpush.msra.mxu1 %v3506_v31 }
 0x141   :  { %2716 = vmatmul.msk.f32.gmra.mxu2 %vm269_vm1, %v321_v25  ;;  %2724 = vmatmul.msk.f32.gmra.mxu3 %vm269_vm1, %v321_v25 }
 0x142   :  { %2732 = vmatmul.msk.f32.gmra.mxu0 %vm269_vm1, %v321_v25  ;;  %2740 = vmatmul.msk.f32.gmra.mxu1 %vm269_vm1, %v321_v25 }
 0x143   :  { %680 = vmatpush.msra.mxu3 %v3520_v35  ;;  %700 = vmatpush.msrb.mxu2 %v3527_v36 }
 0x144   :  { %1115 = vmatpush.msra.mxu1 %v3520_v35 }
 0x145   :  { %681 = vmatpush.msra.mxu3 %v3532_v37  ;;  %701 = vmatpush.msrb.mxu2 %v3537_v39 }
 0x146   :  { %v323_v32 = vpop.f32.mrf.mxu1  ;;  %1116 = vmatpush.msra.mxu1 %v3532_v37 }
 0x147   :  { %v3514_v33 = vadd.f32 %v3431_v63, %v323_v32  ;;  %682 = vmatpush.msra.mxu3 %v3541_v40  ;;  %702 = vmatpush.msrb.mxu2 %v3544_v41 }
 0x148   :  { %1117 = vmatpush.msra.mxu1 %v3541_v40 }
 0x149   :  { %2717 = vmatmul.msk.f32.gmra.mxu2 %vm269_vm1, %v3514_v33  ;;  %2725 = vmatmul.msk.f32.gmra.mxu3 %vm269_vm1, %v3514_v33 }
 0x14a   :  { %2733 = vmatmul.msk.f32.gmra.mxu0 %vm269_vm1, %v3514_v33  ;;  %703 = vmatpush.msrb.mxu2 %v3550_v44 }
 0x14b   :  { %683 = vmatpush.msra.mxu3 %v3554_v45  ;;  %1118 = vmatpush.msra.mxu1 %v3554_v45 }
 0x14c   :  { %704 = vmatpush.msrb.mxu2 %v3558_v46 }
 0x14d   :  { %684 = vmatpush.msra.mxu3 %v3562_v47  ;;  %1119 = vmatpush.msra.mxu1 %v3562_v47 }
 0x14e   :  { %v326_v42 = vpop.f32.mrf.mxu1  ;;  %705 = vmatpush.msrb.mxu2 %v3565_v48 }
 0x14f   :  { %v327_v43 = vadd.f32 %v3431_v63, %v326_v42  ;;  %685 = vmatpush.msra.mxu3 %v3569_v49  ;;  %1120 = vmatpush.msra.mxu1 %v3569_v49 }
 0x150   :  { %706 = vmatpush.msrb.mxu2 %v3572_v50 }
 0x151   :  { %2718 = vmatmul.msk.f32.gmra.mxu2 %vm269_vm1, %v327_v43  ;;  %2726 = vmatmul.msk.f32.gmra.mxu3 %vm269_vm1, %v327_v43 }
 0x152   :  { %2734 = vmatmul.msk.f32.gmra.mxu0 %vm269_vm1, %v327_v43  ;;  %686 = vmatpush.msra.mxu3 %v3578_v53 }
 0x153   :  { %1121 = vmatpush.msra.mxu1 %v3578_v53 }
 0x156   :  { %v329_v51 = vpop.f32.mrf.mxu1 }
 0x157   :  { %v330_v52 = vadd.f32 %v3431_v63, %v329_v51 }
 0x159   :  { %2719 = vmatmul.msk.f32.gmra.mxu2 %vm269_vm1, %v330_v52  ;;  %2727 = vmatmul.msk.f32.gmra.mxu3 %vm269_vm1, %v330_v52 }
 0x15a   :  { %2735 = vmatmul.msk.f32.gmra.mxu0 %vm269_vm1, %v330_v52 }
 0x15e   :  { %v332_v54 = vpop.f32.mrf.mxu1 }
 0x15f   :  { %v333_v55 = vadd.f32 %v3431_v63, %v332_v54  ;;  %v3633_v63 = vld [vmem:[#allocation17 + $0x118] sm:$0xff] }
 0x161   :  { %2720 = vmatmul.msk.f32.gmra.mxu2 %vm269_vm1, %v333_v55  ;;  %2728 = vmatmul.msk.f32.gmra.mxu3 %vm269_vm1, %v333_v55 }
 0x162   :  { %2736 = vmatmul.msk.f32.gmra.mxu0 %vm269_vm1, %v333_v55 }
 0x169   :  { %2741 = vmatmul.msk.f32.vlgmr.msrb.gmra.mxu3 %vm269_vm1, %v3514_v33  ;;  %667 = vmatmul.f32.vlgmr.msra.gmra.mxu2 %v3214_v38 }
 0x16a   :  { %711 = vmatpush.msrb.mxu3 %v3597_v56  ;;  %908 = vmatpush.msra.mxu2 %v3445_v12 }
 0x16c   :  { %712 = vmatpush.msrb.mxu3 %v3603_v57  ;;  %909 = vmatpush.msra.mxu2 %v3451_v14 }
 0x16e   :  { %713 = vmatpush.msrb.mxu3 %v3607_v58  ;;  %910 = vmatpush.msra.mxu2 %v3460_v18 }
 0x170   :  { %714 = vmatpush.msrb.mxu3 %v3612_v59  ;;  %911 = vmatpush.msra.mxu2 %v3469_v20 }
 0x171   :  { %2742 = vmatmul.msk.f32.gmra.mxu3 %vm269_vm1, %v327_v43  ;;  %707 = vmatmul.f32.vlgmr.msrb.gmra.mxu2 %v3214_v38 }
 0x172   :  { %715 = vmatpush.msrb.mxu3 %v3617_v60  ;;  %912 = vmatpush.msra.mxu2 %v3475_v22 }
 0x174   :  { %716 = vmatpush.msrb.mxu3 %v3624_v61  ;;  %913 = vmatpush.msra.mxu2 %v3488_v26 }
 0x176   :  { %717 = vmatpush.msrb.mxu3 %v3628_v62  ;;  %914 = vmatpush.msra.mxu2 %v3498_v28 }
 0x178   :  { %718 = vmatpush.msrb.mxu3 %v3633_v63  ;;  %915 = vmatpush.msra.mxu2 %v3504_v30 }
 0x179   :  { %2743 = vmatmul.msk.f32.gmra.mxu3 %vm269_vm1, %v330_v52 }
 0x17a   :  { %719 = vmatpush.msrb.mxu3 %v3638_v0  ;;  %916 = vmatpush.msra.mxu2 %v3517_v34 }
 0x17c   :  { %720 = vmatpush.msrb.mxu3 %v3644_v1  ;;  %917 = vmatpush.msra.mxu2 %v3527_v36 }
 0x17e   :  { %721 = vmatpush.msrb.mxu3 %v3649_v2  ;;  %918 = vmatpush.msra.mxu2 %v3537_v39 }
 0x180   :  { %722 = vmatpush.msrb.mxu3 %v3654_v3  ;;  %919 = vmatpush.msra.mxu2 %v3544_v41 }
 0x181   :  { %2744 = vmatmul.msk.f32.gmra.mxu3 %vm269_vm1, %v333_v55 }
 0x182   :  { %723 = vmatpush.msrb.mxu3 %v3659_v4  ;;  %920 = vmatpush.msra.mxu2 %v3550_v44 }
 0x184   :  { %724 = vmatpush.msrb.mxu3 %v3665_v5  ;;  %921 = vmatpush.msra.mxu2 %v3558_v46 }
 0x186   :  { %725 = vmatpush.msrb.mxu3 %v3669_v6  ;;  %922 = vmatpush.msra.mxu2 %v3565_v48 }
 0x188   :  { %726 = vmatpush.msrb.mxu3 %v3673_v7  ;;  %923 = vmatpush.msra.mxu2 %v3572_v50 }
 0x189   :  { %687 = vmatmul.f32.vlgmr.msra.gmra.mxu3 %v3214_v38 }
 0x18a   :  { %1126 = vmatpush.msrb.mxu2 %v3445_v12  ;;  %928 = vmatpush.msra.mxu3 %v3597_v56  ;;  %v3723_v12 = vperm.slane %v3716_v9, 2 }
 0x18c   :  { %1127 = vmatpush.msrb.mxu2 %v3451_v14  ;;  %929 = vmatpush.msra.mxu3 %v3603_v57  ;;  %4802 = vst [vmem:[#allocation30_spill] sm:$0xff] %v3723_v12 }
 0x18e   :  { %1128 = vmatpush.msrb.mxu2 %v3460_v18  ;;  %930 = vmatpush.msra.mxu3 %v3607_v58 }
 0x190   :  { %1129 = vmatpush.msrb.mxu2 %v3469_v20  ;;  %931 = vmatpush.msra.mxu3 %v3612_v59 }
 0x191   :  { %727 = vmatmul.f32.vlgmr.msrb.gmra.mxu3 %v3214_v38 }
 0x192   :  { %1130 = vmatpush.msrb.mxu2 %v3475_v22  ;;  %932 = vmatpush.msra.mxu3 %v3617_v60 }
 0x194   :  { %1131 = vmatpush.msrb.mxu2 %v3488_v26  ;;  %933 = vmatpush.msra.mxu3 %v3624_v61 }
 0x196   :  { %1132 = vmatpush.msrb.mxu2 %v3498_v28  ;;  %934 = vmatpush.msra.mxu3 %v3628_v62 }
 0x198   :  { %1133 = vmatpush.msrb.mxu2 %v3504_v30  ;;  %935 = vmatpush.msra.mxu3 %v3633_v63 }
 0x19a   :  { %1134 = vmatpush.msrb.mxu2 %v3517_v34  ;;  %936 = vmatpush.msra.mxu3 %v3638_v0 }
 0x19c   :  { %1135 = vmatpush.msrb.mxu2 %v3527_v36  ;;  %937 = vmatpush.msra.mxu3 %v3644_v1 }
 0x19e   :  { %1136 = vmatpush.msrb.mxu2 %v3537_v39  ;;  %938 = vmatpush.msra.mxu3 %v3649_v2 }
 0x1a0   :  { %1137 = vmatpush.msrb.mxu2 %v3544_v41  ;;  %939 = vmatpush.msra.mxu3 %v3654_v3 }
 0x1a2   :  { %1138 = vmatpush.msrb.mxu2 %v3550_v44  ;;  %940 = vmatpush.msra.mxu3 %v3659_v4 }
 0x1a4   :  { %1139 = vmatpush.msrb.mxu2 %v3558_v46  ;;  %941 = vmatpush.msra.mxu3 %v3665_v5 }
 0x1a6   :  { %1140 = vmatpush.msrb.mxu2 %v3565_v48  ;;  %942 = vmatpush.msra.mxu3 %v3669_v6 }
 0x1a7   :  { %v3711_v8 = vpop.f32.mrf.mxu0 }
 0x1a8   :  { %1141 = vmatpush.msrb.mxu2 %v3572_v50  ;;  %943 = vmatpush.msra.mxu3 %v3673_v7 }
 0x1aa   :  { %1146 = vmatpush.msrb.mxu3 %v3597_v56 }
 0x1ac   :  { %1147 = vmatpush.msrb.mxu3 %v3603_v57  ;;  %v402_v10 = vpop.f32.mrf.mxu2  ;;  %v3719_v11 = vpop.f32.mrf.mxu3 }
 0x1ae   :  { %1148 = vmatpush.msrb.mxu3 %v3607_v58  ;;  %v403_v58 = vadd.f32 %v402_v10, %v353_v15 }
 0x1af   :  { %v487_v13 = vpop.f32.mrf.mxu0 }
 0x1b0   :  { %1149 = vmatpush.msrb.mxu3 %v3612_v59  ;;  %v3727_v14 = vadd.f32 %v487_v13, %v3723_v12 }
 0x1b2   :  { %1150 = vmatpush.msrb.mxu3 %v3617_v60 }
 0x1b4   :  { %1151 = vmatpush.msrb.mxu3 %v3624_v61  ;;  %v405_v17 = vpop.f32.mrf.mxu2  ;;  %v446_v18 = vpop.f32.mrf.mxu3 }
 0x1b5   :  { %v3733_v19 = vadd.f32 %v405_v17, %v353_v15  ;;  %v3735_v20 = vadd.f32 %v446_v18, %v354_v16 }
 0x1b6   :  { %1152 = vmatpush.msrb.mxu3 %v3628_v62 }
 0x1b7   :  { %v490_v21 = vpop.f32.mrf.mxu0 }
 0x1b8   :  { %1153 = vmatpush.msrb.mxu3 %v3633_v63  ;;  %v3740_v22 = vadd.f32 %v490_v21, %v3723_v12 }
 0x1ba   :  { %1154 = vmatpush.msrb.mxu3 %v3638_v0 }
 0x1bc   :  { %1155 = vmatpush.msrb.mxu3 %v3644_v1  ;;  %v408_v23 = vpop.f32.mrf.mxu2  ;;  %v449_v24 = vpop.f32.mrf.mxu3  ;;  %v444_v1 = vadd.f32 %v3719_v11, %v354_v16 }
 0x1bd   :  { %v3744_v25 = vadd.f32 %v408_v23, %v353_v15  ;;  %v3746_v26 = vadd.f32 %v449_v24, %v354_v16 }
 0x1be   :  { %1156 = vmatpush.msrb.mxu3 %v3649_v2 }
 0x1bf   :  { %v493_v27 = vpop.f32.mrf.mxu0 }
 0x1c0   :  { %1157 = vmatpush.msrb.mxu3 %v3654_v3  ;;  %v3751_v28 = vadd.f32 %v493_v27, %v3723_v12 }
 0x1c2   :  { %4803 = vst [vmem:[#allocation31_spill] sm:$0xff] %v3751_v28  ;;  %1158 = vmatpush.msrb.mxu3 %v3659_v4  ;;  %v3796_v4 = vperm.slane %v3716_v9, 3  ;;  %v485_v9 = vadd.f32 %v3711_v8, %v3723_v12 }
 0x1c4   :  { %1159 = vmatpush.msrb.mxu3 %v3665_v5  ;;  %v411_v29 = vpop.f32.mrf.mxu2  ;;  %v452_v30 = vpop.f32.mrf.mxu3  ;;  %4821 = vst [vmem:[#allocation49_spill] sm:$0xff] %v3796_v4 }
 0x1c5   :  { %v3755_v31 = vadd.f32 %v411_v29, %v353_v15  ;;  %v3757_v32 = vadd.f32 %v452_v30, %v354_v16 }
 0x1c6   :  { %1160 = vmatpush.msrb.mxu3 %v3669_v6  ;;  %v525_v6 = vpop.f32.mrf.mxu1 }
 0x1c7   :  { %4804 = vst [vmem:[#allocation32_spill] sm:$0xff] %v3755_v31  ;;  %v496_v33 = vpop.f32.mrf.mxu0  ;;  %v526_v10 = vadd.f32 %v525_v6, %v3796_v4  ;;  %v4008_v31 = vld [vmem:[#allocation17 + $0x50] sm:$0xff] }
 0x1c8   :  { %4805 = vst [vmem:[#allocation33_spill] sm:$0xff] %v3757_v32  ;;  %1161 = vmatpush.msrb.mxu3 %v3673_v7  ;;  %v3762_v34 = vadd.f32 %v496_v33, %v3723_v12  ;;  %v4004_v32 = vld [vmem:[#allocation17 + $0x48] sm:$0xff] }
 0x1c9   :  { %4842 = vst [vmem:[#allocation70_spill] sm:$0xff] %v4004_v32 }
 0x1ca   :  { %4806 = vst [vmem:[#allocation34_spill] sm:$0xff] %v3762_v34  ;;  %v3976_v34 = vld [vmem:[#allocation17 + $0xa8] sm:$0xff] }
 0x1cc   :  { %v414_v35 = vpop.f32.mrf.mxu2  ;;  %v455_v36 = vpop.f32.mrf.mxu3 }
 0x1cd   :  { %v3764_v37 = vadd.f32 %v414_v35, %v353_v15  ;;  %v3766_v38 = vadd.f32 %v455_v36, %v354_v16 }
 0x1cf   :  { %4807 = vst [vmem:[#allocation35_spill] sm:$0xff] %v3764_v37  ;;  %v499_v39 = vpop.f32.mrf.mxu0 }
 0x1d0   :  { %4808 = vst [vmem:[#allocation36_spill] sm:$0xff] %v3766_v38  ;;  %v3769_v40 = vadd.f32 %v499_v39, %v3723_v12  ;;  %v3980_v38 = vld [vmem:[#allocation17 + $0xb8] sm:$0xff] }
 0x1d2   :  { %4809 = vst [vmem:[#allocation37_spill] sm:$0xff] %v3769_v40  ;;  %v3966_v40 = vld [vmem:[#allocation17 + $0xd0] sm:$0xff] }
 0x1d4   :  { %v417_v41 = vpop.f32.mrf.mxu2  ;;  %v458_v42 = vpop.f32.mrf.mxu3 }
 0x1d5   :  { %v3771_v43 = vadd.f32 %v417_v41, %v353_v15  ;;  %v3773_v44 = vadd.f32 %v458_v42, %v354_v16 }
 0x1d7   :  { %4810 = vst [vmem:[#allocation38_spill] sm:$0xff] %v3771_v43  ;;  %v502_v45 = vpop.f32.mrf.mxu0 }
 0x1d8   :  { %4811 = vst [vmem:[#allocation39_spill] sm:$0xff] %v3773_v44  ;;  %v3776_v46 = vadd.f32 %v502_v45, %v3723_v12  ;;  %v3938_v12 = vld [vmem:[#allocation17 + $0x138] sm:$0xff] }
 0x1d9   :  { %4837 = vst [vmem:[#allocation65_spill] sm:$0xff] %v3938_v12 }
 0x1da   :  { %4812 = vst [vmem:[#allocation40_spill] sm:$0xff] %v3776_v46  ;;  %v3958_v46 = vld [vmem:[#allocation17 + $0xf8] sm:$0xff] }
 0x1dc   :  { %v420_v47 = vpop.f32.mrf.mxu2  ;;  %v461_v48 = vpop.f32.mrf.mxu3 }
 0x1dd   :  { %v3778_v49 = vadd.f32 %v420_v47, %v353_v15  ;;  %v3780_v50 = vadd.f32 %v461_v48, %v354_v16 }
 0x1df   :  { %4813 = vst [vmem:[#allocation41_spill] sm:$0xff] %v3778_v49  ;;  %v3964_v49 = vld [vmem:[#allocation17 + $0xc8] sm:$0xff] }
 0x1e0   :  { %4814 = vst [vmem:[#allocation42_spill] sm:$0xff] %v3780_v50 }
 0x1e4   :  { %v423_v51 = vpop.f32.mrf.mxu2  ;;  %v464_v52 = vpop.f32.mrf.mxu3 }
 0x1e5   :  { %v3782_v53 = vadd.f32 %v423_v51, %v353_v15  ;;  %v3784_v54 = vadd.f32 %v464_v52, %v354_v16 }
 0x1e7   :  { %4815 = vst [vmem:[#allocation43_spill] sm:$0xff] %v3782_v53  ;;  %v3948_v53 = vld [vmem:[#allocation17 + $0x118] sm:$0xff] }
 0x1e8   :  { %4816 = vst [vmem:[#allocation44_spill] sm:$0xff] %v3784_v54  ;;  %v3946_v54 = vld [vmem:[#allocation17 + $0x110] sm:$0xff] }
 0x1ec   :  { %v3786_v55 = vpop.f32.mrf.mxu3  ;;  %v668_v56 = vpop.f32.mrf.mxu2 }
 0x1ed   :  { %4817 = vst [vmem:[#allocation45_spill] sm:$0xff] %v3786_v55  ;;  %v731_v59 = vadd.f32 %v668_v56, %v403_v58  ;;  %v3978_v55 = vld [vmem:[#allocation17 + $0xb0] sm:$0xff] }
 0x1ef   :  { %v2745_v60 = vmul.f32 -1.442695, %v731_v59 }
 0x1f1   :  { %2804 = vpow2.f32 %v2745_v60 }
 0x1f4   :  { %v3788_v57 = vpop.f32.mrf.mxu3  ;;  %v708_v11 = vpop.f32.mrf.mxu2 }
 0x1f5   :  { %4818 = vst [vmem:[#allocation46_spill] sm:$0xff] %v3788_v57  ;;  %v733_v30 = vadd.f32 %v708_v11, %v485_v9  ;;  %v528_v11 = vpop.f32.mrf.mxu1  ;;  %v3812_v9 = vld [vmem:[#allocation17 + $0x160] sm:$0xff]  ;;  %v3968_v57 = vld [vmem:[#allocation17 + $0xd8] sm:$0xff] }
 0x1f6   :  { %1090 = vmatpush.msrb.mxu0 %v3812_v9 }
 0x1f7   :  { %v2805_v63 = vpop.eup %2804 }
 0x1f8   :  { %v738_v0 = vadd.f32 1.0, %v2805_v63 }
 0x1fa   :  { %2806 = vrcp.f32 %v738_v0  ;;  %v750_v39 = vand.u32 2147483648, %v738_v0  ;;  %vm744_vm4 = vweird.f32 %v738_v0  ;;  %v748_v41 = vand.u32 2147483647, %v738_v0 }
 0x1fc   :  { %v3790_v61 = vpop.f32.mrf.mxu3  ;;  %v751_v8 = vor.u32 1.1754944e-38, %v750_v39  ;;  %vm749_vm7 = vcmp.eq.f32.partialorder %v748_v41, 8.507059e+37 }
 0x1fd   :  { %4819 = vst [vmem:[#allocation47_spill] sm:$0xff] %v3790_v61 }
 0x200   :  { %v2807_v7 = vpop.eup %2806 }
 0x201   :  { %v740_v15 = vmul.f32 %v2807_v7, %v738_v0  ;;  %vm745_vm3 = vweird.f32 %v2807_v7 }
 0x202   :  { %vm746_vm5 = vmor %vm744_vm4, %vm745_vm3 }
 0x203   :  { %v741_v24 = vsub.f32 1.0, %v740_v15 }
 0x204   :  { %v3792_v62 = vpop.f32.mrf.mxu3 }
 0x205   :  { %4820 = vst [vmem:[#allocation48_spill] sm:$0xff] %v3792_v62  ;;  %v742_v16 = vmul.f32 %v2807_v7, %v741_v24  ;;  %v3944_v62 = vld [vmem:[#allocation17 + $0x108] sm:$0xff] }
 0x207   :  { %v743_v35 = vadd.f32 %v2807_v7, %v742_v16  ;;  %v3810_v16 = vpop.f32.mrf.mxu1 }
 0x209   :  { %v747_v47 = vsel %vm746_vm5, %v2807_v7, %v743_v35  ;;  %v3825_v35 = vld [vmem:[#allocation17 + $0x100] sm:$0xff] }
 0x20a   :  { %v752_v58 = vsel %vm749_vm7, %v751_v8, %v747_v47 }
 0x20c   :  { %v688_v2 = vpop.f32.mrf.mxu3 }
 0x20d   :  { %v732_v3 = vadd.f32 %v688_v2, %v444_v1 }
 0x20f   :  { %v2746_v5 = vmul.f32 -1.442695, %v732_v3 }
 0x211   :  { %2808 = vpow2.f32 %v2746_v5 }
 0x214   :  { %v728_v13 = vpop.f32.mrf.mxu3 }
 0x215   :  { %v734_v17 = vadd.f32 %v728_v13, %v526_v10 }
 0x217   :  { %v2809_v18 = vpop.eup %2808  ;;  %v2747_v21 = vmul.f32 -1.442695, %v734_v17 }
 0x218   :  { %v757_v23 = vadd.f32 1.0, %v2809_v18 }
 0x219   :  { %2810 = vpow2.f32 %v2747_v21 }
 0x21a   :  { %2812 = vrcp.f32 %v757_v23  ;;  %v769_v45 = vand.u32 2147483648, %v757_v23  ;;  %v767_v51 = vand.u32 2147483647, %v757_v23  ;;  %vm763_vm8 = vweird.f32 %v757_v23 }
 0x21c   :  { %v770_v59 = vor.u32 1.1754944e-38, %v769_v45  ;;  %vm768_vm10 = vcmp.eq.f32.partialorder %v767_v51, 8.507059e+37 }
 0x21f   :  { %v2811_v27 = vpop.eup %2810 }
 0x220   :  { %v2813_v29 = vpop.eup %2812  ;;  %v777_v33 = vadd.f32 1.0, %v2811_v27  ;;  %v3815_v27 = vpop.f32.mrf.mxu1 }
 0x221   :  { %v759_v36 = vmul.f32 %v2813_v29, %v757_v23  ;;  %vm764_vm6 = vweird.f32 %v2813_v29  ;;  %4823 = vst [vmem:[#allocation51_spill] sm:$0xff] %v3815_v27  ;;  %v532_v27 = vadd.f32 %v3810_v16, %v3796_v4  ;;  %v4018_v16 = vld [vmem:[#allocation17 + $0x30] sm:$0xff] }
 0x222   :  { %2814 = vrcp.f32 %v777_v33  ;;  %vm765_vm9 = vmor %vm763_vm8, %vm764_vm6  ;;  %v789_v10 = vand.u32 2147483648, %v777_v33  ;;  %vm783_vm12 = vweird.f32 %v777_v33  ;;  %v787_v15 = vand.u32 2147483647, %v777_v33 }
 0x223   :  { %v760_v42 = vsub.f32 1.0, %v759_v36  ;;  %2816 = vtanh.f32 %v733_v30  ;;  %v3819_v30 = vld [vmem:[#allocation17 + $0x140] sm:$0xff] }
 0x224   :  { %v790_v18 = vor.u32 1.1754944e-38, %v789_v10  ;;  %vm788_vm14 = vcmp.eq.f32.partialorder %v787_v15, 8.507059e+37  ;;  %1091 = vmatpush.msrb.mxu0 %v3819_v30  ;;  %v3828_v36 = vld [vmem:[#allocation17 + $0xe0] sm:$0xff] }
 0x225   :  { %v761_v48 = vmul.f32 %v2813_v29, %v760_v42  ;;  %v3831_v42 = vld [vmem:[#allocation17 + $0xc0] sm:$0xff] }
 0x227   :  { %v762_v52 = vadd.f32 %v2813_v29, %v761_v48  ;;  %v3836_v48 = vld [vmem:[#allocation17 + $0xa0] sm:$0xff] }
 0x228   :  { %v2815_v56 = vpop.eup %2814 }
 0x229   :  { %v766_v60 = vsel %vm765_vm9, %v2813_v29, %v762_v52  ;;  %v779_v63 = vmul.f32 %v2815_v56, %v777_v33  ;;  %v2817_v0 = vpop.eup %2816  ;;  %vm784_vm11 = vweird.f32 %v2815_v56  ;;  %v3817_v29 = vpop.f32.mrf.mxu0  ;;  %v3822_v33 = vld [vmem:[#allocation17 + $0x120] sm:$0xff] }
 0x22a   :  { %v771_v1 = vsel %vm768_vm10, %v770_v59, %v766_v60  ;;  %v794_v2 = vmul.f32 %v2817_v0, %v752_v58  ;;  %vm785_vm13 = vmor %vm783_vm12, %vm784_vm11  ;;  %4824 = vst [vmem:[#allocation52_spill] sm:$0xff] %v3817_v29  ;;  %1092 = vmatpush.msrb.mxu0 %v3822_v33  ;;  %v3839_v52 = vld [vmem:[#allocation17 + $0x80] sm:$0xff]  ;;  %v529_v58 = vadd.f32 %v528_v11, %v3796_v4  ;;  %v4020_v4 = vld [vmem:[#allocation17 + $0x38] sm:$0xff] }
 0x22b   :  { %v793_v3 = vmul.f32 0.0, %v771_v1  ;;  %v780_v5 = vsub.f32 1.0, %v779_v63  ;;  %4825 = vst [vmem:[#allocation53_spill] sm:$0xff] %v3839_v52  ;;  %v3848_v60 = vld [vmem:[#allocation17 + $0x20] sm:$0xff] }
 0x22c   :  { %1093 = vmatpush.msrb.mxu0 %v3825_v35  ;;  %v3851_v0 = vld [vmem:[#allocation17] sm:$0xff] }
 0x22d   :  { %v3801_v6 = vadd.f32 %v794_v2, %v793_v3  ;;  %v781_v7 = vmul.f32 %v2815_v56, %v780_v5 }
 0x22e   :  { %1094 = vmatpush.msrb.mxu0 %v3828_v36 }
 0x22f   :  { %v782_v13 = vadd.f32 %v2815_v56, %v781_v7  ;;  %2818 = vtanh.f32 %v3801_v6 }
 0x230   :  { %1095 = vmatpush.msrb.mxu0 %v3831_v42 }
 0x231   :  { %v786_v17 = vsel %vm785_vm13, %v2815_v56, %v782_v13  ;;  %v3841_v56 = vld [vmem:[#allocation17 + $0x60] sm:$0xff] }
 0x232   :  { %v791_v23 = vsel %vm788_vm14, %v790_v18, %v786_v17  ;;  %1096 = vmatpush.msrb.mxu0 %v3836_v48 }
 0x234   :  { %1097 = vmatpush.msrb.mxu0 %v3839_v52 }
 0x235   :  { %v2819_v21 = vpop.eup %2818 }
 0x236   :  { %v3804_v24 = vmul.f32 %v2819_v21, %v791_v23  ;;  %1098 = vmatpush.msrb.mxu0 %v3841_v56 }
 0x238   :  { %4822 = vst [vmem:[#allocation50_spill] sm:$0xff] %v3804_v24  ;;  %884 = vmatmul.f32.vlgmr.msra.gmra.mxu0 %v3804_v24  ;;  %904 = vmatmul.f32.vlgmr.msrb.gmra.mxu1 %v3804_v24 }
 0x239   :  { %924 = vmatmul.f32.vlgmr.msra.gmra.mxu2 %v3804_v24  ;;  %944 = vmatmul.f32.vlgmr.msra.gmra.mxu3 %v3804_v24  ;;  %v3956_v24 = vld [vmem:[#allocation17 + $0xf0] sm:$0xff] }
 0x2b5   :  { %v885_v39 = vpop.f32.mrf.mxu0  ;;  %v905_v41 = vpop.f32.mrf.mxu1 }
 0x2b6   :  { %v948_v45 = vadd.f32 %v885_v39, %v3733_v19  ;;  %v949_v47 = vadd.f32 %v905_v41, %v3735_v20  ;;  %v3845_v19 = vld [vmem:[#allocation17 + $0x40] sm:$0xff] }
 0x2b7   :  { %4826 = vst [vmem:[#allocation54_spill] sm:$0xff] %v3845_v19  ;;  %1099 = vmatpush.msrb.mxu0 %v3845_v19 }
 0x2b8   :  { %v2748_v51 = vmul.f32 -1.442695, %v948_v45  ;;  %v2749_v8 = vmul.f32 -1.442695, %v949_v47 }
 0x2b9   :  { %1100 = vmatpush.msrb.mxu0 %v3848_v60 }
 0x2ba   :  { %2820 = vpow2.f32 %v2748_v51 }
 0x2bb   :  { %2822 = vpow2.f32 %v2749_v8  ;;  %1101 = vmatpush.msrb.mxu0 %v3851_v0 }
 0x2bc   :  { %v945_v20 = vpop.f32.mrf.mxu3  ;;  %v925_v7 = vpop.f32.mrf.mxu2 }
 0x2bd   :  { %v951_v59 = vadd.f32 %v945_v20, %v529_v58  ;;  %v950_v17 = vadd.f32 %v925_v7, %v3727_v14 }
 0x2bf   :  { %v2750_v63 = vmul.f32 -1.442695, %v951_v59 }
 0x2c0   :  { %v2821_v1 = vpop.eup %2820 }
 0x2c1   :  { %v2823_v2 = vpop.eup %2822  ;;  %v955_v3 = vadd.f32 1.0, %v2821_v1  ;;  %2824 = vpow2.f32 %v2750_v63 }
 0x2c2   :  { %v974_v5 = vadd.f32 1.0, %v2823_v2 }
 0x2c3   :  { %2826 = vrcp.f32 %v955_v3  ;;  %v967_v41 = vand.u32 2147483648, %v955_v3  ;;  %v965_v51 = vand.u32 2147483647, %v955_v3  ;;  %vm961_vm1 = vweird.f32 %v955_v3 }
 0x2c4   :  { %2828 = vrcp.f32 %v974_v5  ;;  %v986_v45 = vand.u32 2147483648, %v974_v5  ;;  %v984_v58 = vand.u32 2147483647, %v974_v5  ;;  %vm980_vm3 = vweird.f32 %v974_v5 }
 0x2c5   :  { %v968_v14 = vor.u32 1.1754944e-38, %v967_v41  ;;  %vm966_vm6 = vcmp.eq.f32.partialorder %v965_v51, 8.507059e+37 }
 0x2c6   :  { %v987_v2 = vor.u32 1.1754944e-38, %v986_v45  ;;  %vm985_vm7 = vcmp.eq.f32.partialorder %v984_v58, 8.507059e+37 }
 0x2c7   :  { %v2825_v10 = vpop.eup %2824 }
 0x2c8   :  { %v994_v13 = vadd.f32 1.0, %v2825_v10 }
 0x2c9   :  { %v2827_v15 = vpop.eup %2826 }
 0x2ca   :  { %v2829_v18 = vpop.eup %2828  ;;  %v957_v21 = vmul.f32 %v2827_v15, %v955_v3  ;;  %2830 = vrcp.f32 %v994_v13  ;;  %vm962_vm15 = vweird.f32 %v2827_v15  ;;  %v1006_v41 = vand.u32 2147483648, %v994_v13 }
 0x2cb   :  { %v976_v23 = vmul.f32 %v2829_v18, %v974_v5  ;;  %2832 = vtanh.f32 %v950_v17  ;;  %vm981_vm0 = vweird.f32 %v2829_v18  ;;  %vm963_vm4 = vmor %vm961_vm1, %vm962_vm15  ;;  %vm1000_vm9 = vweird.f32 %v994_v13 }
 0x2cc   :  { %v958_v11 = vsub.f32 1.0, %v957_v21  ;;  %vm982_vm5 = vmor %vm980_vm3, %vm981_vm0  ;;  %v1007_v51 = vor.u32 1.1754944e-38, %v1006_v41  ;;  %v3918_v41 = vld [vmem:[#allocation17 + $0x178] sm:$0xff] }
 0x2cd   :  { %v977_v39 = vsub.f32 1.0, %v976_v23 }
 0x2ce   :  { %v959_v47 = vmul.f32 %v2827_v15, %v958_v11 }
 0x2cf   :  { %v978_v8 = vmul.f32 %v2829_v18, %v977_v39 }
 0x2d0   :  { %v2831_v20 = vpop.eup %2830  ;;  %v960_v59 = vadd.f32 %v2827_v15, %v959_v47 }
 0x2d1   :  { %v979_v63 = vadd.f32 %v2829_v18, %v978_v8  ;;  %v996_v1 = vmul.f32 %v2831_v20, %v994_v13  ;;  %v2833_v10 = vpop.eup %2832  ;;  %vm1001_vm8 = vweird.f32 %v2831_v20 }
 0x2d2   :  { %v964_v7 = vsel %vm963_vm4, %v2827_v15, %v960_v59  ;;  %v1004_v15 = vand.u32 2147483647, %v994_v13  ;;  %vm1002_vm10 = vmor %vm1000_vm9, %vm1001_vm8  ;;  %v3870_v13 = vld [vmem:[#allocation17 + $0x1f0] sm:$0xff]  ;;  %v3878_v59 = vld [vmem:[#allocation17 + $0x1c0] sm:$0xff] }
 0x2d3   :  { %v969_v17 = vsel %vm966_vm6, %v968_v14, %v964_v7  ;;  %v983_v21 = vsel %vm982_vm5, %v2829_v18, %v979_v63  ;;  %v997_v23 = vsub.f32 1.0, %v996_v1  ;;  %4829 = vst [vmem:[#allocation57_spill] sm:$0xff] %v3870_v13  ;;  %1344 = vmatpush.msra.mxu2 %v3870_v13  ;;  %v3880_v14 = vld [vmem:[#allocation17 + $0x1c8] sm:$0xff]  ;;  %v3882_v63 = vld [vmem:[#allocation17 + $0x1d0] sm:$0xff]  ;;  %v3886_v1 = vld [vmem:[#allocation17 + $0x1d8] sm:$0xff] }
 0x2d4   :  { %v988_v11 = vsel %vm985_vm7, %v987_v2, %v983_v21  ;;  %v1011_v39 = vmul.f32 %v2833_v10, %v969_v17  ;;  %vm1005_vm11 = vcmp.eq.f32.partialorder %v1004_v15, 8.507059e+37  ;;  %4830 = vst [vmem:[#allocation58_spill] sm:$0xff] %v3878_v59  ;;  %v3890_v2 = vld [vmem:[#allocation17 + $0x1a0] sm:$0xff]  ;;  %v3892_v7 = vld [vmem:[#allocation17 + $0x1a8] sm:$0xff]  ;;  %v3894_v10 = vld [vmem:[#allocation17 + $0x1b0] sm:$0xff] }
 0x2d5   :  { %v1010_v29 = vmul.f32 %v988_v11, %v3801_v6  ;;  %v998_v47 = vmul.f32 %v2831_v20, %v997_v23  ;;  %v3866_v6 = vld [vmem:[#allocation17 + $0x1e0] sm:$0xff]  ;;  %4831 = vst [vmem:[#allocation59_spill] sm:$0xff] %v3880_v14  ;;  %1345 = vmatpush.msra.mxu2 %v3882_v63  ;;  %v3898_v17 = vld [vmem:[#allocation17 + $0x1b8] sm:$0xff]  ;;  %v3904_v23 = vld [vmem:[#allocation17 + $0x188] sm:$0xff] }
 0x2d6   :  { %1304 = vmatpush.msra.mxu0 %v3866_v6  ;;  %4832 = vst [vmem:[#allocation60_spill] sm:$0xff] %v3898_v17  ;;  %v3902_v21 = vld [vmem:[#allocation17 + $0x180] sm:$0xff]  ;;  %v3906_v11 = vld [vmem:[#allocation17 + $0x190] sm:$0xff]  ;;  %v3924_v15 = vld [vmem:[#allocation17 + $0x148] sm:$0xff] }
 0x2d7   :  { %v3857_v3 = vadd.f32 %v1011_v39, %v1010_v29  ;;  %v999_v5 = vadd.f32 %v2831_v20, %v998_v47  ;;  %v3868_v29 = vld [vmem:[#allocation17 + $0x1e8] sm:$0xff]  ;;  %1346 = vmatpush.msra.mxu2 %v3894_v10  ;;  %4833 = vst [vmem:[#allocation61_spill] sm:$0xff] %v3902_v21  ;;  %v3910_v39 = vld [vmem:[#allocation17 + $0x198] sm:$0xff] }
 0x2d8   :  { %4828 = vst [vmem:[#allocation56_spill] sm:$0xff] %v3868_v29  ;;  %1324 = vmatpush.msrb.mxu1 %v3868_v29  ;;  %1305 = vmatpush.msra.mxu0 %v3878_v59  ;;  %v3914_v47 = vld [vmem:[#allocation17 + $0x168] sm:$0xff] }
 0x2d9   :  { %2834 = vtanh.f32 %v3857_v3  ;;  %v1003_v45 = vsel %vm1002_vm10, %v2831_v20, %v999_v5  ;;  %v3874_v20 = vld [vmem:[#allocation17 + $0x1f8] sm:$0xff]  ;;  %4834 = vst [vmem:[#allocation62_spill] sm:$0xff] %v3904_v23  ;;  %1347 = vmatpush.msra.mxu2 %v3906_v11  ;;  %v3916_v5 = vld [vmem:[#allocation17 + $0x170] sm:$0xff] }
 0x2da   :  { %v1008_v8 = vsel %vm1005_vm11, %v1007_v51, %v1003_v45  ;;  %1364 = vmatpush.msra.mxu3 %v3874_v20  ;;  %1325 = vmatpush.msrb.mxu1 %v3880_v14  ;;  %4835 = vst [vmem:[#allocation63_spill] sm:$0xff] %v3906_v11  ;;  %v3926_v45 = vld [vmem:[#allocation17 + $0x150] sm:$0xff]  ;;  %v3928_v51 = vld [vmem:[#allocation17 + $0x158] sm:$0xff] }
 0x2db   :  { %1306 = vmatpush.msra.mxu0 %v3890_v2  ;;  %1348 = vmatpush.msra.mxu2 %v3916_v5 }
 0x2dc   :  { %1365 = vmatpush.msra.mxu3 %v3886_v1  ;;  %1326 = vmatpush.msrb.mxu1 %v3892_v7 }
 0x2dd   :  { %1307 = vmatpush.msra.mxu0 %v3902_v21  ;;  %1349 = vmatpush.msra.mxu2 %v3926_v45 }
 0x2de   :  { %1366 = vmatpush.msra.mxu3 %v3898_v17  ;;  %1327 = vmatpush.msrb.mxu1 %v3904_v23 }
 0x2df   :  { %v2835_v18 = vpop.eup %2834  ;;  %1308 = vmatpush.msra.mxu0 %v3812_v9 }
 0x2e0   :  { %v3860_v58 = vmul.f32 %v2835_v18, %v1008_v8  ;;  %1367 = vmatpush.msra.mxu3 %v3910_v39  ;;  %1328 = vmatpush.msrb.mxu1 %v3914_v47  ;;  %v3934_v18 = vld [vmem:[#allocation17 + $0x128] sm:$0xff]  ;;  %v3936_v8 = vld [vmem:[#allocation17 + $0x130] sm:$0xff] }
 0x2e1   :  { %1309 = vmatpush.msra.mxu0 %v3819_v30  ;;  %4836 = vst [vmem:[#allocation64_spill] sm:$0xff] %v3936_v8  ;;  %1350 = vmatpush.msra.mxu2 %v3936_v8 }
 0x2e2   :  { %4827 = vst [vmem:[#allocation55_spill] sm:$0xff] %v3860_v58  ;;  %1102 = vmatmul.f32.vlgmr.msrb.gmra.mxu0 %v3860_v58  ;;  %1122 = vmatmul.f32.vlgmr.msra.gmra.mxu1 %v3860_v58 }
 0x2e3   :  { %1142 = vmatmul.f32.vlgmr.msrb.gmra.mxu2 %v3860_v58  ;;  %1162 = vmatmul.f32.vlgmr.msrb.gmra.mxu3 %v3860_v58  ;;  %v3954_v58 = vld [vmem:[#allocation17 + $0xe8] sm:$0xff] }
 0x2e4   :  { %1368 = vmatpush.msra.mxu3 %v3918_v41  ;;  %1329 = vmatpush.msrb.mxu1 %v3924_v15 }
 0x2e5   :  { %1310 = vmatpush.msra.mxu0 %v3822_v33  ;;  %1351 = vmatpush.msra.mxu2 %v3946_v54 }
 0x2e6   :  { %1369 = vmatpush.msra.mxu3 %v3928_v51  ;;  %1330 = vmatpush.msrb.mxu1 %v3934_v18 }
 0x2e7   :  { %1311 = vmatpush.msra.mxu0 %v3825_v35  ;;  %1352 = vmatpush.msra.mxu2 %v3956_v24 }
 0x2e8   :  { %1370 = vmatpush.msra.mxu3 %v3938_v12  ;;  %1331 = vmatpush.msrb.mxu1 %v3944_v62 }
 0x2e9   :  { %1312 = vmatpush.msra.mxu0 %v3828_v36  ;;  %1353 = vmatpush.msra.mxu2 %v3966_v40 }
 0x2ea   :  { %1371 = vmatpush.msra.mxu3 %v3948_v53  ;;  %1332 = vmatpush.msrb.mxu1 %v3954_v58 }
 0x2eb   :  { %1313 = vmatpush.msra.mxu0 %v3831_v42  ;;  %1354 = vmatpush.msra.mxu2 %v3978_v55 }
 0x2ec   :  { %1372 = vmatpush.msra.mxu3 %v3958_v46  ;;  %1333 = vmatpush.msrb.mxu1 %v3964_v49 }
 0x2ed   :  { %1314 = vmatpush.msra.mxu0 %v3836_v48 }
 0x2ee   :  { %1373 = vmatpush.msra.mxu3 %v3968_v57  ;;  %1334 = vmatpush.msrb.mxu1 %v3976_v34 }
 0x2ef   :  { %1315 = vmatpush.msra.mxu0 %v3839_v52 }
 0x2f0   :  { %1374 = vmatpush.msra.mxu3 %v3980_v38 }
 0x2f1   :  { %1316 = vmatpush.msra.mxu0 %v3841_v56 }
 0x2f3   :  { %1317 = vmatpush.msra.mxu0 %v3845_v19  ;;  %v4030_v19 = vld [vmem:[#allocation17 + $0x18] sm:$0xff] }
 0x2f5   :  { %1318 = vmatpush.msra.mxu0 %v3848_v60 }
 0x2f7   :  { %1319 = vmatpush.msra.mxu0 %v3851_v0 }
 0x2f9   :  { %1522 = vmatpush.msrb.mxu0 %v3866_v6 }
 0x2fb   :  { %1523 = vmatpush.msrb.mxu0 %v3878_v59 }
 0x2fd   :  { %1524 = vmatpush.msrb.mxu0 %v3890_v2 }
 0x2ff   :  { %1525 = vmatpush.msrb.mxu0 %v3902_v21 }
 0x301   :  { %1526 = vmatpush.msrb.mxu0 %v3812_v9 }
 0x303   :  { %1527 = vmatpush.msrb.mxu0 %v3819_v30 }
 0x305   :  { %1528 = vmatpush.msrb.mxu0 %v3822_v33 }
 0x307   :  { %1529 = vmatpush.msrb.mxu0 %v3825_v35 }
 0x309   :  { %1530 = vmatpush.msrb.mxu0 %v3828_v36 }
 0x30b   :  { %1531 = vmatpush.msrb.mxu0 %v3831_v42 }
 0x30d   :  { %1532 = vmatpush.msrb.mxu0 %v3836_v48 }
 0x35f   :  { %v1103_v61 = vpop.f32.mrf.mxu0  ;;  %v1123_v50 = vpop.f32.mrf.mxu1 }
 0x360   :  { %v1166_v44 = vadd.f32 %v1103_v61, %v3744_v25  ;;  %v1167_v43 = vadd.f32 %v1123_v50, %v3746_v26  ;;  %v3986_v25 = vld [vmem:[#allocation17 + $0x88] sm:$0xff]  ;;  %v3988_v26 = vld [vmem:[#allocation17 + $0x90] sm:$0xff]  ;;  %v3990_v50 = vld [vmem:[#allocation17 + $0x98] sm:$0xff] }
 0x361   :  { %4838 = vst [vmem:[#allocation66_spill] sm:$0xff] %v3986_v25  ;;  %1335 = vmatpush.msrb.mxu1 %v3986_v25  ;;  %v3998_v61 = vld [vmem:[#allocation17 + $0x78] sm:$0xff]  ;;  %1355 = vmatpush.msra.mxu2 %v3988_v26 }
 0x362   :  { %v2751_v37 = vmul.f32 -1.442695, %v1166_v44  ;;  %v2752_v28 = vmul.f32 -1.442695, %v1167_v43  ;;  %v3994_v43 = vld [vmem:[#allocation17 + $0x68] sm:$0xff]  ;;  %v3996_v44 = vld [vmem:[#allocation17 + $0x70] sm:$0xff]  ;;  %1375 = vmatpush.msra.mxu3 %v3990_v50 }
 0x363   :  { %4839 = vst [vmem:[#allocation67_spill] sm:$0xff] %v3994_v43  ;;  %1336 = vmatpush.msrb.mxu1 %v3994_v43  ;;  %v4010_v25 = vld [vmem:[#allocation17 + $0x58] sm:$0xff]  ;;  %1356 = vmatpush.msra.mxu2 %v3996_v44 }
 0x364   :  { %2836 = vpow2.f32 %v2751_v37  ;;  %4840 = vst [vmem:[#allocation68_spill] sm:$0xff] %v3996_v44  ;;  %1376 = vmatpush.msra.mxu3 %v3998_v61 }
 0x365   :  { %4841 = vst [vmem:[#allocation69_spill] sm:$0xff] %v3998_v61  ;;  %2838 = vpow2.f32 %v2752_v28  ;;  %v4014_v28 = vld [vmem:[#allocation17 + $0x28] sm:$0xff]  ;;  %1337 = vmatpush.msrb.mxu1 %v4004_v32  ;;  %1357 = vmatpush.msra.mxu2 %v4008_v31  ;;  %v4028_v61 = vld [vmem:[#allocation17 + $0x10] sm:$0xff] }
 0x366   :  { %v1163_v37 = vpop.f32.mrf.mxu3  ;;  %1377 = vmatpush.msra.mxu3 %v4010_v25 }
 0x367   :  { %v1169_v52 = vadd.f32 %v1163_v37, %v532_v27  ;;  %v4024_v27 = vld [vmem:[#allocation17 + $0x8] sm:$0xff]  ;;  %1338 = vmatpush.msrb.mxu1 %v4014_v28  ;;  %1358 = vmatpush.msra.mxu2 %v4018_v16 }
 0x368   :  { %1378 = vmatpush.msra.mxu3 %v4020_v4 }
 0x369   :  { %v2753_v43 = vmul.f32 -1.442695, %v1169_v52  ;;  %1339 = vmatpush.msrb.mxu1 %v4024_v27  ;;  %1359 = vmatpush.msra.mxu2 %v4028_v61 }
 0x36a   :  { %v2837_v37 = vpop.eup %2836  ;;  %1379 = vmatpush.msra.mxu3 %v4030_v19 }
 0x36b   :  { %v2839_v32 = vpop.eup %2838  ;;  %v4032_v44 = vadd.f32 1.0, %v2837_v37  ;;  %2840 = vpow2.f32 %v2753_v43  ;;  %1542 = vmatpush.msra.mxu1 %v3868_v29  ;;  %1562 = vmatpush.msrb.mxu2 %v3870_v13 }
 0x36c   :  { %v4036_v52 = vadd.f32 1.0, %v2839_v32  ;;  %1582 = vmatpush.msrb.mxu3 %v3874_v20  ;;  %v1143_v32 = vpop.f32.mrf.mxu2 }
 0x36d   :  { %2842 = vrcp.f32 %v4032_v44  ;;  %1543 = vmatpush.msra.mxu1 %v3880_v14  ;;  %1563 = vmatpush.msrb.mxu2 %v3882_v63  ;;  %v1168_v13 = vadd.f32 %v1143_v32, %v3740_v22  ;;  %vm1179_vm14 = vweird.f32 %v4032_v44 }
 0x36e   :  { %2844 = vrcp.f32 %v4036_v52  ;;  %1583 = vmatpush.msrb.mxu3 %v3886_v1  ;;  %vm1198_vm15 = vweird.f32 %v4036_v52 }
 0x36f   :  { %1544 = vmatpush.msra.mxu1 %v3892_v7  ;;  %1564 = vmatpush.msrb.mxu2 %v3894_v10 }
 0x370   :  { %1584 = vmatpush.msrb.mxu3 %v3898_v17  ;;  %v1185_v17 = vand.u32 2147483648, %v4032_v44 }
 0x371   :  { %v2841_v43 = vpop.eup %2840  ;;  %1545 = vmatpush.msra.mxu1 %v3904_v23  ;;  %1565 = vmatpush.msrb.mxu2 %v3906_v11  ;;  %v1204_v23 = vand.u32 2147483648, %v4036_v52  ;;  %v1183_v11 = vand.u32 2147483647, %v4032_v44 }
 0x372   :  { %v4052_v37 = vadd.f32 1.0, %v2841_v43  ;;  %1585 = vmatpush.msrb.mxu3 %v3910_v39  ;;  %v1186_v30 = vor.u32 1.1754944e-38, %v1185_v17 }
 0x373   :  { %v2843_v29 = vpop.eup %2842  ;;  %1546 = vmatpush.msra.mxu1 %v3914_v47  ;;  %1566 = vmatpush.msrb.mxu2 %v3916_v5  ;;  %vm1184_vm3 = vcmp.eq.f32.partialorder %v1183_v11, 8.507059e+37  ;;  %v4845_v11 = vld [vmem:[#allocation67_spill] sm:$0xff] }
 0x374   :  { %v2845_v59 = vpop.eup %2844  ;;  %v1175_v14 = vmul.f32 %v2843_v29, %v4032_v44  ;;  %2846 = vrcp.f32 %v4052_v37  ;;  %1586 = vmatpush.msrb.mxu3 %v3918_v41  ;;  %vm1180_vm12 = vweird.f32 %v2843_v29  ;;  %v1224_v42 = vand.u32 2147483648, %v4052_v37 }
 0x375   :  { %v1194_v43 = vmul.f32 %v2845_v59, %v4036_v52  ;;  %2848 = vtanh.f32 %v1168_v13  ;;  %1547 = vmatpush.msra.mxu1 %v3924_v15  ;;  %vm1199_vm13 = vweird.f32 %v2845_v59  ;;  %1567 = vmatpush.msrb.mxu2 %v3926_v45  ;;  %vm1181_vm0 = vmor %vm1179_vm14, %vm1180_vm12  ;;  %vm1218_vm6 = vweird.f32 %v4052_v37 }
 0x376   :  { %v1176_v22 = vsub.f32 1.0, %v1175_v14  ;;  %v1202_v14 = vand.u32 2147483647, %v4036_v52  ;;  %1587 = vmatpush.msrb.mxu3 %v3928_v51  ;;  %vm1200_vm1 = vmor %vm1198_vm15, %vm1199_vm13 }
 0x377   :  { %v1195_v32 = vsub.f32 1.0, %v1194_v43  ;;  %1548 = vmatpush.msra.mxu1 %v3934_v18  ;;  %1568 = vmatpush.msrb.mxu2 %v3936_v8 }
 0x378   :  { %v1177_v21 = vmul.f32 %v2843_v29, %v1176_v22  ;;  %1588 = vmatpush.msrb.mxu3 %v3938_v12  ;;  %vm1203_vm4 = vcmp.eq.f32.partialorder %v1202_v14, 8.507059e+37  ;;  %v4846_v14 = vld [vmem:[#allocation68_spill] sm:$0xff] }
 0x379   :  { %v1196_v9 = vmul.f32 %v2845_v59, %v1195_v32  ;;  %1549 = vmatpush.msra.mxu1 %v3944_v62  ;;  %1569 = vmatpush.msrb.mxu2 %v3946_v54 }
 0x37a   :  { %v4078_v13 = vpop.eup %2846  ;;  %v1178_v43 = vadd.f32 %v2843_v29, %v1177_v21  ;;  %v1205_v21 = vor.u32 1.1754944e-38, %v1204_v23  ;;  %1589 = vmatpush.msrb.mxu3 %v3948_v53  ;;  %v4844_v23 = vld [vmem:[#allocation66_spill] sm:$0xff] }
 0x37b   :  { %v1197_v22 = vadd.f32 %v2845_v59, %v1196_v9  ;;  %v1214_v32 = vmul.f32 %v4078_v13, %v4052_v37  ;;  %v2849_v33 = vpop.eup %2848  ;;  %1550 = vmatpush.msra.mxu1 %v3954_v58  ;;  %1570 = vmatpush.msrb.mxu2 %v3956_v24  ;;  %vm1219_vm5 = vweird.f32 %v4078_v13 }
 0x37c   :  { %v1182_v44 = vsel %vm1181_vm0, %v2843_v29, %v1178_v43  ;;  %1590 = vmatpush.msrb.mxu3 %v3958_v46  ;;  %vm1220_vm7 = vmor %vm1218_vm6, %vm1219_vm5  ;;  %v4847_v43 = vld [vmem:[#allocation69_spill] sm:$0xff] }
 0x37d   :  { %v1187_v52 = vsel %vm1184_vm3, %v1186_v30, %v1182_v44  ;;  %v1201_v17 = vsel %vm1200_vm1, %v2845_v59, %v1197_v22  ;;  %v1215_v9 = vsub.f32 1.0, %v1214_v32  ;;  %1551 = vmatpush.msra.mxu1 %v3964_v49  ;;  %1571 = vmatpush.msrb.mxu2 %v3966_v40  ;;  %v4849_v30 = vld [vmem:[#allocation70_spill] sm:$0xff]  ;;  %v4854_v44 = vld [vmem:[#allocation59_spill] sm:$0xff] }
 0x37e   :  { %v1206_v8 = vsel %vm1203_vm4, %v1205_v21, %v1201_v17  ;;  %v1229_v12 = vmul.f32 %v2849_v33, %v1187_v52  ;;  %1591 = vmatpush.msrb.mxu3 %v3968_v57  ;;  %v4853_v21 = vld [vmem:[#allocation58_spill] sm:$0xff] }
 0x37f   :  { %v1228_v29 = vmul.f32 %v1206_v8, %v3857_v3  ;;  %v1216_v35 = vmul.f32 %v4078_v13, %v1215_v9  ;;  %1552 = vmatpush.msra.mxu1 %v3976_v34  ;;  %1572 = vmatpush.msrb.mxu2 %v3978_v55  ;;  %v4843_v3 = vld [vmem:[#allocation53_spill] sm:$0xff]  ;;  %v1225_v8 = vor.u32 1.1754944e-38, %v1224_v42  ;;  %v4857_v33 = vld [vmem:[#allocation62_spill] sm:$0xff] }
 0x380   :  { %1592 = vmatpush.msrb.mxu3 %v3980_v38  ;;  %1533 = vmatpush.msrb.mxu0 %v4843_v3 }
 0x381   :  { %v4102_v59 = vadd.f32 %v1229_v12, %v1228_v29  ;;  %v1217_v36 = vadd.f32 %v4078_v13, %v1216_v35  ;;  %v1222_v12 = vand.u32 2147483647, %v4052_v37  ;;  %1553 = vmatpush.msra.mxu1 %v4844_v23  ;;  %1573 = vmatpush.msrb.mxu2 %v3988_v26  ;;  %v4848_v37 = vld [vmem:[#allocation54_spill] sm:$0xff] }
 0x382   :  { %1593 = vmatpush.msrb.mxu3 %v3990_v50  ;;  %1534 = vmatpush.msrb.mxu0 %v3841_v56  ;;  %v4851_v56 = vld [vmem:[#allocation56_spill] sm:$0xff] }
 0x383   :  { %2850 = vtanh.f32 %v4102_v59  ;;  %v1221_v48 = vsel %vm1220_vm7, %v4078_v13, %v1217_v36  ;;  %1554 = vmatpush.msra.mxu1 %v4845_v11  ;;  %1574 = vmatpush.msrb.mxu2 %v4846_v14  ;;  %vm1223_vm8 = vcmp.eq.f32.partialorder %v1222_v12, 8.507059e+37 }
 0x384   :  { %1594 = vmatpush.msrb.mxu3 %v4847_v43  ;;  %1535 = vmatpush.msrb.mxu0 %v4848_v37  ;;  %v1226_v32 = vsel %vm1223_vm8, %v1225_v8, %v1221_v48 }
 0x385   :  { %1555 = vmatpush.msra.mxu1 %v4849_v30  ;;  %1575 = vmatpush.msrb.mxu2 %v4008_v31 }
 0x386   :  { %1595 = vmatpush.msrb.mxu3 %v4010_v25  ;;  %1536 = vmatpush.msrb.mxu0 %v3848_v60  ;;  %v4852_v60 = vld [vmem:[#allocation57_spill] sm:$0xff] }
 0x387   :  { %1556 = vmatpush.msra.mxu1 %v4014_v28  ;;  %1576 = vmatpush.msrb.mxu2 %v4018_v16 }
 0x388   :  { %1596 = vmatpush.msrb.mxu3 %v4020_v4  ;;  %1537 = vmatpush.msrb.mxu0 %v3851_v0  ;;  %v4855_v0 = vld [vmem:[#allocation60_spill] sm:$0xff] }
 0x389   :  { %v2851_v22 = vpop.eup %2850  ;;  %1557 = vmatpush.msra.mxu1 %v4024_v27  ;;  %1577 = vmatpush.msrb.mxu2 %v4028_v61 }
 0x38a   :  { %v4129_v13 = vmul.f32 %v2851_v22, %v1226_v32  ;;  %1597 = vmatpush.msrb.mxu3 %v4030_v19 }
 0x38c   :  { %4850 = vst [vmem:[#allocation53_spill] sm:$0xff] %v4129_v13  ;;  %1320 = vmatmul.f32.vlgmr.msra.gmra.mxu0 %v4129_v13  ;;  %1340 = vmatmul.f32.vlgmr.msrb.gmra.mxu1 %v4129_v13 }
 0x38d   :  { %1360 = vmatmul.f32.vlgmr.msra.gmra.mxu2 %v4129_v13  ;;  %1380 = vmatmul.f32.vlgmr.msra.gmra.mxu3 %v4129_v13  ;;  %v4405_v13 = vld [vmem:[#allocation17 + $0x58] sm:$0xff] }
 0x38e   :  { %1740 = vmatpush.msra.mxu0 %v3866_v6  ;;  %1760 = vmatpush.msrb.mxu1 %v4851_v56  ;;  %v4856_v6 = vld [vmem:[#allocation61_spill] sm:$0xff] }
 0x38f   :  { %1780 = vmatpush.msra.mxu2 %v4852_v60  ;;  %1800 = vmatpush.msra.mxu3 %v3874_v20  ;;  %v4858_v20 = vld [vmem:[#allocation63_spill] sm:$0xff] }
 0x390   :  { %1741 = vmatpush.msra.mxu0 %v4853_v21  ;;  %1761 = vmatpush.msrb.mxu1 %v4854_v44 }
 0x391   :  { %1781 = vmatpush.msra.mxu2 %v3882_v63  ;;  %1801 = vmatpush.msra.mxu3 %v3886_v1  ;;  %v4859_v63 = vld [vmem:[#allocation64_spill] sm:$0xff]  ;;  %v4860_v1 = vld [vmem:[#allocation65_spill] sm:$0xff] }
 0x392   :  { %1742 = vmatpush.msra.mxu0 %v3890_v2  ;;  %1762 = vmatpush.msrb.mxu1 %v3892_v7 }
 0x393   :  { %1782 = vmatpush.msra.mxu2 %v3894_v10  ;;  %1802 = vmatpush.msra.mxu3 %v4855_v0 }
 0x394   :  { %1743 = vmatpush.msra.mxu0 %v4856_v6  ;;  %1763 = vmatpush.msrb.mxu1 %v4857_v33 }
 0x395   :  { %1783 = vmatpush.msra.mxu2 %v4858_v20  ;;  %1803 = vmatpush.msra.mxu3 %v3910_v39  ;;  %v4213_v20 = vld [vmem:[#allocation17 + $0x140] sm:$0xff] }
 0x396   :  { %1764 = vmatpush.msrb.mxu1 %v3914_v47 }
 0x397   :  { %1784 = vmatpush.msra.mxu2 %v3916_v5  ;;  %1804 = vmatpush.msra.mxu3 %v3918_v41 }
 0x398   :  { %1765 = vmatpush.msrb.mxu1 %v3924_v15  ;;  %v4865_v15 = vld [vmem:[#allocation31_spill] sm:$0xff] }
 0x399   :  { %1785 = vmatpush.msra.mxu2 %v3926_v45  ;;  %1805 = vmatpush.msra.mxu3 %v3928_v51 }
 0x39a   :  { %1766 = vmatpush.msrb.mxu1 %v3934_v18 }
 0x39b   :  { %1786 = vmatpush.msra.mxu2 %v4859_v63  ;;  %1806 = vmatpush.msra.mxu3 %v4860_v1  ;;  %v4216_v63 = vld [vmem:[#allocation17 + $0x120] sm:$0xff] }
 0x39c   :  { %1767 = vmatpush.msrb.mxu1 %v3944_v62  ;;  %v4219_v1 = vld [vmem:[#allocation17 + $0x100] sm:$0xff] }
 0x39d   :  { %1787 = vmatpush.msra.mxu2 %v3946_v54  ;;  %1807 = vmatpush.msra.mxu3 %v3948_v53 }
 0x39e   :  { %1768 = vmatpush.msrb.mxu1 %v3954_v58 }
 0x39f   :  { %1788 = vmatpush.msra.mxu2 %v3956_v24  ;;  %1808 = vmatpush.msra.mxu3 %v3958_v46 }
 0x3a0   :  { %1769 = vmatpush.msrb.mxu1 %v3964_v49  ;;  %v4862_v49 = vld [vmem:[#allocation33_spill] sm:$0xff] }
 0x3a1   :  { %1789 = vmatpush.msra.mxu2 %v3966_v40  ;;  %1809 = vmatpush.msra.mxu3 %v3968_v57  ;;  %v4861_v40 = vld [vmem:[#allocation32_spill] sm:$0xff]  ;;  %v4864_v57 = vld [vmem:[#allocation51_spill] sm:$0xff] }
 0x3a2   :  { %1770 = vmatpush.msrb.mxu1 %v3976_v34 }
 0x3a3   :  { %1790 = vmatpush.msra.mxu2 %v3978_v55  ;;  %1810 = vmatpush.msra.mxu3 %v3980_v38  ;;  %v4863_v55 = vld [vmem:[#allocation49_spill] sm:$0xff] }
 0x3a4   :  { %1771 = vmatpush.msrb.mxu1 %v4844_v23  ;;  %v535_v62 = vadd.f32 %v4864_v57, %v4863_v55  ;;  %v4230_v57 = vld [vmem:[#allocation17 + $0xa0] sm:$0xff] }
 0x3a5   :  { %1791 = vmatpush.msra.mxu2 %v3988_v26  ;;  %1811 = vmatpush.msra.mxu3 %v3990_v50 }
 0x3a6   :  { %1772 = vmatpush.msrb.mxu1 %v4845_v11 }
 0x3a7   :  { %1792 = vmatpush.msra.mxu2 %v4846_v14  ;;  %1812 = vmatpush.msra.mxu3 %v4847_v43 }
 0x3a8   :  { %1773 = vmatpush.msrb.mxu1 %v4849_v30 }
 0x3a9   :  { %1793 = vmatpush.msra.mxu2 %v4008_v31  ;;  %1813 = vmatpush.msra.mxu3 %v4010_v25 }
 0x3aa   :  { %1774 = vmatpush.msrb.mxu1 %v4014_v28 }
 0x3ab   :  { %1794 = vmatpush.msra.mxu2 %v4018_v16  ;;  %1814 = vmatpush.msra.mxu3 %v4020_v4 }
 0x3ac   :  { %1775 = vmatpush.msrb.mxu1 %v4024_v27 }
 0x3ad   :  { %1795 = vmatpush.msra.mxu2 %v4028_v61  ;;  %1815 = vmatpush.msra.mxu3 %v4030_v19 }
 0x409   :  { %v1321_v34 = vpop.f32.mrf.mxu0  ;;  %v1341_v38 = vpop.f32.mrf.mxu1 }
 0x40a   :  { %v1384_v46 = vadd.f32 %v1321_v34, %v4861_v40  ;;  %v1385_v31 = vadd.f32 %v1341_v38, %v4862_v49  ;;  %v4222_v34 = vld [vmem:[#allocation17 + $0xe0] sm:$0xff]  ;;  %v4867_v49 = vld [vmem:[#allocation35_spill] sm:$0xff] }
 0x40c   :  { %v2754_v53 = vmul.f32 -1.442695, %v1384_v46  ;;  %v2755_v54 = vmul.f32 -1.442695, %v1385_v31  ;;  %v4225_v46 = vld [vmem:[#allocation17 + $0xc0] sm:$0xff] }
 0x40e   :  { %2852 = vpow2.f32 %v2754_v53  ;;  %v4868_v53 = vld [vmem:[#allocation36_spill] sm:$0xff] }
 0x40f   :  { %2854 = vpow2.f32 %v2755_v54 }
 0x410   :  { %v1381_v4 = vpop.f32.mrf.mxu3  ;;  %v1361_v39 = vpop.f32.mrf.mxu2 }
 0x411   :  { %v1387_v24 = vadd.f32 %v1381_v4, %v535_v62  ;;  %v1386_v45 = vadd.f32 %v1361_v39, %v4865_v15 }
 0x413   :  { %v2756_v58 = vmul.f32 -1.442695, %v1387_v24  ;;  %v4233_v24 = vld [vmem:[#allocation17 + $0x80] sm:$0xff] }
 0x414   :  { %v2853_v2 = vpop.eup %2852 }
 0x415   :  { %v2855_v7 = vpop.eup %2854  ;;  %v1391_v10 = vadd.f32 1.0, %v2853_v2  ;;  %2856 = vpow2.f32 %v2756_v58  ;;  %v4235_v58 = vld [vmem:[#allocation17 + $0x60] sm:$0xff] }
 0x416   :  { %v1410_v19 = vadd.f32 1.0, %v2855_v7  ;;  %v4869_v2 = vld [vmem:[#allocation45_spill] sm:$0xff] }
 0x417   :  { %2858 = vrcp.f32 %v1391_v10  ;;  %v1403_v61 = vand.u32 2147483648, %v1391_v10  ;;  %v1401_v27 = vand.u32 2147483647, %v1391_v10  ;;  %vm1397_vm11 = vweird.f32 %v1391_v10 }
 0x418   :  { %2860 = vrcp.f32 %v1410_v19  ;;  %v1422_v28 = vand.u32 2147483648, %v1410_v19  ;;  %v1420_v17 = vand.u32 2147483647, %v1410_v19  ;;  %vm1416_vm12 = vweird.f32 %v1410_v19 }
 0x419   :  { %v1404_v35 = vor.u32 1.1754944e-38, %v1403_v61  ;;  %vm1402_vm15 = vcmp.eq.f32.partialorder %v1401_v27, 8.507059e+37  ;;  %v538_v7 = vadd.f32 %v4869_v2, %v4863_v55 }
 0x41a   :  { %v1423_v12 = vor.u32 1.1754944e-38, %v1422_v28  ;;  %vm1421_vm0 = vcmp.eq.f32.partialorder %v1420_v17, 8.507059e+37  ;;  %v4871_v28 = vld [vmem:[#allocation34_spill] sm:$0xff] }
 0x41b   :  { %v2857_v47 = vpop.eup %2856 }
 0x41c   :  { %v1430_v5 = vadd.f32 1.0, %v2857_v47  ;;  %v4243_v47 = vld [vmem:[#allocation17 + $0x20] sm:$0xff] }
 0x41d   :  { %v2859_v41 = vpop.eup %2858 }
 0x41e   :  { %v2861_v51 = vpop.eup %2860  ;;  %v1393_v18 = vmul.f32 %v2859_v41, %v1391_v10  ;;  %2862 = vrcp.f32 %v1430_v5  ;;  %vm1398_vm9 = vweird.f32 %v2859_v41  ;;  %v1442_v56 = vand.u32 2147483648, %v1430_v5  ;;  %v4240_v10 = vld [vmem:[#allocation17 + $0x40] sm:$0xff] }
 0x41f   :  { %v1412_v25 = vmul.f32 %v2861_v51, %v1410_v19  ;;  %2864 = vtanh.f32 %v1386_v45  ;;  %vm1417_vm10 = vweird.f32 %v2861_v51  ;;  %vm1399_vm13 = vmor %vm1397_vm11, %vm1398_vm9  ;;  %vm1436_vm3 = vweird.f32 %v1430_v5  ;;  %4870 = vst [vmem:[#allocation67_spill] sm:$0xff] %v4240_v10 }
 0x420   :  { %v1394_v26 = vsub.f32 1.0, %v1393_v18  ;;  %vm1418_vm14 = vmor %vm1416_vm12, %vm1417_vm10  ;;  %v1440_v60 = vand.u32 2147483647, %v1430_v5  ;;  %v1443_v44 = vor.u32 1.1754944e-38, %v1442_v56 }
 0x421   :  { %v1413_v50 = vsub.f32 1.0, %v1412_v25 }
 0x422   :  { %v1395_v16 = vmul.f32 %v2859_v41, %v1394_v26  ;;  %vm1441_vm5 = vcmp.eq.f32.partialorder %v1440_v60, 8.507059e+37 }
 0x423   :  { %v1414_v52 = vmul.f32 %v2861_v51, %v1413_v50 }
 0x424   :  { %v2863_v9 = vpop.eup %2862  ;;  %v1396_v29 = vadd.f32 %v2859_v41, %v1395_v16 }
 0x425   :  { %v1415_v36 = vadd.f32 %v2861_v51, %v1414_v52  ;;  %v1432_v42 = vmul.f32 %v2863_v9, %v1430_v5  ;;  %v2865_v23 = vpop.eup %2864  ;;  %vm1437_vm1 = vweird.f32 %v2863_v9 }
 0x426   :  { %v1400_v3 = vsel %vm1399_vm13, %v2859_v41, %v1396_v29  ;;  %vm1438_vm4 = vmor %vm1436_vm3, %vm1437_vm1  ;;  %v4246_v41 = vld [vmem:[#allocation17] sm:$0xff] }
 0x427   :  { %v1405_v48 = vsel %vm1402_vm15, %v1404_v35, %v1400_v3  ;;  %v1419_v11 = vsel %vm1418_vm14, %v2861_v51, %v1415_v36  ;;  %v1433_v8 = vsub.f32 1.0, %v1432_v42 }
 0x428   :  { %v1424_v14 = vsel %vm1421_vm0, %v1423_v12, %v1419_v11  ;;  %v1447_v43 = vmul.f32 %v2865_v23, %v1405_v48 }
 0x429   :  { %v1446_v37 = vmul.f32 %v1424_v14, %v4102_v59  ;;  %v1434_v30 = vmul.f32 %v2863_v9, %v1433_v8  ;;  %v4210_v59 = vld [vmem:[#allocation17 + $0x160] sm:$0xff] }
 0x42a   :  { %1744 = vmatpush.msra.mxu0 %v4210_v59 }
 0x42b   :  { %v4201_v22 = vadd.f32 %v1447_v43, %v1446_v37  ;;  %v1435_v32 = vadd.f32 %v2863_v9, %v1434_v30 }
 0x42c   :  { %1745 = vmatpush.msra.mxu0 %v4213_v20 }
 0x42d   :  { %2866 = vtanh.f32 %v4201_v22  ;;  %v1439_v21 = vsel %vm1438_vm4, %v2863_v9, %v1435_v32 }
 0x42e   :  { %v1444_v6 = vsel %vm1441_vm5, %v1443_v44, %v1439_v21  ;;  %1746 = vmatpush.msra.mxu0 %v4216_v63 }
 0x430   :  { %1747 = vmatpush.msra.mxu0 %v4219_v1 }
 0x432   :  { %1748 = vmatpush.msra.mxu0 %v4222_v34 }
 0x433   :  { %v2867_v0 = vpop.eup %2866 }
 0x434   :  { %v4204_v33 = vmul.f32 %v2867_v0, %v1444_v6  ;;  %1749 = vmatpush.msra.mxu0 %v4225_v46 }
 0x436   :  { %4866 = vst [vmem:[#allocation66_spill] sm:$0xff] %v4204_v33  ;;  %1538 = vmatmul.f32.vlgmr.msrb.gmra.mxu0 %v4204_v33  ;;  %1558 = vmatmul.f32.vlgmr.msra.gmra.mxu1 %v4204_v33 }
 0x437   :  { %1578 = vmatmul.f32.vlgmr.msrb.gmra.mxu2 %v4204_v33  ;;  %1598 = vmatmul.f32.vlgmr.msrb.gmra.mxu3 %v4204_v33  ;;  %v4403_v33 = vld [vmem:[#allocation17 + $0x50] sm:$0xff] }
 0x438   :  { %1750 = vmatpush.msra.mxu0 %v4230_v57 }
 0x43a   :  { %1751 = vmatpush.msra.mxu0 %v4233_v24 }
 0x43c   :  { %1752 = vmatpush.msra.mxu0 %v4235_v58 }
 0x43e   :  { %1753 = vmatpush.msra.mxu0 %v4240_v10 }
 0x440   :  { %1754 = vmatpush.msra.mxu0 %v4243_v47 }
 0x442   :  { %1755 = vmatpush.msra.mxu0 %v4246_v41 }
 0x4b3   :  { %v1539_v38 = vpop.f32.mrf.mxu0  ;;  %v1559_v40 = vpop.f32.mrf.mxu1 }
 0x4b4   :  { %v1602_v31 = vadd.f32 %v1539_v38, %v4867_v49  ;;  %v1603_v54 = vadd.f32 %v1559_v40, %v4868_v53 }
 0x4b6   :  { %v2757_v62 = vmul.f32 -1.442695, %v1602_v31  ;;  %v2758_v4 = vmul.f32 -1.442695, %v1603_v54 }
 0x4b8   :  { %2868 = vpow2.f32 %v2757_v62 }
 0x4b9   :  { %2870 = vpow2.f32 %v2758_v4 }
 0x4ba   :  { %v1599_v19 = vpop.f32.mrf.mxu3  ;;  %v1579_v25 = vpop.f32.mrf.mxu2 }
 0x4bb   :  { %v1605_v39 = vadd.f32 %v1599_v19, %v538_v7  ;;  %v1604_v16 = vadd.f32 %v1579_v25, %v4871_v28  ;;  %v4263_v19 = vld [vmem:[#allocation17 + $0x1e8] sm:$0xff]  ;;  %v4285_v25 = vld [vmem:[#allocation17 + $0x1a0] sm:$0xff] }
 0x4bc   :  { %1978 = vmatpush.msra.mxu1 %v4263_v19  ;;  %v4297_v28 = vld [vmem:[#allocation17 + $0x180] sm:$0xff] }
 0x4bd   :  { %v2759_v5 = vmul.f32 -1.442695, %v1605_v39  ;;  %v4265_v39 = vld [vmem:[#allocation17 + $0x1f0] sm:$0xff] }
 0x4be   :  { %v2869_v15 = vpop.eup %2868  ;;  %1998 = vmatpush.msrb.mxu2 %v4265_v39 }
 0x4bf   :  { %v2871_v45 = vpop.eup %2870  ;;  %v1609_v51 = vadd.f32 1.0, %v2869_v15  ;;  %2872 = vpow2.f32 %v2759_v5  ;;  %v4269_v5 = vld [vmem:[#allocation17 + $0x1f8] sm:$0xff]  ;;  %v4273_v15 = vld [vmem:[#allocation17 + $0x1c0] sm:$0xff] }
 0x4c0   :  { %v1628_v18 = vadd.f32 1.0, %v2871_v45  ;;  %2018 = vmatpush.msrb.mxu3 %v4269_v5  ;;  %v4275_v45 = vld [vmem:[#allocation17 + $0x1c8] sm:$0xff] }
 0x4c1   :  { %2874 = vrcp.f32 %v1609_v51  ;;  %v1621_v35 = vand.u32 2147483648, %v1609_v51  ;;  %v1619_v12 = vand.u32 2147483647, %v1609_v51  ;;  %vm1615_vm8 = vweird.f32 %v1609_v51  ;;  %1979 = vmatpush.msra.mxu1 %v4275_v45 }
 0x4c2   :  { %2876 = vrcp.f32 %v1628_v18  ;;  %v1640_v36 = vand.u32 2147483648, %v1628_v18  ;;  %v1638_v23 = vand.u32 2147483647, %v1628_v18  ;;  %vm1634_vm9 = vweird.f32 %v1628_v18 }
 0x4c3   :  { %v1622_v8 = vor.u32 1.1754944e-38, %v1621_v35  ;;  %vm1620_vm12 = vcmp.eq.f32.partialorder %v1619_v12, 8.507059e+37  ;;  %v4319_v35 = vld [vmem:[#allocation17 + $0x148] sm:$0xff] }
 0x4c4   :  { %v1641_v37 = vor.u32 1.1754944e-38, %v1640_v36  ;;  %vm1639_vm13 = vcmp.eq.f32.partialorder %v1638_v23, 8.507059e+37  ;;  %v4321_v36 = vld [vmem:[#allocation17 + $0x150] sm:$0xff]  ;;  %v4329_v12 = vld [vmem:[#allocation17 + $0x128] sm:$0xff]  ;;  %v4333_v23 = vld [vmem:[#allocation17 + $0x138] sm:$0xff] }
 0x4c5   :  { %v2873_v26 = vpop.eup %2872 }
 0x4c6   :  { %v1648_v50 = vadd.f32 1.0, %v2873_v26  ;;  %v4287_v26 = vld [vmem:[#allocation17 + $0x1a8] sm:$0xff] }
 0x4c7   :  { %v2875_v61 = vpop.eup %2874  ;;  %1980 = vmatpush.msra.mxu1 %v4287_v26 }
 0x4c8   :  { %v2877_v27 = vpop.eup %2876  ;;  %v1611_v52 = vmul.f32 %v2875_v61, %v1609_v51  ;;  %2878 = vrcp.f32 %v1648_v50  ;;  %vm1616_vm6 = vweird.f32 %v2875_v61  ;;  %v1660_v31 = vand.u32 2147483648, %v1648_v50  ;;  %v4277_v51 = vld [vmem:[#allocation17 + $0x1d0] sm:$0xff] }
 0x4c9   :  { %v1630_v17 = vmul.f32 %v2877_v27, %v1628_v18  ;;  %2880 = vtanh.f32 %v1604_v16  ;;  %vm1635_vm7 = vweird.f32 %v2877_v27  ;;  %vm1617_vm10 = vmor %vm1615_vm8, %vm1616_vm6  ;;  %vm1654_vm15 = vweird.f32 %v1648_v50  ;;  %v4281_v18 = vld [vmem:[#allocation17 + $0x1d8] sm:$0xff]  ;;  %1999 = vmatpush.msrb.mxu2 %v4277_v51  ;;  %v4299_v16 = vld [vmem:[#allocation17 + $0x188] sm:$0xff] }
 0x4ca   :  { %v1612_v9 = vsub.f32 1.0, %v1611_v52  ;;  %vm1636_vm11 = vmor %vm1634_vm9, %vm1635_vm7  ;;  %v1658_v53 = vand.u32 2147483647, %v1648_v50  ;;  %v1661_v62 = vor.u32 1.1754944e-38, %v1660_v31  ;;  %2019 = vmatpush.msrb.mxu3 %v4281_v18  ;;  %1981 = vmatpush.msra.mxu1 %v4299_v16  ;;  %v4305_v52 = vld [vmem:[#allocation17 + $0x198] sm:$0xff]  ;;  %v4373_v31 = vld [vmem:[#allocation17 + $0xb0] sm:$0xff] }
 0x4cb   :  { %v1631_v29 = vsub.f32 1.0, %v1630_v17  ;;  %v4309_v17 = vld [vmem:[#allocation17 + $0x168] sm:$0xff] }
 0x4cc   :  { %v1613_v42 = vmul.f32 %v2875_v61, %v1612_v9  ;;  %vm1659_vm1 = vcmp.eq.f32.partialorder %v1658_v53, 8.507059e+37  ;;  %v4311_v9 = vld [vmem:[#allocation17 + $0x170] sm:$0xff]  ;;  %1982 = vmatpush.msra.mxu1 %v4309_v17  ;;  %v4375_v53 = vld [vmem:[#allocation17 + $0xb8] sm:$0xff] }
 0x4cd   :  { %v1632_v3 = vmul.f32 %v2877_v27, %v1631_v29  ;;  %v4313_v29 = vld [vmem:[#allocation17 + $0x178] sm:$0xff] }
 0x4ce   :  { %v2879_v48 = vpop.eup %2878  ;;  %v1614_v11 = vadd.f32 %v2875_v61, %v1613_v42  ;;  %v4323_v42 = vld [vmem:[#allocation17 + $0x158] sm:$0xff]  ;;  %1983 = vmatpush.msra.mxu1 %v4319_v35 }
 0x4cf   :  { %v1633_v14 = vadd.f32 %v2877_v27, %v1632_v3  ;;  %v1650_v43 = vmul.f32 %v2879_v48, %v1648_v50  ;;  %v2881_v32 = vpop.eup %2880  ;;  %vm1655_vm14 = vweird.f32 %v2879_v48  ;;  %v4289_v50 = vld [vmem:[#allocation17 + $0x1b0] sm:$0xff] }
 0x4d0   :  { %v1618_v30 = vsel %vm1617_vm10, %v2875_v61, %v1614_v11  ;;  %vm1656_vm0 = vmor %vm1654_vm15, %vm1655_vm14  ;;  %v4293_v61 = vld [vmem:[#allocation17 + $0x1b8] sm:$0xff]  ;;  %2000 = vmatpush.msrb.mxu2 %v4289_v50  ;;  %v4331_v3 = vld [vmem:[#allocation17 + $0x130] sm:$0xff]  ;;  %1984 = vmatpush.msra.mxu1 %v4329_v12 }
 0x4d1   :  { %v1623_v56 = vsel %vm1620_vm12, %v1622_v8, %v1618_v30  ;;  %v1637_v60 = vsel %vm1636_vm11, %v2877_v27, %v1633_v14  ;;  %v1651_v21 = vsub.f32 1.0, %v1650_v43  ;;  %2020 = vmatpush.msrb.mxu3 %v4293_v61  ;;  %v4301_v27 = vld [vmem:[#allocation17 + $0x190] sm:$0xff]  ;;  %v4343_v8 = vld [vmem:[#allocation17 + $0x118] sm:$0xff]  ;;  %v4349_v14 = vld [vmem:[#allocation17 + $0xe8] sm:$0xff] }
 0x4d2   :  { %v1642_v44 = vsel %vm1639_vm13, %v1641_v37, %v1637_v60  ;;  %v1665_v0 = vmul.f32 %v2881_v32, %v1623_v56  ;;  %2001 = vmatpush.msrb.mxu2 %v4301_v27  ;;  %v4341_v11 = vld [vmem:[#allocation17 + $0x110] sm:$0xff]  ;;  %v4353_v37 = vld [vmem:[#allocation17 + $0xf8] sm:$0xff]  ;;  %v4359_v56 = vld [vmem:[#allocation17 + $0xc8] sm:$0xff] }
 0x4d3   :  { %v1664_v6 = vmul.f32 %v1642_v44, %v4201_v22  ;;  %v1652_v38 = vmul.f32 %v2879_v48, %v1651_v21  ;;  %v4261_v22 = vld [vmem:[#allocation17 + $0x1e0] sm:$0xff]  ;;  %2021 = vmatpush.msrb.mxu3 %v4305_v52  ;;  %v4351_v43 = vld [vmem:[#allocation17 + $0xf0] sm:$0xff]  ;;  %v4363_v21 = vld [vmem:[#allocation17 + $0xd8] sm:$0xff] }
 0x4d4   :  { %1958 = vmatpush.msrb.mxu0 %v4261_v22  ;;  %2002 = vmatpush.msrb.mxu2 %v4311_v9  ;;  %v4361_v60 = vld [vmem:[#allocation17 + $0xd0] sm:$0xff]  ;;  %v4873_v44 = vld [vmem:[#allocation38_spill] sm:$0xff] }
 0x4d5   :  { %v4252_v40 = vadd.f32 %v1665_v0, %v1664_v6  ;;  %v1653_v49 = vadd.f32 %v2879_v48, %v1652_v38  ;;  %2022 = vmatpush.msrb.mxu3 %v4313_v29  ;;  %v4874_v6 = vld [vmem:[#allocation39_spill] sm:$0xff] }
 0x4d6   :  { %1959 = vmatpush.msrb.mxu0 %v4273_v15  ;;  %2003 = vmatpush.msrb.mxu2 %v4321_v36 }
 0x4d7   :  { %2882 = vtanh.f32 %v4252_v40  ;;  %v1657_v54 = vsel %vm1656_vm0, %v2879_v48, %v1653_v49  ;;  %2023 = vmatpush.msrb.mxu3 %v4323_v42  ;;  %v4339_v48 = vld [vmem:[#allocation17 + $0x108] sm:$0xff] }
 0x4d8   :  { %v1662_v2 = vsel %vm1659_vm1, %v1661_v62, %v1657_v54  ;;  %1960 = vmatpush.msrb.mxu0 %v4285_v25  ;;  %2004 = vmatpush.msrb.mxu2 %v4331_v3  ;;  %v4371_v49 = vld [vmem:[#allocation17 + $0xa8] sm:$0xff] }
 0x4d9   :  { %2024 = vmatpush.msrb.mxu3 %v4333_v23  ;;  %1985 = vmatpush.msra.mxu1 %v4339_v48 }
 0x4da   :  { %1961 = vmatpush.msrb.mxu0 %v4297_v28  ;;  %2005 = vmatpush.msrb.mxu2 %v4341_v11 }
 0x4db   :  { %2025 = vmatpush.msrb.mxu3 %v4343_v8  ;;  %1986 = vmatpush.msra.mxu1 %v4349_v14 }
 0x4dc   :  { %1962 = vmatpush.msrb.mxu0 %v4210_v59  ;;  %2006 = vmatpush.msrb.mxu2 %v4351_v43 }
 0x4dd   :  { %v2883_v4 = vpop.eup %2882  ;;  %2026 = vmatpush.msrb.mxu3 %v4353_v37  ;;  %1987 = vmatpush.msra.mxu1 %v4359_v56 }
 0x4de   :  { %v4255_v7 = vmul.f32 %v2883_v4, %v1662_v2  ;;  %1963 = vmatpush.msrb.mxu0 %v4213_v20  ;;  %2007 = vmatpush.msrb.mxu2 %v4361_v60  ;;  %v4381_v4 = vld [vmem:[#allocation17 + $0x88] sm:$0xff]  ;;  %v4383_v2 = vld [vmem:[#allocation17 + $0x90] sm:$0xff] }
 0x4df   :  { %2027 = vmatpush.msrb.mxu3 %v4363_v21  ;;  %1988 = vmatpush.msra.mxu1 %v4371_v49  ;;  %4875 = vst [vmem:[#allocation69_spill] sm:$0xff] %v4381_v4 }
 0x4e0   :  { %4872 = vst [vmem:[#allocation68_spill] sm:$0xff] %v4255_v7  ;;  %1756 = vmatmul.f32.vlgmr.msra.gmra.mxu0 %v4255_v7  ;;  %1776 = vmatmul.f32.vlgmr.msrb.gmra.mxu1 %v4255_v7 }
 0x4e1   :  { %1796 = vmatmul.f32.vlgmr.msra.gmra.mxu2 %v4255_v7  ;;  %1816 = vmatmul.f32.vlgmr.msra.gmra.mxu3 %v4255_v7  ;;  %v4399_v7 = vld [vmem:[#allocation17 + $0x48] sm:$0xff] }
 0x4e2   :  { %1964 = vmatpush.msrb.mxu0 %v4216_v63  ;;  %2008 = vmatpush.msrb.mxu2 %v4373_v31  ;;  %4880 = vst [vmem:[#allocation57_spill] sm:$0xff] %v4399_v7 }
 0x4e3   :  { %2028 = vmatpush.msrb.mxu3 %v4375_v53  ;;  %1989 = vmatpush.msra.mxu1 %v4381_v4 }
 0x4e4   :  { %1965 = vmatpush.msrb.mxu0 %v4219_v1  ;;  %2009 = vmatpush.msrb.mxu2 %v4383_v2 }
 0x4e6   :  { %1966 = vmatpush.msrb.mxu0 %v4222_v34 }
 0x4e8   :  { %1967 = vmatpush.msrb.mxu0 %v4225_v46 }
 0x4ea   :  { %1968 = vmatpush.msrb.mxu0 %v4230_v57 }
 0x4ec   :  { %1969 = vmatpush.msrb.mxu0 %v4233_v24 }
 0x4ee   :  { %1970 = vmatpush.msrb.mxu0 %v4235_v58 }
 0x4f0   :  { %1971 = vmatpush.msrb.mxu0 %v4240_v10  ;;  %v4425_v10 = vld [vmem:[#allocation17 + $0x18] sm:$0xff] }
 0x4f2   :  { %1972 = vmatpush.msrb.mxu0 %v4243_v47 }
 0x4f4   :  { %1973 = vmatpush.msrb.mxu0 %v4246_v41 }
 0x4f6   :  { %2176 = vmatpush.msra.mxu0 %v4261_v22 }
 0x4f8   :  { %2177 = vmatpush.msra.mxu0 %v4273_v15 }
 0x4fa   :  { %2178 = vmatpush.msra.mxu0 %v4285_v25 }
 0x4fc   :  { %2179 = vmatpush.msra.mxu0 %v4297_v28 }
 0x4fe   :  { %2180 = vmatpush.msra.mxu0 %v4210_v59 }
 0x500   :  { %2181 = vmatpush.msra.mxu0 %v4213_v20 }
 0x502   :  { %2182 = vmatpush.msra.mxu0 %v4216_v63 }
 0x504   :  { %2183 = vmatpush.msra.mxu0 %v4219_v1 }
 0x506   :  { %2184 = vmatpush.msra.mxu0 %v4222_v34 }
 0x508   :  { %2185 = vmatpush.msra.mxu0 %v4225_v46 }
 0x50a   :  { %2186 = vmatpush.msra.mxu0 %v4230_v57 }
 0x50c   :  { %2187 = vmatpush.msra.mxu0 %v4233_v24  ;;  %v4886_v24 = vld [vmem:[#allocation67_spill] sm:$0xff] }
 0x50e   :  { %2188 = vmatpush.msra.mxu0 %v4235_v58  ;;  %v2347_v58 = vld [vmem:[%s4759_s10 + $0x60] sm:$0xff] }
 0x510   :  { %2189 = vmatpush.msra.mxu0 %v4886_v24 }
 0x512   :  { %2190 = vmatpush.msra.mxu0 %v4243_v47 }
 0x514   :  { %2191 = vmatpush.msra.mxu0 %v4246_v41 }
 0x55d   :  { %v1757_v30 = vpop.f32.mrf.mxu0  ;;  %v1777_v32 = vpop.f32.mrf.mxu1 }
 0x55e   :  { %v1820_v0 = vadd.f32 %v1757_v30, %v4873_v44  ;;  %v1821_v38 = vadd.f32 %v1777_v32, %v4874_v6  ;;  %v4385_v30 = vld [vmem:[#allocation17 + $0x98] sm:$0xff]  ;;  %v4389_v32 = vld [vmem:[#allocation17 + $0x68] sm:$0xff]  ;;  %v4391_v44 = vld [vmem:[#allocation17 + $0x70] sm:$0xff] }
 0x55f   :  { %4876 = vst [vmem:[#allocation54_spill] sm:$0xff] %v4389_v32  ;;  %v4879_v6 = vld [vmem:[#allocation46_spill] sm:$0xff]  ;;  %2029 = vmatpush.msrb.mxu3 %v4385_v30  ;;  %1990 = vmatpush.msra.mxu1 %v4389_v32 }
 0x560   :  { %v2760_v54 = vmul.f32 -1.442695, %v1820_v0  ;;  %v2761_v62 = vmul.f32 -1.442695, %v1821_v38  ;;  %4877 = vst [vmem:[#allocation70_spill] sm:$0xff] %v4391_v44  ;;  %v4393_v0 = vld [vmem:[#allocation17 + $0x78] sm:$0xff]  ;;  %v541_v38 = vadd.f32 %v4879_v6, %v4863_v55  ;;  %2010 = vmatpush.msrb.mxu2 %v4391_v44 }
 0x561   :  { %4878 = vst [vmem:[#allocation56_spill] sm:$0xff] %v4393_v0  ;;  %2030 = vmatpush.msrb.mxu3 %v4393_v0  ;;  %1991 = vmatpush.msra.mxu1 %v4399_v7  ;;  %v4413_v6 = vld [vmem:[#allocation17 + $0x30] sm:$0xff]  ;;  %v4415_v55 = vld [vmem:[#allocation17 + $0x38] sm:$0xff] }
 0x562   :  { %2884 = vpow2.f32 %v2760_v54  ;;  %2011 = vmatpush.msrb.mxu2 %v4403_v33  ;;  %v4423_v0 = vld [vmem:[#allocation17 + $0x10] sm:$0xff] }
 0x563   :  { %2886 = vpow2.f32 %v2761_v62  ;;  %v4409_v62 = vld [vmem:[#allocation17 + $0x28] sm:$0xff]  ;;  %2031 = vmatpush.msrb.mxu3 %v4405_v13 }
 0x564   :  { %v1817_v54 = vpop.f32.mrf.mxu3  ;;  %1992 = vmatpush.msra.mxu1 %v4409_v62  ;;  %2012 = vmatpush.msrb.mxu2 %v4413_v6 }
 0x565   :  { %v1823_v4 = vadd.f32 %v1817_v54, %v541_v38  ;;  %v4419_v38 = vld [vmem:[#allocation17 + $0x8] sm:$0xff]  ;;  %2032 = vmatpush.msrb.mxu3 %v4415_v55 }
 0x566   :  { %1993 = vmatpush.msra.mxu1 %v4419_v38  ;;  %2013 = vmatpush.msrb.mxu2 %v4423_v0 }
 0x567   :  { %v2762_v32 = vmul.f32 -1.442695, %v1823_v4  ;;  %2033 = vmatpush.msrb.mxu3 %v4425_v10 }
 0x568   :  { %v2885_v54 = vpop.eup %2884  ;;  %2196 = vmatpush.msrb.mxu1 %v4263_v19  ;;  %2216 = vmatpush.msra.mxu2 %v4265_v39  ;;  %v4881_v19 = vld [vmem:[#allocation37_spill] sm:$0xff] }
 0x569   :  { %v2887_v7 = vpop.eup %2886  ;;  %v4427_v44 = vadd.f32 1.0, %v2885_v54  ;;  %2888 = vpow2.f32 %v2762_v32  ;;  %2236 = vmatpush.msra.mxu3 %v4269_v5 }
 0x56a   :  { %v4431_v4 = vadd.f32 1.0, %v2887_v7  ;;  %v1797_v7 = vpop.f32.mrf.mxu2  ;;  %2197 = vmatpush.msrb.mxu1 %v4275_v45  ;;  %2217 = vmatpush.msra.mxu2 %v4277_v51 }
 0x56b   :  { %2890 = vrcp.f32 %v4427_v44  ;;  %2237 = vmatpush.msra.mxu3 %v4281_v18  ;;  %v1822_v39 = vadd.f32 %v1797_v7, %v4881_v19  ;;  %v1839_v25 = vand.u32 2147483648, %v4427_v44  ;;  %vm1833_vm5 = vweird.f32 %v4427_v44  ;;  %v4890_v7 = vld [vmem:[#allocation49_spill] sm:$0xff] }
 0x56c   :  { %2892 = vrcp.f32 %v4431_v4  ;;  %2198 = vmatpush.msrb.mxu1 %v4287_v26  ;;  %2218 = vmatpush.msra.mxu2 %v4289_v50  ;;  %v1858_v26 = vand.u32 2147483648, %v4431_v4  ;;  %v1856_v28 = vand.u32 2147483647, %v4431_v4  ;;  %vm1852_vm6 = vweird.f32 %v4431_v4 }
 0x56d   :  { %2238 = vmatpush.msra.mxu3 %v4293_v61  ;;  %v1837_v61 = vand.u32 2147483647, %v4427_v44  ;;  %v1840_v20 = vor.u32 1.1754944e-38, %v1839_v25 }
 0x56e   :  { %2199 = vmatpush.msrb.mxu1 %v4299_v16  ;;  %2219 = vmatpush.msra.mxu2 %v4301_v27  ;;  %vm1857_vm10 = vcmp.eq.f32.partialorder %v1856_v28, 8.507059e+37 }
 0x56f   :  { %v2889_v32 = vpop.eup %2888  ;;  %2239 = vmatpush.msra.mxu3 %v4305_v52  ;;  %vm1838_vm9 = vcmp.eq.f32.partialorder %v1837_v61, 8.507059e+37  ;;  %v2337_v61 = vld [vmem:[%s4759_s10 + $0x10] sm:$0xff] }
 0x570   :  { %v4447_v54 = vadd.f32 1.0, %v2889_v32  ;;  %2200 = vmatpush.msrb.mxu1 %v4309_v17  ;;  %2220 = vmatpush.msra.mxu2 %v4311_v9  ;;  %v1859_v9 = vor.u32 1.1754944e-38, %v1858_v26  ;;  %v4891_v32 = vld [vmem:[#allocation47_spill] sm:$0xff] }
 0x571   :  { %v2891_v22 = vpop.eup %2890  ;;  %2240 = vmatpush.msra.mxu3 %v4313_v29 }
 0x572   :  { %v2893_v5 = vpop.eup %2892  ;;  %v1829_v15 = vmul.f32 %v2891_v22, %v4427_v44  ;;  %2894 = vrcp.f32 %v4447_v54  ;;  %vm1834_vm3 = vweird.f32 %v2891_v22  ;;  %2201 = vmatpush.msrb.mxu1 %v4319_v35  ;;  %2221 = vmatpush.msra.mxu2 %v4321_v36  ;;  %v1878_v46 = vand.u32 2147483648, %v4447_v54 }
 0x573   :  { %v1848_v45 = vmul.f32 %v2893_v5, %v4431_v4  ;;  %2896 = vtanh.f32 %v1822_v39  ;;  %vm1853_vm4 = vweird.f32 %v2893_v5  ;;  %2241 = vmatpush.msra.mxu3 %v4323_v42  ;;  %vm1835_vm7 = vmor %vm1833_vm5, %vm1834_vm3  ;;  %vm1872_vm12 = vweird.f32 %v4447_v54  ;;  %v2342_v4 = vld [vmem:[%s4759_s10 + $0x38] sm:$0xff] }
 0x574   :  { %v1830_v51 = vsub.f32 1.0, %v1829_v15  ;;  %2202 = vmatpush.msrb.mxu1 %v4329_v12  ;;  %2222 = vmatpush.msra.mxu2 %v4331_v3  ;;  %vm1854_vm8 = vmor %vm1852_vm6, %vm1853_vm4 }
 0x575   :  { %v1849_v18 = vsub.f32 1.0, %v1848_v45  ;;  %2242 = vmatpush.msra.mxu3 %v4333_v23  ;;  %v2339_v45 = vld [vmem:[%s4759_s10 + $0x20] sm:$0xff] }
 0x576   :  { %v1831_v50 = vmul.f32 %v2891_v22, %v1830_v51  ;;  %2203 = vmatpush.msrb.mxu1 %v4339_v48  ;;  %2223 = vmatpush.msra.mxu2 %v4341_v11  ;;  %v4882_v11 = vld [vmem:[#allocation69_spill] sm:$0xff] }
 0x577   :  { %v1850_v59 = vmul.f32 %v2893_v5, %v1849_v18  ;;  %2243 = vmatpush.msra.mxu3 %v4343_v8  ;;  %v4883_v8 = vld [vmem:[#allocation54_spill] sm:$0xff] }
 0x578   :  { %v4473_v16 = vpop.eup %2894  ;;  %v1832_v27 = vadd.f32 %v2891_v22, %v1831_v50  ;;  %2204 = vmatpush.msrb.mxu1 %v4349_v14  ;;  %2224 = vmatpush.msra.mxu2 %v4351_v43  ;;  %v1879_v14 = vor.u32 1.1754944e-38, %v1878_v46  ;;  %v4884_v43 = vld [vmem:[#allocation70_spill] sm:$0xff] }
 0x579   :  { %v1851_v52 = vadd.f32 %v2893_v5, %v1850_v59  ;;  %v1868_v17 = vmul.f32 %v4473_v16, %v4447_v54  ;;  %v2897_v63 = vpop.eup %2896  ;;  %2244 = vmatpush.msra.mxu3 %v4353_v37  ;;  %vm1873_vm11 = vweird.f32 %v4473_v16  ;;  %v4885_v37 = vld [vmem:[#allocation56_spill] sm:$0xff]  ;;  %v2338_v50 = vld [vmem:[%s4759_s10 + $0x18] sm:$0xff] }
 0x57a   :  { %v1836_v29 = vsel %vm1835_vm7, %v2891_v22, %v1832_v27  ;;  %2205 = vmatpush.msrb.mxu1 %v4359_v56  ;;  %2225 = vmatpush.msra.mxu2 %v4361_v60  ;;  %vm1874_vm13 = vmor %vm1872_vm12, %vm1873_vm11  ;;  %v4887_v56 = vld [vmem:[#allocation57_spill] sm:$0xff]  ;;  %v2335_v27 = vld [vmem:[%s4759_s10] sm:$0xff]  ;;  %vm2402_vm12 = vcmask 130048  }
 0x57b   :  { %v1841_v35 = vsel %vm1838_vm9, %v1840_v20, %v1836_v29  ;;  %v1855_v36 = vsel %vm1854_vm8, %v2893_v5, %v1851_v52  ;;  %v1869_v42 = vsub.f32 1.0, %v1868_v17  ;;  %2245 = vmatpush.msra.mxu3 %v4363_v21  ;;  %v2341_v22 = vld [vmem:[%s4759_s10 + $0x30] sm:$0xff]  ;;  %v2340_v5 = vld [vmem:[%s4759_s10 + $0x28] sm:$0xff] }
 0x57c   :  { %v1860_v12 = vsel %vm1857_vm10, %v1859_v9, %v1855_v36  ;;  %v1883_v3 = vmul.f32 %v2897_v63, %v1841_v35  ;;  %2206 = vmatpush.msrb.mxu1 %v4371_v49  ;;  %2226 = vmatpush.msra.mxu2 %v4373_v31  ;;  %v2345_v31 = vld [vmem:[%s4759_s10 + $0x50] sm:$0xff]  ;;  %v2336_v59 = vld [vmem:[%s4759_s10 + $0x8] sm:$0xff] }
 0x57d   :  { %v1882_v23 = vmul.f32 %v1860_v12, %v4252_v40  ;;  %v1870_v1 = vmul.f32 %v4473_v16, %v1869_v42  ;;  %2246 = vmatpush.msra.mxu3 %v4375_v53  ;;  %v1876_v40 = vand.u32 2147483647, %v4447_v54  ;;  %v4888_v53 = vld [vmem:[#allocation41_spill] sm:$0xff]  ;;  %v544_v54 = vadd.f32 %v4891_v32, %v4890_v7  ;;  %v4892_v17 = vld [vmem:[#allocation40_spill] sm:$0xff] }
 0x57e   :  { %2207 = vmatpush.msrb.mxu1 %v4882_v11  ;;  %2227 = vmatpush.msra.mxu2 %v4383_v2  ;;  %v2397_v32 = vld [vmem:[%s4761_s12 + $0x8] sm:$0xff] }
 0x57f   :  { %v4497_v48 = vadd.f32 %v1883_v3, %v1882_v23  ;;  %v1871_v34 = vadd.f32 %v4473_v16, %v1870_v1  ;;  %2247 = vmatpush.msra.mxu3 %v4385_v30  ;;  %vm1877_vm14 = vcmp.eq.f32.partialorder %v1876_v40, 8.507059e+37  ;;  %v4889_v30 = vld [vmem:[#allocation42_spill] sm:$0xff] }
 0x580   :  { %2208 = vmatpush.msrb.mxu1 %v4883_v8  ;;  %2228 = vmatpush.msra.mxu2 %v4884_v43 }
 0x581   :  { %2898 = vtanh.f32 %v4497_v48  ;;  %v1875_v57 = vsel %vm1874_vm13, %v4473_v16, %v1871_v34  ;;  %2248 = vmatpush.msra.mxu3 %v4885_v37 }
 0x582   :  { %2209 = vmatpush.msrb.mxu1 %v4887_v56  ;;  %v1880_v21 = vsel %vm1877_vm14, %v1879_v14, %v1875_v57  ;;  %2229 = vmatpush.msra.mxu2 %v4403_v33  ;;  %v2348_v33 = vld [vmem:[%s4759_s10 + $0x68] sm:$0xff] }
 0x583   :  { %2249 = vmatpush.msra.mxu3 %v4405_v13  ;;  %v2350_v13 = vld [vmem:[%s4759_s10 + $0x78] sm:$0xff] }
 0x584   :  { %2210 = vmatpush.msrb.mxu1 %v4409_v62  ;;  %2230 = vmatpush.msra.mxu2 %v4413_v6 }
 0x585   :  { %2250 = vmatpush.msra.mxu3 %v4415_v55  ;;  %v2349_v55 = vld [vmem:[%s4759_s10 + $0x70] sm:$0xff] }
 0x586   :  { %2211 = vmatpush.msrb.mxu1 %v4419_v38  ;;  %2231 = vmatpush.msra.mxu2 %v4423_v0  ;;  %v2344_v0 = vld [vmem:[%s4759_s10 + $0x48] sm:$0xff]  ;;  %v2343_v38 = vld [vmem:[%s4759_s10 + $0x40] sm:$0xff] }
 0x587   :  { %v2899_v60 = vpop.eup %2898  ;;  %2251 = vmatpush.msra.mxu3 %v4425_v10  ;;  %v2346_v10 = vld [vmem:[%s4759_s10 + $0x58] sm:$0xff]  ;;  %s3216_s10 = smov [#allocation21]  }
 0x588   :  { %v4524_v49 = vmul.f32 %v2899_v60, %v1880_v21  ;;  %s2676_s5 = sshll.u32 %s3216_s10, 4  ;;  %s2677_s5 = int_to_ptr.vmem [resolvable:$true] %s2676_s5 }
 0x58a   :  { %1974 = vmatmul.f32.vlgmr.msrb.gmra.mxu0 %v4524_v49  ;;  %1994 = vmatmul.f32.vlgmr.msra.gmra.mxu1 %v4524_v49 }
 0x58b   :  { %2014 = vmatmul.f32.vlgmr.msrb.gmra.mxu2 %v4524_v49  ;;  %2034 = vmatmul.f32.vlgmr.msrb.gmra.mxu3 %v4524_v49 }
 0x58c   :  { %2355 = vmatpush.msrb.mxu0 %v2350_v13  ;;  %2441 = vmatpush.msra.mxu1 %v2397_v32 }
 0x58e   :  { %2356 = vmatpush.msrb.mxu0 %v2349_v55 }
 0x590   :  { %2357 = vmatpush.msrb.mxu0 %v2348_v33 }
 0x592   :  { %2358 = vmatpush.msrb.mxu0 %v2347_v58 }
 0x594   :  { %2359 = vmatpush.msrb.mxu0 %v2346_v10 }
 0x596   :  { %2360 = vmatpush.msrb.mxu0 %v2345_v31 }
 0x598   :  { %2361 = vmatpush.msrb.mxu0 %v2344_v0 }
 0x59a   :  { %2362 = vmatpush.msrb.mxu0 %v2343_v38  ;;  %v4896_v38 = vld [vmem:[#allocation66_spill] sm:$0xff] }
 0x59c   :  { %2363 = vmatpush.msrb.mxu0 %v2342_v4  ;;  %v4897_v4 = vld [vmem:[#allocation68_spill] sm:$0xff] }
 0x59e   :  { %2364 = vmatpush.msrb.mxu0 %v2341_v22 }
 0x5a0   :  { %2365 = vmatpush.msrb.mxu0 %v2340_v5 }
 0x5a2   :  { %2366 = vmatpush.msrb.mxu0 %v2339_v45 }
 0x5a4   :  { %2367 = vmatpush.msrb.mxu0 %v2338_v50 }
 0x5a6   :  { %2368 = vmatpush.msrb.mxu0 %v2337_v61 }
 0x5a8   :  { %2369 = vmatpush.msrb.mxu0 %v2336_v59 }
 0x5aa   :  { %2370 = vmatpush.msrb.mxu0 %v2335_v27 }
 0x607   :  { %v1975_v47 = vpop.f32.mrf.mxu0  ;;  %v1995_v41 = vpop.f32.mrf.mxu1 }
 0x608   :  { %v2038_v2 = vadd.f32 %v1975_v47, %v4888_v53  ;;  %v2039_v44 = vadd.f32 %v1995_v41, %v4889_v30 }
 0x60a   :  { %v2763_v62 = vmul.f32 -1.442695, %v2038_v2  ;;  %v2764_v6 = vmul.f32 -1.442695, %v2039_v44 }
 0x60c   :  { %2900 = vpow2.f32 %v2763_v62  ;;  %v4894_v62 = vld [vmem:[#allocation55_spill] sm:$0xff] }
 0x60d   :  { %2902 = vpow2.f32 %v2764_v6  ;;  %v4895_v6 = vld [vmem:[#allocation53_spill] sm:$0xff] }
 0x60e   :  { %v2035_v19 = vpop.f32.mrf.mxu3  ;;  %v2015_v28 = vpop.f32.mrf.mxu2 }
 0x60f   :  { %v2041_v39 = vadd.f32 %v2035_v19, %v544_v54  ;;  %v2040_v9 = vadd.f32 %v2015_v28, %v4892_v17  ;;  %v2396_v54 = vld [vmem:[%s4761_s12] sm:$0xff] }
 0x610   :  { %2442 = vmatpush.msra.mxu1 %v2396_v54 }
 0x611   :  { %v2765_v15 = vmul.f32 -1.442695, %v2041_v39  ;;  %v4898_v39 = vld [vmem:[#allocation43_spill] sm:$0xff] }
 0x612   :  { %v2901_v51 = vpop.eup %2900 }
 0x613   :  { %v2903_v18 = vpop.eup %2902  ;;  %v2045_v25 = vadd.f32 1.0, %v2901_v51  ;;  %2904 = vpow2.f32 %v2765_v15  ;;  %v4899_v15 = vld [vmem:[#allocation44_spill] sm:$0xff] }
 0x614   :  { %v2064_v26 = vadd.f32 1.0, %v2903_v18 }
 0x615   :  { %2906 = vrcp.f32 %v2045_v25  ;;  %v2057_v12 = vand.u32 2147483648, %v2045_v25  ;;  %v2055_v1 = vand.u32 2147483647, %v2045_v25  ;;  %vm2051_vm1 = vweird.f32 %v2045_v25 }
 0x616   :  { %2908 = vrcp.f32 %v2064_v26  ;;  %v2076_v3 = vand.u32 2147483648, %v2064_v26  ;;  %v2074_v46 = vand.u32 2147483647, %v2064_v26  ;;  %vm2070_vm3 = vweird.f32 %v2064_v26 }
 0x617   :  { %v2058_v57 = vor.u32 1.1754944e-38, %v2057_v12  ;;  %vm2056_vm6 = vcmp.eq.f32.partialorder %v2055_v1, 8.507059e+37 }
 0x618   :  { %v2077_v43 = vor.u32 1.1754944e-38, %v2076_v3  ;;  %vm2075_vm7 = vcmp.eq.f32.partialorder %v2074_v46, 8.507059e+37 }
 0x619   :  { %v2905_v16 = vpop.eup %2904 }
 0x61a   :  { %v2084_v20 = vadd.f32 1.0, %v2905_v16 }
 0x61b   :  { %v2907_v52 = vpop.eup %2906 }
 0x61c   :  { %v2909_v29 = vpop.eup %2908  ;;  %v2047_v63 = vmul.f32 %v2907_v52, %v2045_v25  ;;  %2910 = vrcp.f32 %v2084_v20  ;;  %vm2052_vm15 = vweird.f32 %v2907_v52  ;;  %v2096_v41 = vand.u32 2147483648, %v2084_v20  ;;  %v4900_v25 = vld [vmem:[#allocation48_spill] sm:$0xff] }
 0x61d   :  { %v2066_v35 = vmul.f32 %v2909_v29, %v2064_v26  ;;  %2912 = vtanh.f32 %v2040_v9  ;;  %vm2071_vm0 = vweird.f32 %v2909_v29  ;;  %vm2053_vm4 = vmor %vm2051_vm1, %vm2052_vm15  ;;  %vm2090_vm9 = vweird.f32 %v2084_v20 }
 0x61e   :  { %v2048_v36 = vsub.f32 1.0, %v2047_v63  ;;  %vm2072_vm5 = vmor %vm2070_vm3, %vm2071_vm0  ;;  %v2094_v31 = vand.u32 2147483647, %v2084_v20  ;;  %v2097_v2 = vor.u32 1.1754944e-38, %v2096_v41  ;;  %v547_v26 = vadd.f32 %v4900_v25, %v4890_v7 }
 0x61f   :  { %v2067_v42 = vsub.f32 1.0, %v2066_v35  ;;  %v4901_v35 = vld [vmem:[#allocation30_spill] sm:$0xff] }
 0x620   :  { %v2049_v23 = vmul.f32 %v2907_v52, %v2048_v36  ;;  %vm2095_vm11 = vcmp.eq.f32.partialorder %v2094_v31, 8.507059e+37  ;;  %v4902_v36 = vld [vmem:[#allocation52_spill] sm:$0xff] }
 0x621   :  { %v2068_v34 = vmul.f32 %v2909_v29, %v2067_v42  ;;  %v506_v42 = vadd.f32 %v4902_v36, %v4901_v35  ;;  %v2478_v35 = vld [vmem:[#allocation6 + $0x10] sm:$0xff] }
 0x622   :  { %v2911_v40 = vpop.eup %2910  ;;  %v2050_v11 = vadd.f32 %v2907_v52, %v2049_v23 }
 0x623   :  { %v2069_v8 = vadd.f32 %v2909_v29, %v2068_v34  ;;  %v2086_v14 = vmul.f32 %v2911_v40, %v2084_v20  ;;  %v2913_v24 = vpop.eup %2912  ;;  %vm2091_vm8 = vweird.f32 %v2911_v40 }
 0x624   :  { %v2054_v37 = vsel %vm2053_vm4, %v2907_v52, %v2050_v11  ;;  %vm2092_vm10 = vmor %vm2090_vm9, %vm2091_vm8 }
 0x625   :  { %v2059_v56 = vsel %vm2056_vm6, %v2058_v57, %v2054_v37  ;;  %v2073_v60 = vsel %vm2072_vm5, %v2909_v29, %v2069_v8  ;;  %v2087_v21 = vsub.f32 1.0, %v2086_v14 }
 0x626   :  { %v2078_v13 = vsel %vm2075_vm7, %v2077_v43, %v2073_v60  ;;  %v2101_v55 = vmul.f32 %v2913_v24, %v2059_v56 }
 0x627   :  { %v2100_v33 = vmul.f32 %v2078_v13, %v4497_v48  ;;  %v2088_v58 = vmul.f32 %v2911_v40, %v2087_v21  ;;  %v4893_v48 = vld [vmem:[#allocation50_spill] sm:$0xff] }
 0x629   :  { %v4592_v10 = vadd.f32 %v2101_v55, %v2100_v33  ;;  %v2089_v47 = vadd.f32 %v2911_v40, %v2088_v58 }
 0x62b   :  { %2914 = vtanh.f32 %v4592_v10  ;;  %v2093_v53 = vsel %vm2092_vm10, %v2911_v40, %v2089_v47 }
 0x62c   :  { %v2098_v44 = vsel %vm2095_vm11, %v2097_v2, %v2093_v53 }
 0x631   :  { %v2915_v30 = vpop.eup %2914 }
 0x632   :  { %v2104_v0 = vmul.f32 %v2915_v30, %v2098_v44 }
 0x634   :  { %2192 = vmatmul.f32.vlgmr.msra.gmra.mxu0 %v2104_v0  ;;  %2212 = vmatmul.f32.vlgmr.msrb.gmra.mxu1 %v2104_v0 }
 0x635   :  { %2232 = vmatmul.f32.vlgmr.msra.gmra.mxu2 %v2104_v0  ;;  %2252 = vmatmul.f32.vlgmr.msra.gmra.mxu3 %v2104_v0 }
 0x63c   :  { %2371 = vmatmul.f32.vlgmr.msrb.gmra.mxu0 %v4893_v48 }
 0x644   :  { %2374 = vmatmul.f32.gmra.mxu0 %v4894_v62 }
 0x64c   :  { %2377 = vmatmul.f32.gmra.mxu0 %v4895_v6 }
 0x654   :  { %2380 = vmatmul.f32.gmra.mxu0 %v4896_v38 }
 0x65c   :  { %2383 = vmatmul.f32.gmra.mxu0 %v4897_v4 }
 0x664   :  { %2386 = vmatmul.f32.gmra.mxu0 %v4524_v49  ;;  %v4609_v49 = vld [vmem:[#allocation18] ss:$0 sm:$0xff] }
 0x66c   :  { %2389 = vmatmul.f32.gmra.mxu0 %v2104_v0 }
 0x6b1   :  { %v2193_v22 = vpop.f32.mrf.mxu0  ;;  %v2213_v19 = vpop.f32.mrf.mxu1 }
 0x6b2   :  { %v2256_v5 = vadd.f32 %v2193_v22, %v4898_v39  ;;  %v2257_v45 = vadd.f32 %v2213_v19, %v4899_v15 }
 0x6b4   :  { %v2766_v51 = vmul.f32 -1.442695, %v2256_v5  ;;  %v2767_v18 = vmul.f32 -1.442695, %v2257_v45 }
 0x6b6   :  { %2916 = vpow2.f32 %v2766_v51 }
 0x6b7   :  { %2918 = vpow2.f32 %v2767_v18 }
 0x6b8   :  { %v2253_v50 = vpop.f32.mrf.mxu3  ;;  %v2233_v29 = vpop.f32.mrf.mxu2 }
 0x6b9   :  { %v2259_v61 = vadd.f32 %v2253_v50, %v547_v26  ;;  %v2372_v59 = vpop.f32.mrf.mxu0  ;;  %v2258_v23 = vadd.f32 %v2233_v29, %v506_v42 }
 0x6ba   :  { %v2373_v28 = vadd.f32 %v4609_v49, %v2372_v59 }
 0x6bb   :  { %v2768_v16 = vmul.f32 -1.442695, %v2259_v61  ;;  %v2803_v61 = vld [vmem:[%s4762_s13] ss:$0 sm:$0xff] }
 0x6bc   :  { %v2917_v27 = vpop.eup %2916  ;;  %2769 = vmatmul.msk.f32.vlgmr.msra.gmra.mxu1 %vm2402_vm12, %v2373_v28  ;;  %v2476_v28 = vld [vmem:[#allocation6] sm:$0xff] }
 0x6bd   :  { %v2919_v20 = vpop.eup %2918  ;;  %v2263_v52 = vadd.f32 1.0, %v2917_v27  ;;  %2920 = vpow2.f32 %v2768_v16 }
 0x6be   :  { %v2282_v17 = vadd.f32 1.0, %v2919_v20 }
 0x6bf   :  { %2922 = vrcp.f32 %v2263_v52  ;;  %v2273_v57 = vand.u32 2147483647, %v2263_v52  ;;  %v2275_v8 = vand.u32 2147483648, %v2263_v52  ;;  %vm2269_vm15 = vweird.f32 %v2263_v52 }
 0x6c0   :  { %2924 = vrcp.f32 %v2282_v17  ;;  %v2294_v43 = vand.u32 2147483648, %v2282_v17  ;;  %v2292_v60 = vand.u32 2147483647, %v2282_v17  ;;  %vm2288_vm0 = vweird.f32 %v2282_v17 }
 0x6c1   :  { %v2375_v9 = vpop.f32.mrf.mxu0  ;;  %v2276_v55 = vor.u32 1.1754944e-38, %v2275_v8  ;;  %vm2274_vm4 = vcmp.eq.f32.partialorder %v2273_v57, 8.507059e+37 }
 0x6c2   :  { %v2376_v7 = vadd.f32 %v4609_v49, %v2375_v9  ;;  %v2295_v47 = vor.u32 1.1754944e-38, %v2294_v43  ;;  %vm2293_vm5 = vcmp.eq.f32.partialorder %v2292_v60, 8.507059e+37 }
 0x6c3   :  { %v2921_v63 = vpop.eup %2920 }
 0x6c4   :  { %v2302_v12 = vadd.f32 1.0, %v2921_v63  ;;  %2770 = vmatmul.msk.f32.gmra.mxu1 %vm2402_vm12, %v2376_v7 }
 0x6c5   :  { %v2923_v3 = vpop.eup %2922 }
 0x6c6   :  { %v2925_v1 = vpop.eup %2924  ;;  %v2265_v34 = vmul.f32 %v2923_v3, %v2263_v52  ;;  %2926 = vrcp.f32 %v2302_v12  ;;  %vm2270_vm13 = vweird.f32 %v2923_v3  ;;  %v2314_v54 = vand.u32 2147483648, %v2302_v12 }
 0x6c7   :  { %v2284_v46 = vmul.f32 %v2925_v1, %v2282_v17  ;;  %2928 = vtanh.f32 %v2258_v23  ;;  %vm2289_vm14 = vweird.f32 %v2925_v1  ;;  %vm2271_vm1 = vmor %vm2269_vm15, %vm2270_vm13  ;;  %vm2308_vm7 = vweird.f32 %v2302_v12  ;;  %v2477_v17 = vld [vmem:[#allocation6 + $0x8] sm:$0xff]  ;;  %v2479_v23 = vld [vmem:[#allocation6 + $0x18] sm:$0xff] }
 0x6c8   :  { %v2266_v40 = vsub.f32 1.0, %v2265_v34  ;;  %vm2290_vm3 = vmor %vm2288_vm0, %vm2289_vm14  ;;  %v2312_v22 = vand.u32 2147483647, %v2302_v12  ;;  %v2315_v5 = vor.u32 1.1754944e-38, %v2314_v54 }
 0x6c9   :  { %v2285_v11 = vsub.f32 1.0, %v2284_v46  ;;  %v2378_v14 = vpop.f32.mrf.mxu0 }
 0x6ca   :  { %v2267_v37 = vmul.f32 %v2923_v3, %v2266_v40  ;;  %v2379_v24 = vadd.f32 %v4609_v49, %v2378_v14  ;;  %vm2313_vm9 = vcmp.eq.f32.partialorder %v2312_v22, 8.507059e+37 }
 0x6cb   :  { %v2286_v56 = vmul.f32 %v2925_v1, %v2285_v11  ;;  %v2480_v11 = vld [vmem:[#allocation6 + $0x20] sm:$0xff] }
 0x6cc   :  { %v2927_v21 = vpop.eup %2926  ;;  %v2268_v13 = vadd.f32 %v2923_v3, %v2267_v37  ;;  %2771 = vmatmul.msk.f32.gmra.mxu1 %vm2402_vm12, %v2379_v24 }
 0x6cd   :  { %v2287_v33 = vadd.f32 %v2925_v1, %v2286_v56  ;;  %v2304_v58 = vmul.f32 %v2927_v21, %v2302_v12  ;;  %v2929_v31 = vpop.eup %2928  ;;  %vm2309_vm6 = vweird.f32 %v2927_v21  ;;  %v2481_v56 = vld [vmem:[#allocation6 + $0x28] sm:$0xff] }
 0x6ce   :  { %v2272_v41 = vsel %vm2271_vm1, %v2923_v3, %v2268_v13  ;;  %vm2310_vm8 = vmor %vm2308_vm7, %vm2309_vm6 }
 0x6cf   :  { %v2277_v53 = vsel %vm2274_vm4, %v2276_v55, %v2272_v41  ;;  %v2291_v2 = vsel %vm2290_vm3, %v2925_v1, %v2287_v33  ;;  %v2305_v30 = vsub.f32 1.0, %v2304_v58  ;;  %v2482_v33 = vld [vmem:[#allocation6 + $0x30] sm:$0xff]  ;;  %vm2629_vm4 = vcmask 7168  }
 0x6d0   :  { %v2296_v44 = vsel %vm2293_vm5, %v2295_v47, %v2291_v2  ;;  %v2319_v0 = vmul.f32 %v2929_v31, %v2277_v53  ;;  %v2483_v31 = vld [vmem:[#allocation6 + $0x38] sm:$0xff] }
 0x6d1   :  { %v2318_v48 = vmul.f32 %v2296_v44, %v4592_v10  ;;  %v2381_v62 = vpop.f32.mrf.mxu0  ;;  %v2306_v6 = vmul.f32 %v2927_v21, %v2305_v30 }
 0x6d2   :  { %v2382_v38 = vadd.f32 %v4609_v49, %v2381_v62 }
 0x6d3   :  { %v2320_v4 = vadd.f32 %v2319_v0, %v2318_v48  ;;  %v2307_v32 = vadd.f32 %v2927_v21, %v2306_v6 }
 0x6d4   :  { %2772 = vmatmul.msk.f32.gmra.mxu1 %vm2402_vm12, %v2382_v38 }
 0x6d5   :  { %2930 = vtanh.f32 %v2320_v4  ;;  %v2311_v19 = vsel %vm2310_vm8, %v2927_v21, %v2307_v32 }
 0x6d6   :  { %v2316_v45 = vsel %vm2313_vm9, %v2315_v5, %v2311_v19 }
 0x6d9   :  { %v2384_v39 = vpop.f32.mrf.mxu0 }
 0x6da   :  { %v2385_v15 = vadd.f32 %v4609_v49, %v2384_v39 }
 0x6db   :  { %v2931_v10 = vpop.eup %2930 }
 0x6dc   :  { %2773 = vmatmul.msk.f32.gmra.mxu1 %vm2402_vm12, %v2385_v15  ;;  %v2322_v51 = vmul.f32 %v2931_v10, %v2316_v45 }
 0x6de   :  { %2392 = vmatmul.f32.gmra.mxu0 %v2322_v51 }
 0x6e1   :  { %v2387_v18 = vpop.f32.mrf.mxu0 }
 0x6e2   :  { %v2388_v25 = vadd.f32 %v4609_v49, %v2387_v18 }
 0x6e4   :  { %2774 = vmatmul.msk.f32.gmra.mxu1 %vm2402_vm12, %v2388_v25 }
 0x6e9   :  { %v2390_v26 = vpop.f32.mrf.mxu0 }
 0x6ea   :  { %v2391_v50 = vadd.f32 %v4609_v49, %v2390_v26 }
 0x6ec   :  { %2775 = vmatmul.msk.f32.gmra.mxu1 %vm2402_vm12, %v2391_v50 }
 0x739   :  { %v2444_v59 = vpop.f32.mrf.mxu1 }
 0x73a   :  { %v2445_v16 = vadd.f32 %v2803_v61, %v2444_v59 }
 0x73c   :  { %2468 = vst [vmem:[#allocation20] sm:$0xff] %v2445_v16  ;;  %v2484_v27 = vsub.f32 %v2445_v16, %v2476_v28 }
 0x73e   :  { %v2492_v20 = vmul.f32 %v2484_v27, %v2484_v27 }
 0x740   :  { %2500 = vadd.xlane.f32.xlu0 %v2492_v20 }
 0x741   :  { %v2447_v52 = vpop.f32.mrf.mxu1 }
 0x742   :  { %v2448_v9 = vadd.f32 %v2803_v61, %v2447_v52 }
 0x744   :  { %2469 = vst [vmem:[#allocation20 + $0x8] sm:$0xff] %v2448_v9  ;;  %v2485_v29 = vsub.f32 %v2448_v9, %v2477_v17 }
 0x746   :  { %v2493_v7 = vmul.f32 %v2485_v29, %v2485_v29 }
 0x748   :  { %2502 = vadd.xlane.f32.xlu0 %v2493_v7 }
 0x749   :  { %v2450_v63 = vpop.f32.mrf.mxu1 }
 0x74a   :  { %v2451_v36 = vadd.f32 %v2803_v61, %v2450_v63 }
 0x74c   :  { %2470 = vst [vmem:[#allocation20 + $0x10] sm:$0xff] %v2451_v36  ;;  %v2486_v42 = vsub.f32 %v2451_v36, %v2478_v35 }
 0x74e   :  { %v2494_v12 = vmul.f32 %v2486_v42, %v2486_v42 }
 0x750   :  { %2504 = vadd.xlane.f32.xlu1 %v2494_v12 }
 0x751   :  { %v2453_v3 = vpop.f32.mrf.mxu1 }
 0x752   :  { %v2454_v1 = vadd.f32 %v2803_v61, %v2453_v3 }
 0x754   :  { %2471 = vst [vmem:[#allocation20 + $0x18] sm:$0xff] %v2454_v1  ;;  %v2487_v34 = vsub.f32 %v2454_v1, %v2479_v23 }
 0x756   :  { %v2495_v46 = vmul.f32 %v2487_v34, %v2487_v34 }
 0x758   :  { %2506 = vadd.xlane.f32.xlu1 %v2495_v46 }
 0x759   :  { %v2456_v40 = vpop.f32.mrf.mxu1 }
 0x75a   :  { %v2457_v57 = vadd.f32 %v2803_v61, %v2456_v40 }
 0x75b   :  { %v2393_v8 = vpop.f32.mrf.mxu0 }
 0x75c   :  { %2472 = vst [vmem:[#allocation20 + $0x20] sm:$0xff] %v2457_v57  ;;  %v2394_v14 = vadd.f32 %v4609_v49, %v2393_v8  ;;  %v2488_v43 = vsub.f32 %v2457_v57, %v2480_v11 }
 0x75e   :  { %2776 = vmatmul.msk.f32.gmra.mxu1 %vm2402_vm12, %v2394_v14  ;;  %v2496_v37 = vmul.f32 %v2488_v43, %v2488_v43 }
 0x760   :  { %2508 = vadd.xlane.f32.xlu2 %v2496_v37 }
 0x761   :  { %v2459_v24 = vpop.f32.mrf.mxu1 }
 0x762   :  { %v2460_v60 = vadd.f32 %v2803_v61, %v2459_v24 }
 0x764   :  { %2473 = vst [vmem:[#allocation20 + $0x28] sm:$0xff] %v2460_v60  ;;  %v2489_v21 = vsub.f32 %v2460_v60, %v2481_v56 }
 0x766   :  { %v2497_v13 = vmul.f32 %v2489_v21, %v2489_v21 }
 0x768   :  { %2510 = vadd.xlane.f32.xlu2 %v2497_v13 }
 0x769   :  { %v2462_v55 = vpop.f32.mrf.mxu1 }
 0x76a   :  { %v2463_v58 = vadd.f32 %v2803_v61, %v2462_v55 }
 0x76c   :  { %2474 = vst [vmem:[#allocation20 + $0x30] sm:$0xff] %v2463_v58  ;;  %v2490_v47 = vsub.f32 %v2463_v58, %v2482_v33 }
 0x76e   :  { %v2498_v41 = vmul.f32 %v2490_v47, %v2490_v47 }
 0x770   :  { %2512 = vadd.xlane.f32.xlu0 %v2498_v41 }
 0x7b3   :  { %v4635_v44 = vpop.xlane.xlu0 %2500 }
 0x7b4   :  { %vm2523_vm11 = vcmp.eq.f32.partialorder %v4635_v44, inf  ;;  %v2526_v60 = vand.u32 2147483648, %v4635_v44  ;;  %vm2525_vm14 = vcmp.eq.f32.partialorder %v4635_v44, 0.0 }
 0x7bb   :  { %v4641_v62 = vpop.xlane.xlu0 %2502 }
 0x7bc   :  { %2932 = vrsqrt.f32 %v4641_v62  ;;  %vm2535_vm10 = vcmp.eq.f32.partialorder %v4641_v62, inf  ;;  %v2538_v21 = vand.u32 2147483648, %v4641_v62  ;;  %vm2537_vm12 = vcmp.eq.f32.partialorder %v4641_v62, 0.0 }
 0x7bd   :  { %2934 = vrsqrt.f32 %v4635_v44 }
 0x7c2   :  { %v2933_v38 = vpop.eup %2932 }
 0x7c3   :  { %v4637_v0 = vpop.xlane.xlu1 %2504  ;;  %v2935_v32 = vpop.eup %2934  ;;  %v2529_v19 = vmul.f32 %v2933_v38, %v4641_v62 }
 0x7c4   :  { %2936 = vrsqrt.f32 %v4637_v0  ;;  %v2517_v5 = vmul.f32 %v2935_v32, %v4635_v44  ;;  %vm2547_vm13 = vcmp.eq.f32.partialorder %v4637_v0, inf  ;;  %vm2549_vm0 = vcmp.eq.f32.partialorder %v4637_v0, 0.0 }
 0x7c5   :  { %v2530_v45 = vmul.f32 %v2933_v38, %v2529_v19  ;;  %v2614_v19 = vld [vmem:[%s4751_s2 + $0x10] sm:$0xff] }
 0x7c6   :  { %v2518_v25 = vmul.f32 %v2935_v32, %v2517_v5 }
 0x7c7   :  { %v2531_v59 = vmul.f32 0.5, %v2530_v45 }
 0x7c8   :  { %v2519_v27 = vmul.f32 0.5, %v2518_v25 }
 0x7c9   :  { %v2532_v9 = vsub.f32 1.5, %v2531_v59  ;;  %v2616_v59 = vld [vmem:[%s4751_s2 + $0x20] sm:$0xff] }
 0x7ca   :  { %v2937_v22 = vpop.eup %2936  ;;  %v2520_v63 = vsub.f32 1.5, %v2519_v27 }
 0x7cb   :  { %v4645_v6 = vpop.xlane.xlu1 %2506  ;;  %v2541_v15 = vmul.f32 %v2937_v22, %v4637_v0  ;;  %v2533_v12 = vmul.f32 %v2933_v38, %v2532_v9 }
 0x7cc   :  { %2938 = vrsqrt.f32 %v4645_v6  ;;  %v2521_v1 = vmul.f32 %v2935_v32, %v2520_v63  ;;  %vm2559_vm15 = vcmp.eq.f32.partialorder %v4645_v6, inf  ;;  %v2612_v32 = vld [vmem:[%s4751_s2] sm:$0xff]  ;;  %vm2561_vm3 = vcmp.eq.f32.partialorder %v4645_v6, 0.0 }
 0x7cd   :  { %v2542_v26 = vmul.f32 %v2937_v22, %v2541_v15  ;;  %v2534_v11 = vmul.f32 %v2533_v12, %v4641_v62 }
 0x7ce   :  { %v2522_v14 = vmul.f32 %v2521_v1, %v4635_v44 }
 0x7cf   :  { %v2543_v20 = vmul.f32 0.5, %v2542_v26  ;;  %v2536_v56 = vsel %vm2535_vm10, %v4641_v62, %v2534_v11 }
 0x7d0   :  { %v2524_v58 = vsel %vm2523_vm11, %v4635_v44, %v2522_v14 }
 0x7d1   :  { %v2544_v35 = vsub.f32 1.5, %v2543_v20  ;;  %v2527_v38 = vsel %vm2525_vm14, %v2526_v60, %v2524_v58 }
 0x7d2   :  { %v2939_v39 = vpop.eup %2938 }
 0x7d3   :  { %v4639_v48 = vpop.xlane.xlu2 %2508  ;;  %v2553_v51 = vmul.f32 %v2939_v39, %v4645_v6  ;;  %v2545_v34 = vmul.f32 %v2937_v22, %v2544_v35  ;;  %v2562_v22 = vand.u32 2147483648, %v4645_v6 }
 0x7d4   :  { %2940 = vrsqrt.f32 %v4639_v48  ;;  %vm2571_vm1 = vcmp.eq.f32.partialorder %v4639_v48, inf  ;;  %vm2573_vm6 = vcmp.eq.f32.partialorder %v4639_v48, 0.0 }
 0x7d5   :  { %v2554_v28 = vmul.f32 %v2939_v39, %v2553_v51  ;;  %v2546_v43 = vmul.f32 %v2545_v34, %v4637_v0  ;;  %v2615_v51 = vld [vmem:[%s4751_s2 + $0x18] sm:$0xff] }
 0x7d7   :  { %v2555_v29 = vmul.f32 0.5, %v2554_v28  ;;  %v2548_v47 = vsel %vm2547_vm13, %v4637_v0, %v2546_v43 }
 0x7d9   :  { %v2556_v3 = vsub.f32 1.5, %v2555_v29 }
 0x7da   :  { %v2941_v10 = vpop.eup %2940 }
 0x7db   :  { %v2465_v49 = vpop.f32.mrf.mxu1  ;;  %v4649_v4 = vpop.xlane.xlu2 %2510  ;;  %v2565_v50 = vmul.f32 %v2941_v10, %v4639_v48  ;;  %v2557_v57 = vmul.f32 %v2939_v39, %v2556_v3 }
 0x7dc   :  { %v2466_v53 = vadd.f32 %v2803_v61, %v2465_v49  ;;  %2942 = vrsqrt.f32 %v4649_v4  ;;  %vm2583_vm5 = vcmp.eq.f32.partialorder %v4649_v4, inf  ;;  %vm2585_vm8 = vcmp.eq.f32.partialorder %v4649_v4, 0.0 }
 0x7dd   :  { %v2566_v52 = vmul.f32 %v2941_v10, %v2565_v50  ;;  %v2558_v13 = vmul.f32 %v2557_v57, %v4645_v6 }
 0x7de   :  { %2475 = vst [vmem:[#allocation20 + $0x38] sm:$0xff] %v2466_v53  ;;  %v2491_v2 = vsub.f32 %v2466_v53, %v2483_v31  ;;  %v2539_v31 = vsel %vm2537_vm12, %v2538_v21, %v2536_v56  ;;  %v2613_v53 = vld [vmem:[%s4751_s2 + $0x8] sm:$0xff] }
 0x7df   :  { %v2567_v36 = vmul.f32 0.5, %v2566_v52  ;;  %v2622_v39 = vmul.f32 %v2613_v53, %v2539_v31 }
 0x7e0   :  { %v2499_v30 = vmul.f32 %v2491_v2, %v2491_v2  ;;  %v2550_v2 = vand.u32 2147483648, %v4637_v0 }
 0x7e1   :  { %v2568_v46 = vsub.f32 1.5, %v2567_v36  ;;  %v2631_v28 = vsel %vm2629_vm4, %v2622_v39, 0.0 }
 0x7e2   :  { %2514 = vadd.xlane.f32.xlu1 %v2499_v30  ;;  %v2943_v18 = vpop.eup %2942  ;;  %v2560_v30 = vsel %vm2559_vm15, %v4645_v6, %v2558_v13  ;;  %v2551_v44 = vsel %vm2549_vm0, %v2550_v2, %v2548_v47  ;;  %v2620_v2 = vld [vmem:[#allocation21] sm:$0x1] }
 0x7e3   :  { %v4652_v54 = vpop.xlane.xlu0 %2512  ;;  %v2577_v16 = vmul.f32 %v2943_v18, %v4649_v4  ;;  %v2569_v37 = vmul.f32 %v2941_v10, %v2568_v46  ;;  %v2574_v10 = vand.u32 2147483648, %v4639_v48  ;;  %v2563_v45 = vsel %vm2561_vm3, %v2562_v22, %v2560_v30 }
 0x7e4   :  { %2944 = vrsqrt.f32 %v4652_v54  ;;  %v2623_v26 = vmul.f32 %v2614_v19, %v2551_v44  ;;  %vm2595_vm7 = vcmp.eq.f32.partialorder %v4652_v54, inf  ;;  %v2598_v20 = vand.u32 2147483648, %v4652_v54 }
 0x7e5   :  { %v2578_v7 = vmul.f32 %v2943_v18, %v2577_v16  ;;  %v2570_v41 = vmul.f32 %v2569_v37, %v4639_v48  ;;  %vm2597_vm9 = vcmp.eq.f32.partialorder %v4652_v54, 0.0 }
 0x7e6   :  { %v2633_v63 = vsel %vm2629_vm4, %v2623_v26, 0.0 }
 0x7e7   :  { %v2579_v23 = vmul.f32 0.5, %v2578_v7  ;;  %v2572_v5 = vsel %vm2571_vm1, %v4639_v48, %v2570_v41  ;;  %v2624_v48 = vmul.f32 %v2615_v51, %v2563_v45 }
 0x7e8   :  { %v2575_v50 = vsel %vm2573_vm6, %v2574_v10, %v2572_v5 }
 0x7e9   :  { %v2580_v8 = vsub.f32 1.5, %v2579_v23  ;;  %v2625_v7 = vmul.f32 %v2616_v59, %v2575_v50  ;;  %v2635_v3 = vsel %vm2629_vm4, %v2624_v48, 0.0 }
 0x7ea   :  { %v2945_v61 = vpop.eup %2944 }
 0x7eb   :  { %v2589_v17 = vmul.f32 %v2945_v61, %v4652_v54  ;;  %v2581_v55 = vmul.f32 %v2943_v18, %v2580_v8  ;;  %v2621_v18 = vmul.f32 %v2612_v32, %v2527_v38  ;;  %v2637_v46 = vsel %vm2629_vm4, %v2625_v7, 0.0  ;;  %v2619_v8 = vld [vmem:[%s4751_s2 + $0x38] sm:$0xff] }
 0x7ed   :  { %v2590_v42 = vmul.f32 %v2945_v61, %v2589_v17  ;;  %v2582_v62 = vmul.f32 %v2581_v55, %v4649_v4  ;;  %v2617_v17 = vld [vmem:[%s4751_s2 + $0x28] sm:$0xff]  ;;  %v2630_v9 = vsel %vm2629_vm4, %v2621_v18, 0.0 }
 0x7ee   :  { %v2632_v36 = vadd.f32 %v2631_v28, %v2630_v9 }
 0x7ef   :  { %v2591_v40 = vmul.f32 0.5, %v2590_v42  ;;  %v2584_v6 = vsel %vm2583_vm5, %v4649_v4, %v2582_v62 }
 0x7f0   :  { %v2634_v23 = vadd.f32 %v2633_v63, %v2632_v36 }
 0x7f1   :  { %v2592_v24 = vsub.f32 1.5, %v2591_v40 }
 0x7f2   :  { %v2636_v40 = vadd.f32 %v2635_v3, %v2634_v23 }
 0x7f3   :  { %v2593_v49 = vmul.f32 %v2945_v61, %v2592_v24  ;;  %v2586_v61 = vand.u32 2147483648, %v4649_v4  ;;  %v2618_v4 = vld [vmem:[%s4751_s2 + $0x30] sm:$0xff]  ;;  %s2664_s2 = sshll.u32 %s4763_s14, 4  ;;  %s2678_s14 = sshll.u32 %s4764_s15, 4  ;;  %s2665_s2 = int_to_ptr.hbm [resolvable:$true] %s2664_s2  ;;  %s2679_s14 = int_to_ptr.hbm [resolvable:$true] %s2678_s14 }
 0x7f4   :  { %v2638_v14 = vadd.f32 %v2637_v46, %v2636_v40  ;;  %2670 = dma.vmem_to_hbm [thread:$0]  %s2663_s17, 1024, %s2665_s2, [#allocation8], %s3204_s3, %s3204_s3, %s3205_s16  }
 0x7f5   :  { %v2594_v0 = vmul.f32 %v2593_v49, %v4652_v54  ;;  %v2587_v52 = vsel %vm2585_vm8, %v2586_v61, %v2584_v6 }
 0x7f6   :  { %v2626_v12 = vmul.f32 %v2617_v17, %v2587_v52 }
 0x7f7   :  { %v2596_v27 = vsel %vm2595_vm7, %v4652_v54, %v2594_v0 }
 0x7f8   :  { %v2599_v35 = vsel %vm2597_vm9, %v2598_v20, %v2596_v27  ;;  %v2639_v11 = vsel %vm2629_vm4, %v2626_v12, 0.0 }
 0x7f9   :  { %v2627_v34 = vmul.f32 %v2618_v4, %v2599_v35  ;;  %v2640_v56 = vadd.f32 %v2639_v11, %v2638_v14 }
 0x7fb   :  { %v2641_v37 = vsel %vm2629_vm4, %v2627_v34, 0.0 }
 0x7fc   :  { %v2642_v21 = vadd.f32 %v2641_v37, %v2640_v56 }
 0x855   :  { %v4672_v33 = vpop.xlane.xlu1 %2514 }
 0x856   :  { %2946 = vrsqrt.f32 %v4672_v33  ;;  %vm2607_vm10 = vcmp.eq.f32.partialorder %v4672_v33, inf  ;;  %v2610_v57 = vand.u32 2147483648, %v4672_v33  ;;  %vm2609_vm11 = vcmp.eq.f32.partialorder %v4672_v33, 0.0 }
 0x85c   :  { %v2947_v15 = vpop.eup %2946 }
 0x85d   :  { %v2601_v25 = vmul.f32 %v2947_v15, %v4672_v33 }
 0x85f   :  { %v2602_v16 = vmul.f32 %v2947_v15, %v2601_v25 }
 0x861   :  { %v2603_v29 = vmul.f32 0.5, %v2602_v16 }
 0x863   :  { %v2604_v42 = vsub.f32 1.5, %v2603_v29 }
 0x865   :  { %v2605_v1 = vmul.f32 %v2947_v15, %v2604_v42 }
 0x867   :  { %v2606_v54 = vmul.f32 %v2605_v1, %v4672_v33 }
 0x869   :  { %v2608_v43 = vsel %vm2607_vm10, %v4672_v33, %v2606_v54 }
 0x86a   :  { %v2611_v24 = vsel %vm2609_vm11, %v2610_v57, %v2608_v43 }
 0x86b   :  { %v2628_v60 = vmul.f32 %v2619_v8, %v2611_v24 }
 0x86d   :  { %v2643_v13 = vsel %vm2629_vm4, %v2628_v60, 0.0 }
 0x86e   :  { %v2644_v55 = vadd.f32 %v2643_v13, %v2642_v21 }
 0x870   :  { %2645 = vadd.xlane.f32.xlu2 %v2644_v55 }
 0x8e3   :  { %v2646_v33 = vpop.xlane.xlu2 %2645 }
 0x8e4   :  { %v2647_v58 = vrot.slane %v2646_v33, 4 }
 0x8e6   :  { %v2648_v47 = vadd.f32 %v2647_v58, %v2646_v33 }
 0x8e8   :  { %v2649_v41 = vrot.slane %v2648_v47, 2 }
 0x8ea   :  { %v2650_v49 = vadd.f32 %v2649_v41, %v2648_v47 }
 0x8ec   :  { %v2651_v31 = vrot.slane %v2650_v49, 1 }
 0x8ee   :  { %v2652_v53 = vadd.f32 %v2651_v31, %v2650_v49 }
 0x8f0   :  { %2783 = vpush %v2652_v53 }
 0x921   :  { %s2784_s12 = spop %2783 }
 0x922   :  { %v2654_v30 = vstv %s2784_s12 }
 0x923   :  { %v2655_v62 = vadd.f32 %v2654_v30, %v2620_v2 }
 0x925   :  { %2657 = vst.msk [vmem:[#allocation21] sm:$0x1] %vm172_vm2, %v2655_v62 }
 0x926   :  { %2681 = dma.vmem_to_hbm [thread:$0]  %s2677_s5, 16, %s2679_s14, [#allocation22]  }
 0x927   :  { %3198 = dma.done.wait [#allocation8], 1024  }
 0x928   :  { %3199 = vsyncadd [#allocation8], 4294966272 }
 0x929   :  { %3200 = dma.done.wait [#allocation22], 16  }
 0x92a   :  { %3201 = vsyncadd [#allocation22], 4294967280 }
 0x92b   :  { %2690 = vsyncpa [#allocation7], 1 }
 0x92c   :  { %2691 = vsyncpa [#allocation10], 1 }
 0x92d   :  { %2692 = vsyncpa [#allocation13], 1 }
 0x92e   :  { %2693 = vsyncpa [#allocation16], 1 }
 0x92f   :  { %2694 = vsyncpa [#allocation19], 1 }
 0x930   :  { %2695 = vsyncpa [#allocation8], 1 }
 0x931   :  { %2696 = vsyncpa [#allocation22], 1 }

</bundles_post_ra>
